<compile_context>
chip_gen: v7x
topology: tpu7x:2x2x1
jax: 0.10.0
libtpu: 0.0.40
codegen_flags: <defaults>
</compile_context>

<pallas_src>
import functools

import jax
import jax.numpy as jnp
from jax.experimental import pallas as pl
from jax.experimental.pallas import tpu as pltpu


# ---------------------------------------------------------------------------
# Kernel
# ---------------------------------------------------------------------------
def _text_encoder_kernel(
    x_ref,       # (Bt, S, D)      word embeddings for a block of batch rows
    mrow_ref,    # (Bt, 1, S)      key mask (lane-major)
    mcol_ref,    # (Bt, S, 1)      pooling mask (sublane-major)
    wqkv_ref,    # (D, 3*Hp)       fused, head-padded, scale-folded QKV weight
    bqkv_ref,    # (1, 3*Hp)
    w1_ref,      # (Hp, Qd)        additive-attention fc1 (rows head-padded)
    b1_ref,      # (1, Qd)
    w2_ref,      # (Qd, 1)
    b2_ref,      # (1, 1)  in SMEM
    out_ref,     # (1, Bt, Hp)
    *, n_heads, d_pad,
):
    Bt, S, D = x_ref.shape
    Hp = n_heads * d_pad

    # ---- fused QKV projection: one MXU matmul over Bt*S rows ----
    x2d = x_ref[...].reshape(Bt * S, D)
    qkv = jnp.dot(x2d, wqkv_ref[...], preferred_element_type=jnp.float32)
    qkv = qkv + bqkv_ref[...]                          # (Bt*S, 3*Hp)

    q = qkv[:, 0 * Hp:1 * Hp].reshape(Bt, S, Hp)       # 128-lane aligned slices
    k = qkv[:, 1 * Hp:2 * Hp].reshape(Bt, S, Hp)
    v = qkv[:, 2 * Hp:3 * Hp].reshape(Bt, S, Hp)

    key_mask = mrow_ref[...]                           # (Bt, 1, S)

    # ---- multi-head exp-normalized attention (heads unrolled, 32-aligned) ----
    ctx_heads = []
    for h in range(n_heads):
        sl = slice(h * d_pad, (h + 1) * d_pad)
        qh = q[:, :, sl]                               # (Bt, S, d_pad)
        kh = k[:, :, sl]
        vh = v[:, :, sl]
        # 1/sqrt(d_k) already folded into W_Q.
        scores = jnp.einsum("bqd,bkd->bqk", qh, kh,
                            preferred_element_type=jnp.float32)
        scores = jnp.exp(scores) * key_mask            # (Bt, S, S)
        denom = jnp.sum(scores, axis=-1, keepdims=True) + 1e-8
        attn = scores * pl.reciprocal(denom, approx=True)
        ctx_heads.append(jnp.einsum("bqk,bkd->bqd", attn, vh,
                                    preferred_element_type=jnp.float32))
    ctx = jnp.concatenate(ctx_heads, axis=-1)          # (Bt, S, Hp)

    # ---- additive attention pooling ----
    ctx2d = ctx.reshape(Bt * S, Hp)
    e = jnp.tanh(jnp.dot(ctx2d, w1_ref[...],
                         preferred_element_type=jnp.float32) + b1_ref[...])
    logits = jnp.dot(e, w2_ref[...],
                     preferred_element_type=jnp.float32) + b2_ref[0, 0]
    alpha = jnp.exp(logits).reshape(Bt, S, 1) * mcol_ref[...]   # (Bt, S, 1)
    asum = jnp.sum(alpha, axis=1, keepdims=True) + 1e-8         # (Bt, 1, 1)

    # pooled = sum_s ctx * alpha  (VPU mul + sublane reduce, no transposes)
    pooled = jnp.sum(ctx * alpha, axis=1)                        # (Bt, Hp)
    pooled = pooled * pl.reciprocal(asum, approx=True)[:, 0, :]  # (Bt, Hp)
    out_ref[0] = pooled                                          # dense store


# ---------------------------------------------------------------------------
# Host-side helpers
# ---------------------------------------------------------------------------
def _head_pad_dim(d_k, d_v, n_heads, lane=128):
    """Per-head padded width so head offsets are aligned and total % 128 == 0."""
    d = max(d_k, d_v)
    cand = -(-lane // n_heads)
    if (n_heads * cand) % lane == 0 and cand >= d:
        return cand
    return -(-d // lane) * lane


def _choose_block_b(B, S, max_rows=256):
    """Largest divisor of B keeping >=2 grid steps (megacore) and modest tiles."""
    cap = max(1, max_rows // max(S, 1))
    divisors = [d for d in range(1, B + 1) if B % d == 0 and d <= cap]
    multi = [d for d in divisors if B // d >= 2]
    return max(multi) if multi else max(divisors)


def _prepare_params(params, n_heads, d_k, d_v, d_model, d_pad):
    """Fuse Q/K/V, fold the score scale into W_Q, pad heads to d_pad lanes."""
    Hp = n_heads * d_pad
    Qd = params["w1"].shape[1]
    scale = 1.0 / jnp.sqrt(jnp.float32(d_k))

    def pad_heads(w, b, d, s):
        w = (w * s).reshape(d_model, n_heads, d)
        b = (b * s).reshape(1, n_heads, d)
        wp = jnp.zeros((d_model, n_heads, d_pad), w.dtype).at[:, :, :d].set(w)
        bp = jnp.zeros((1, n_heads, d_pad), b.dtype).at[:, :, :d].set(b)
        return wp.reshape(d_model, Hp), bp.reshape(1, Hp)

    wq, bq = pad_heads(params["wq"], params["bq"], d_k, scale)
    wk, bk = pad_heads(params["wk"], params["bk"], d_k, 1.0)
    wv, bv = pad_heads(params["wv"], params["bv"], d_v, 1.0)
    wqkv = jnp.concatenate([wq, wk, wv], axis=1)          # (D, 3*Hp)
    bqkv = jnp.concatenate([bq, bk, bv], axis=1)          # (1, 3*Hp)

    w1 = params["w1"].reshape(n_heads, d_v, Qd)
    w1p = jnp.zeros((n_heads, d_pad, Qd), w1.dtype).at[:, :d_v, :].set(w1)
    w1p = w1p.reshape(Hp, Qd)

    return {
        "wqkv": wqkv, "bqkv": bqkv,
        "w1": w1p, "b1": params["b1"],
        "w2": params["w2"], "b2": params["b2"],
    }


def text_encoder_pallas(word_emb, mask, params, *, n_heads, d_k, d_v,
                        block_b=None):
    """word_emb: (B, S, D) f32, mask: (B, S) f32 -> (B, n_heads*d_v) f32."""
    B, S, D = word_emb.shape
    Qd = params["w1"].shape[1]
    d_pad = _head_pad_dim(d_k, d_v, n_heads)
    Hp = n_heads * d_pad

    fused = _prepare_params(params, n_heads, d_k, d_v, D, d_pad)

    if block_b is None:
        block_b = _choose_block_b(B, S)
    assert B % block_b == 0, (B, block_b)
    nb = B // block_b

    maskf = mask.astype(jnp.float32)
    mask_row = maskf.reshape(B, 1, S)   # key-mask layout (lane-major)
    mask_col = maskf.reshape(B, S, 1)   # pooling-mask layout (sublane-major)

    kernel = functools.partial(
        _text_encoder_kernel, n_heads=n_heads, d_pad=d_pad)

    def full_spec(shape):
        return pl.BlockSpec(shape, lambda b: (0,) * len(shape))

    out = pl.pallas_call(
        kernel,
        out_shape=jax.ShapeDtypeStruct((nb, block_b, Hp), jnp.float32),
        grid_spec=pltpu.PrefetchScalarGridSpec(
            num_scalar_prefetch=0,
            grid=(nb,),
            in_specs=[
                pl.BlockSpec((block_b, S, D), lambda b: (b, 0, 0)),   # word_emb
                pl.BlockSpec((block_b, 1, S), lambda b: (b, 0, 0)),   # mask_row
                pl.BlockSpec((block_b, S, 1), lambda b: (b, 0, 0)),   # mask_col
                full_spec((D, 3 * Hp)),                               # W_qkv
                full_spec((1, 3 * Hp)),                               # b_qkv
                full_spec((Hp, Qd)),                                  # att_fc1 W
                full_spec((1, Qd)),                                   # att_fc1 b
                full_spec((Qd, 1)),                                   # att_fc2 W
                pl.BlockSpec(memory_space=pltpu.MemorySpace.SMEM),    # att_fc2 b
            ],
            out_specs=pl.BlockSpec((1, block_b, Hp), lambda b: (b, 0, 0)),
        ),
        compiler_params=pltpu.CompilerParams(
            dimension_semantics=("parallel",)),
    )(
        word_emb, mask_row, mask_col,
        fused["wqkv"], fused["bqkv"],
        fused["w1"], fused["b1"],
        fused["w2"], fused["b2"],
    )

    # drop the per-head zero padding (columns [d_v:d_pad] of every head).
    out = out.reshape(B, n_heads, d_pad)[:, :, :d_v].reshape(B, n_heads * d_v)
    return out


# ---------------------------------------------------------------------------
# Pure-JAX reference mirroring the PyTorch forward (eval mode)
# ---------------------------------------------------------------------------
def text_encoder_reference(word_emb, mask, params, *, n_heads, d_k, d_v):
    B, S, D = word_emb.shape
    q = word_emb @ params["wq"] + params["bq"]
    k = word_emb @ params["wk"] + params["bk"]
    v = word_emb @ params["wv"] + params["bv"]
    q = q.reshape(B, S, n_heads, d_k).transpose(0, 2, 1, 3)
    k = k.reshape(B, S, n_heads, d_k).transpose(0, 2, 1, 3)
    v = v.reshape(B, S, n_heads, d_v).transpose(0, 2, 1, 3)
    scores = jnp.exp(jnp.einsum("bhqd,bhkd->bhqk", q, k) / jnp.sqrt(d_k * 1.0))
    scores = scores * mask[:, None, None, :]
    attn = scores / (jnp.sum(scores, axis=-1, keepdims=True) + 1e-8)
    ctx = jnp.einsum("bhqk,bhkd->bhqd", attn, v)
    ctx = ctx.transpose(0, 2, 1, 3).reshape(B, S, n_heads * d_v)
    e = jnp.tanh(ctx @ params["w1"] + params["b1"])
    alpha = jnp.exp(e @ params["w2"] + params["b2"])
    alpha = alpha * mask[:, :, None]
    alpha = alpha / (jnp.sum(alpha, axis=1, keepdims=True) + 1e-8)
    return jnp.einsum("bsd,bs1->bd", ctx, alpha)


# ---------------------------------------------------------------------------
# Demo / self-test
# ---------------------------------------------------------------------------
if __name__ == "__main__":
    B = 32                  # batch (small but enough to exercise Bt batching)
    NUM_WORDS = 8           # tokens per text (text has 3*NUM_WORDS columns)
    D = 32                  # word_embedding_dim
    N_HEADS = 4             # num_attention_heads
    D_K = D_V = 20          # fixed in MultiHeadAttention(d_model, n_heads, 20, 20)
    QUERY_DIM = 32          # query_vector_dim
    VOCAB = 100

    key = jax.random.PRNGKey(0)
    keys = jax.random.split(key, 10)

    # text: (B, 3*NUM_WORDS) int token ids [ids | type | attmask] like the module.
    text_ids = jax.random.randint(keys[0], (B, NUM_WORDS), 0, VOCAB)
    text_type = jnp.zeros((B, NUM_WORDS), jnp.int32)
    text_attmask = jnp.concatenate(
        [jnp.ones((B, NUM_WORDS - 2), jnp.int32),
         jnp.zeros((B, 2), jnp.int32)], axis=1)
    text = jnp.concatenate([text_ids, text_type, text_attmask], axis=1)

    # Recover the three slices exactly as TextEncoder.forward does.
    num_words = text.shape[1] // 3
    ids = text[:, :num_words]
    attmask = text[:, 2 * num_words: 3 * num_words].astype(jnp.float32)

    # Synthetic deterministic "BERT layer-8 hidden state" (embedding lookup).
    emb_table = jax.random.normal(keys[1], (VOCAB, D), jnp.float32) * 0.1
    word_emb = emb_table[ids]                       # (B, S, D)

    def xavier(k, shape):
        fan_in, fan_out = shape
        lim = jnp.sqrt(6.0 / (fan_in + fan_out))
        return jax.random.uniform(k, shape, jnp.float32, -lim, lim)

    params = {
        "wq": xavier(keys[2], (D, N_HEADS * D_K)),
        "bq": jnp.zeros((1, N_HEADS * D_K), jnp.float32),
        "wk": xavier(keys[3], (D, N_HEADS * D_K)),
        "bk": jnp.zeros((1, N_HEADS * D_K), jnp.float32),
        "wv": xavier(keys[4], (D, N_HEADS * D_V)),
        "bv": jnp.zeros((1, N_HEADS * D_V), jnp.float32),
        "w1": xavier(keys[5], (N_HEADS * D_V, QUERY_DIM)),
        "b1": jax.random.normal(keys[6], (1, QUERY_DIM), jnp.float32) * 0.01,
        "w2": xavier(keys[7], (QUERY_DIM, 1)),
        "b2": jax.random.normal(keys[8], (1, 1), jnp.float32) * 0.01,
    }

    out = text_encoder_pallas(
        word_emb, attmask, params, n_heads=N_HEADS, d_k=D_K, d_v=D_V)
    out = jax.block_until_ready(out)

    ref = text_encoder_reference(
        word_emb, attmask, params, n_heads=N_HEADS, d_k=D_K, d_v=D_V)
    ref = jax.block_until_ready(ref)

    assert out.shape == (B, N_HEADS * D_V), out.shape
    # Slightly loose tolerance: pl.reciprocal(approx=True) is used for both
    # softmax-style normalizations.
    assert jnp.allclose(out, ref, atol=5e-3, rtol=5e-3), (
        f"max err {jnp.max(jnp.abs(out - ref))}")

    print("KERNEL_OK")
</pallas_src>

<mosaic_0001>
module attributes {stable_mosaic.version = 11 : i64} {
  func.func @_text_encoder_kernel(%arg0: i32, %arg1: memref<16x8x32xf32, #tpu.memory_space<vmem>>, %arg2: memref<16x1x8xf32, #tpu.memory_space<vmem>>, %arg3: memref<16x8x1xf32, #tpu.memory_space<vmem>>, %arg4: memref<32x384xf32, #tpu.memory_space<vmem>>, %arg5: memref<1x384xf32, #tpu.memory_space<vmem>>, %arg6: memref<128x32xf32, #tpu.memory_space<vmem>>, %arg7: memref<1x32xf32, #tpu.memory_space<vmem>>, %arg8: memref<32x1xf32, #tpu.memory_space<vmem>>, %arg9: memref<1x1xf32, #tpu.memory_space<smem>>, %arg10: memref<1x16x128xf32, #tpu.memory_space<vmem>>) attributes {dimension_semantics = [#tpu.dimension_semantics<parallel>], iteration_bounds = array<i64: 2>, scalar_prefetch = 0 : i64, scratch_operands = 0 : i64, tpu.core_type = #tpu.core_type<tc>, window_params = [{transform_indices = @transform_0, window_bounds = array<i64: 16, 8, 32>}, {transform_indices = @transform_1, window_bounds = array<i64: 16, 1, 8>}, {transform_indices = @transform_2, window_bounds = array<i64: 16, 8, 1>}, {pipeline_mode = #tpu.pipeline_mode<synchronous>, transform_indices = @transform_3, window_bounds = array<i64: 32, 384>}, {pipeline_mode = #tpu.pipeline_mode<synchronous>, transform_indices = @transform_4, window_bounds = array<i64: 1, 384>}, {pipeline_mode = #tpu.pipeline_mode<synchronous>, transform_indices = @transform_5, window_bounds = array<i64: 128, 32>}, {pipeline_mode = #tpu.pipeline_mode<synchronous>, transform_indices = @transform_6, window_bounds = array<i64: 1, 32>}, {pipeline_mode = #tpu.pipeline_mode<synchronous>, transform_indices = @transform_7, window_bounds = array<i64: 32, 1>}, {transform_indices = @transform_8, window_bounds = array<i64: 1, 1>}, {transform_indices = @transform_9, window_bounds = array<i64: 1, 16, 128>}]} {
    %c0 = arith.constant 0 : index
    %c0_0 = arith.constant 0 : index
    %c0_1 = arith.constant 0 : index
    %0 = vector.load %arg1[%c0, %c0_0, %c0_1] : memref<16x8x32xf32, #tpu.memory_space<vmem>>, vector<16x8x32xf32>
    %1 = vector.shape_cast %0 : vector<16x8x32xf32> to vector<128x32xf32>
    %c0_2 = arith.constant 0 : index
    %c0_3 = arith.constant 0 : index
    %2 = vector.load %arg4[%c0_2, %c0_3] : memref<32x384xf32, #tpu.memory_space<vmem>>, vector<32x384xf32>
    %cst = arith.constant dense<0.000000e+00> : vector<128x384xf32>
    %3 = tpu.matmul %1, %2, %cst {dimension_numbers = #tpu.dot_dimension_numbers<[1], [0], [0], [1], [0, 0, 1, 1], [], []>} : vector<128x32xf32>, vector<32x384xf32>, vector<128x384xf32> -> vector<128x384xf32>
    %c0_4 = arith.constant 0 : index
    %c0_5 = arith.constant 0 : index
    %4 = vector.load %arg5[%c0_4, %c0_5] : memref<1x384xf32, #tpu.memory_space<vmem>>, vector<1x384xf32>
    %5 = vector.broadcast %4 : vector<1x384xf32> to vector<128x384xf32>
    %6 = arith.addf %3, %5 : vector<128x384xf32>
    %7 = vector.extract_strided_slice %6 {offsets = [0, 0], sizes = [128, 128], strides = [1, 1]} : vector<128x384xf32> to vector<128x128xf32>
    %8 = vector.shape_cast %7 : vector<128x128xf32> to vector<16x8x128xf32>
    %9 = vector.extract_strided_slice %6 {offsets = [0, 128], sizes = [128, 128], strides = [1, 1]} : vector<128x384xf32> to vector<128x128xf32>
    %10 = vector.shape_cast %9 : vector<128x128xf32> to vector<16x8x128xf32>
    %11 = vector.extract_strided_slice %6 {offsets = [0, 256], sizes = [128, 128], strides = [1, 1]} : vector<128x384xf32> to vector<128x128xf32>
    %12 = vector.shape_cast %11 : vector<128x128xf32> to vector<16x8x128xf32>
    %c0_6 = arith.constant 0 : index
    %c0_7 = arith.constant 0 : index
    %c0_8 = arith.constant 0 : index
    %13 = vector.load %arg2[%c0_6, %c0_7, %c0_8] : memref<16x1x8xf32, #tpu.memory_space<vmem>>, vector<16x1x8xf32>
    %14 = vector.extract_strided_slice %8 {offsets = [0, 0, 0], sizes = [16, 8, 32], strides = [1, 1, 1]} : vector<16x8x128xf32> to vector<16x8x32xf32>
    %15 = vector.extract_strided_slice %10 {offsets = [0, 0, 0], sizes = [16, 8, 32], strides = [1, 1, 1]} : vector<16x8x128xf32> to vector<16x8x32xf32>
    %16 = vector.extract_strided_slice %12 {offsets = [0, 0, 0], sizes = [16, 8, 32], strides = [1, 1, 1]} : vector<16x8x128xf32> to vector<16x8x32xf32>
    "tpu.trace_start"() <{level = 10 : i32, message = "bqd,bkd->bqk"}> : () -> ()
    %cst_9 = arith.constant dense<0.000000e+00> : vector<16x8x8xf32>
    %17 = tpu.matmul %14, %15, %cst_9 {dimension_numbers = #tpu.dot_dimension_numbers<[2], [2], [1], [1], [0, 0, 0, 1, 1, 1], [0], [0]>} : vector<16x8x32xf32>, vector<16x8x32xf32>, vector<16x8x8xf32> -> vector<16x8x8xf32>
    "tpu.trace_stop"() : () -> ()
    %18 = math.exp %17 : vector<16x8x8xf32>
    %19 = vector.broadcast %13 : vector<16x1x8xf32> to vector<16x8x8xf32>
    %20 = arith.mulf %18, %19 : vector<16x8x8xf32>
    %cst_10 = arith.constant dense<0.000000e+00> : vector<16x8xf32>
    %21 = vector.multi_reduction <add>, %20, %cst_10 [2] : vector<16x8x8xf32> to vector<16x8xf32>
    %22 = vector.shape_cast %21 : vector<16x8xf32> to vector<16x8x1xf32>
    %cst_11 = arith.constant 9.99999993E-9 : f32
    %23 = vector.broadcast %cst_11 : f32 to vector<16x8x1xf32>
    %24 = arith.addf %22, %23 : vector<16x8x1xf32>
    %25 = tpu.reciprocal %24 {approx = true} : vector<16x8x1xf32> -> vector<16x8x1xf32>
    %26 = vector.broadcast %25 : vector<16x8x1xf32> to vector<16x8x8xf32>
    %27 = arith.mulf %20, %26 : vector<16x8x8xf32>
    "tpu.trace_start"() <{level = 10 : i32, message = "bqk,bkd->bqd"}> : () -> ()
    %cst_12 = arith.constant dense<0.000000e+00> : vector<16x8x32xf32>
    %28 = tpu.matmul %27, %16, %cst_12 {dimension_numbers = #tpu.dot_dimension_numbers<[2], [1], [1], [2], [0, 0, 0, 1, 1, 2], [0], [0]>} : vector<16x8x8xf32>, vector<16x8x32xf32>, vector<16x8x32xf32> -> vector<16x8x32xf32>
    "tpu.trace_stop"() : () -> ()
    %29 = vector.extract_strided_slice %8 {offsets = [0, 0, 32], sizes = [16, 8, 32], strides = [1, 1, 1]} : vector<16x8x128xf32> to vector<16x8x32xf32>
    %30 = vector.extract_strided_slice %10 {offsets = [0, 0, 32], sizes = [16, 8, 32], strides = [1, 1, 1]} : vector<16x8x128xf32> to vector<16x8x32xf32>
    %31 = vector.extract_strided_slice %12 {offsets = [0, 0, 32], sizes = [16, 8, 32], strides = [1, 1, 1]} : vector<16x8x128xf32> to vector<16x8x32xf32>
    "tpu.trace_start"() <{level = 10 : i32, message = "bqd,bkd->bqk"}> : () -> ()
    %cst_13 = arith.constant dense<0.000000e+00> : vector<16x8x8xf32>
    %32 = tpu.matmul %29, %30, %cst_13 {dimension_numbers = #tpu.dot_dimension_numbers<[2], [2], [1], [1], [0, 0, 0, 1, 1, 1], [0], [0]>} : vector<16x8x32xf32>, vector<16x8x32xf32>, vector<16x8x8xf32> -> vector<16x8x8xf32>
    "tpu.trace_stop"() : () -> ()
    %33 = math.exp %32 : vector<16x8x8xf32>
    %34 = vector.broadcast %13 : vector<16x1x8xf32> to vector<16x8x8xf32>
    %35 = arith.mulf %33, %34 : vector<16x8x8xf32>
    %cst_14 = arith.constant dense<0.000000e+00> : vector<16x8xf32>
    %36 = vector.multi_reduction <add>, %35, %cst_14 [2] : vector<16x8x8xf32> to vector<16x8xf32>
    %37 = vector.shape_cast %36 : vector<16x8xf32> to vector<16x8x1xf32>
    %cst_15 = arith.constant 9.99999993E-9 : f32
    %38 = vector.broadcast %cst_15 : f32 to vector<16x8x1xf32>
    %39 = arith.addf %37, %38 : vector<16x8x1xf32>
    %40 = tpu.reciprocal %39 {approx = true} : vector<16x8x1xf32> -> vector<16x8x1xf32>
    %41 = vector.broadcast %40 : vector<16x8x1xf32> to vector<16x8x8xf32>
    %42 = arith.mulf %35, %41 : vector<16x8x8xf32>
    "tpu.trace_start"() <{level = 10 : i32, message = "bqk,bkd->bqd"}> : () -> ()
    %cst_16 = arith.constant dense<0.000000e+00> : vector<16x8x32xf32>
    %43 = tpu.matmul %42, %31, %cst_16 {dimension_numbers = #tpu.dot_dimension_numbers<[2], [1], [1], [2], [0, 0, 0, 1, 1, 2], [0], [0]>} : vector<16x8x8xf32>, vector<16x8x32xf32>, vector<16x8x32xf32> -> vector<16x8x32xf32>
    "tpu.trace_stop"() : () -> ()
    %44 = vector.extract_strided_slice %8 {offsets = [0, 0, 64], sizes = [16, 8, 32], strides = [1, 1, 1]} : vector<16x8x128xf32> to vector<16x8x32xf32>
    %45 = vector.extract_strided_slice %10 {offsets = [0, 0, 64], sizes = [16, 8, 32], strides = [1, 1, 1]} : vector<16x8x128xf32> to vector<16x8x32xf32>
    %46 = vector.extract_strided_slice %12 {offsets = [0, 0, 64], sizes = [16, 8, 32], strides = [1, 1, 1]} : vector<16x8x128xf32> to vector<16x8x32xf32>
    "tpu.trace_start"() <{level = 10 : i32, message = "bqd,bkd->bqk"}> : () -> ()
    %cst_17 = arith.constant dense<0.000000e+00> : vector<16x8x8xf32>
    %47 = tpu.matmul %44, %45, %cst_17 {dimension_numbers = #tpu.dot_dimension_numbers<[2], [2], [1], [1], [0, 0, 0, 1, 1, 1], [0], [0]>} : vector<16x8x32xf32>, vector<16x8x32xf32>, vector<16x8x8xf32> -> vector<16x8x8xf32>
    "tpu.trace_stop"() : () -> ()
    %48 = math.exp %47 : vector<16x8x8xf32>
    %49 = vector.broadcast %13 : vector<16x1x8xf32> to vector<16x8x8xf32>
    %50 = arith.mulf %48, %49 : vector<16x8x8xf32>
    %cst_18 = arith.constant dense<0.000000e+00> : vector<16x8xf32>
    %51 = vector.multi_reduction <add>, %50, %cst_18 [2] : vector<16x8x8xf32> to vector<16x8xf32>
    %52 = vector.shape_cast %51 : vector<16x8xf32> to vector<16x8x1xf32>
    %cst_19 = arith.constant 9.99999993E-9 : f32
    %53 = vector.broadcast %cst_19 : f32 to vector<16x8x1xf32>
    %54 = arith.addf %52, %53 : vector<16x8x1xf32>
    %55 = tpu.reciprocal %54 {approx = true} : vector<16x8x1xf32> -> vector<16x8x1xf32>
    %56 = vector.broadcast %55 : vector<16x8x1xf32> to vector<16x8x8xf32>
    %57 = arith.mulf %50, %56 : vector<16x8x8xf32>
    "tpu.trace_start"() <{level = 10 : i32, message = "bqk,bkd->bqd"}> : () -> ()
    %cst_20 = arith.constant dense<0.000000e+00> : vector<16x8x32xf32>
    %58 = tpu.matmul %57, %46, %cst_20 {dimension_numbers = #tpu.dot_dimension_numbers<[2], [1], [1], [2], [0, 0, 0, 1, 1, 2], [0], [0]>} : vector<16x8x8xf32>, vector<16x8x32xf32>, vector<16x8x32xf32> -> vector<16x8x32xf32>
    "tpu.trace_stop"() : () -> ()
    %59 = vector.extract_strided_slice %8 {offsets = [0, 0, 96], sizes = [16, 8, 32], strides = [1, 1, 1]} : vector<16x8x128xf32> to vector<16x8x32xf32>
    %60 = vector.extract_strided_slice %10 {offsets = [0, 0, 96], sizes = [16, 8, 32], strides = [1, 1, 1]} : vector<16x8x128xf32> to vector<16x8x32xf32>
    %61 = vector.extract_strided_slice %12 {offsets = [0, 0, 96], sizes = [16, 8, 32], strides = [1, 1, 1]} : vector<16x8x128xf32> to vector<16x8x32xf32>
    "tpu.trace_start"() <{level = 10 : i32, message = "bqd,bkd->bqk"}> : () -> ()
    %cst_21 = arith.constant dense<0.000000e+00> : vector<16x8x8xf32>
    %62 = tpu.matmul %59, %60, %cst_21 {dimension_numbers = #tpu.dot_dimension_numbers<[2], [2], [1], [1], [0, 0, 0, 1, 1, 1], [0], [0]>} : vector<16x8x32xf32>, vector<16x8x32xf32>, vector<16x8x8xf32> -> vector<16x8x8xf32>
    "tpu.trace_stop"() : () -> ()
    %63 = math.exp %62 : vector<16x8x8xf32>
    %64 = vector.broadcast %13 : vector<16x1x8xf32> to vector<16x8x8xf32>
    %65 = arith.mulf %63, %64 : vector<16x8x8xf32>
    %cst_22 = arith.constant dense<0.000000e+00> : vector<16x8xf32>
    %66 = vector.multi_reduction <add>, %65, %cst_22 [2] : vector<16x8x8xf32> to vector<16x8xf32>
    %67 = vector.shape_cast %66 : vector<16x8xf32> to vector<16x8x1xf32>
    %cst_23 = arith.constant 9.99999993E-9 : f32
    %68 = vector.broadcast %cst_23 : f32 to vector<16x8x1xf32>
    %69 = arith.addf %67, %68 : vector<16x8x1xf32>
    %70 = tpu.reciprocal %69 {approx = true} : vector<16x8x1xf32> -> vector<16x8x1xf32>
    %71 = vector.broadcast %70 : vector<16x8x1xf32> to vector<16x8x8xf32>
    %72 = arith.mulf %65, %71 : vector<16x8x8xf32>
    "tpu.trace_start"() <{level = 10 : i32, message = "bqk,bkd->bqd"}> : () -> ()
    %cst_24 = arith.constant dense<0.000000e+00> : vector<16x8x32xf32>
    %73 = tpu.matmul %72, %61, %cst_24 {dimension_numbers = #tpu.dot_dimension_numbers<[2], [1], [1], [2], [0, 0, 0, 1, 1, 2], [0], [0]>} : vector<16x8x8xf32>, vector<16x8x32xf32>, vector<16x8x32xf32> -> vector<16x8x32xf32>
    "tpu.trace_stop"() : () -> ()
    %74 = tpu.concatenate %28, %43, %58, %73 in 2 : vector<16x8x32xf32>, vector<16x8x32xf32>, vector<16x8x32xf32>, vector<16x8x32xf32> -> vector<16x8x128xf32>
    %75 = vector.shape_cast %74 : vector<16x8x128xf32> to vector<128x128xf32>
    %c0_25 = arith.constant 0 : index
    %c0_26 = arith.constant 0 : index
    %76 = vector.load %arg6[%c0_25, %c0_26] : memref<128x32xf32, #tpu.memory_space<vmem>>, vector<128x32xf32>
    %cst_27 = arith.constant dense<0.000000e+00> : vector<128x32xf32>
    %77 = tpu.matmul %75, %76, %cst_27 {dimension_numbers = #tpu.dot_dimension_numbers<[1], [0], [0], [1], [0, 0, 1, 1], [], []>} : vector<128x128xf32>, vector<128x32xf32>, vector<128x32xf32> -> vector<128x32xf32>
    %c0_28 = arith.constant 0 : index
    %c0_29 = arith.constant 0 : index
    %78 = vector.load %arg7[%c0_28, %c0_29] : memref<1x32xf32, #tpu.memory_space<vmem>>, vector<1x32xf32>
    %79 = vector.broadcast %78 : vector<1x32xf32> to vector<128x32xf32>
    %80 = arith.addf %77, %79 : vector<128x32xf32>
    %81 = math.tanh %80 : vector<128x32xf32>
    %c0_30 = arith.constant 0 : index
    %c0_31 = arith.constant 0 : index
    %82 = vector.load %arg8[%c0_30, %c0_31] : memref<32x1xf32, #tpu.memory_space<vmem>>, vector<32x1xf32>
    %cst_32 = arith.constant dense<0.000000e+00> : vector<128x1xf32>
    %83 = tpu.matmul %81, %82, %cst_32 {dimension_numbers = #tpu.dot_dimension_numbers<[1], [0], [0], [1], [0, 0, 1, 1], [], []>} : vector<128x32xf32>, vector<32x1xf32>, vector<128x1xf32> -> vector<128x1xf32>
    %c0_33 = arith.constant 0 : index
    %c0_34 = arith.constant 0 : index
    %84 = memref.load %arg9[%c0_33, %c0_34] : memref<1x1xf32, #tpu.memory_space<smem>>
    %85 = vector.broadcast %84 : f32 to vector<128x1xf32>
    %86 = arith.addf %83, %85 : vector<128x1xf32>
    %87 = math.exp %86 : vector<128x1xf32>
    %88 = vector.shape_cast %87 : vector<128x1xf32> to vector<16x8x1xf32>
    %c0_35 = arith.constant 0 : index
    %c0_36 = arith.constant 0 : index
    %c0_37 = arith.constant 0 : index
    %89 = vector.load %arg3[%c0_35, %c0_36, %c0_37] : memref<16x8x1xf32, #tpu.memory_space<vmem>>, vector<16x8x1xf32>
    %90 = arith.mulf %88, %89 : vector<16x8x1xf32>
    %cst_38 = arith.constant dense<0.000000e+00> : vector<16x1xf32>
    %91 = vector.multi_reduction <add>, %90, %cst_38 [1] : vector<16x8x1xf32> to vector<16x1xf32>
    %92 = vector.shape_cast %91 : vector<16x1xf32> to vector<16x1x1xf32>
    %cst_39 = arith.constant 9.99999993E-9 : f32
    %93 = vector.broadcast %cst_39 : f32 to vector<16x1x1xf32>
    %94 = arith.addf %92, %93 : vector<16x1x1xf32>
    %95 = vector.broadcast %90 : vector<16x8x1xf32> to vector<16x8x128xf32>
    %96 = arith.mulf %74, %95 : vector<16x8x128xf32>
    %cst_40 = arith.constant dense<0.000000e+00> : vector<16x128xf32>
    %97 = vector.multi_reduction <add>, %96, %cst_40 [1] : vector<16x8x128xf32> to vector<16x128xf32>
    %98 = tpu.reciprocal %94 {approx = true} : vector<16x1x1xf32> -> vector<16x1x1xf32>
    %99 = vector.shape_cast %98 : vector<16x1x1xf32> to vector<16x1xf32>
    %100 = vector.broadcast %99 : vector<16x1xf32> to vector<16x128xf32>
    %101 = arith.mulf %97, %100 : vector<16x128xf32>
    %c0_41 = arith.constant 0 : index
    %c0_42 = arith.constant 0 : index
    %c0_43 = arith.constant 0 : index
    %102 = vector.load %arg10[%c0_41, %c0_42, %c0_43] : memref<1x16x128xf32, #tpu.memory_space<vmem>>, vector<1x16x128xf32>
    %103 = vector.shape_cast %102 : vector<1x16x128xf32> to vector<16x128xf32>
    %104 = vector.shape_cast %101 : vector<16x128xf32> to vector<1x16x128xf32>
    tpu.vector_store %arg10[%c0_41, %c0_42, %c0_43], %104 {strides = array<i32>} : memref<1x16x128xf32, #tpu.memory_space<vmem>>, vector<1x16x128xf32>,
    return
  }
  func.func @transform_0(%arg0: i32) -> (i32, i32, i32) {
    %c0_i32 = arith.constant 0 : i32
    %c0_i32_0 = arith.constant 0 : i32
    %c0_i32_1 = arith.constant 0 : i32
    return %arg0, %c0_i32, %c0_i32_0 : i32, i32, i32
  }
  func.func @transform_1(%arg0: i32) -> (i32, i32, i32) {
    %c0_i32 = arith.constant 0 : i32
    %c0_i32_0 = arith.constant 0 : i32
    %c0_i32_1 = arith.constant 0 : i32
    return %arg0, %c0_i32, %c0_i32_0 : i32, i32, i32
  }
  func.func @transform_2(%arg0: i32) -> (i32, i32, i32) {
    %c0_i32 = arith.constant 0 : i32
    %c0_i32_0 = arith.constant 0 : i32
    %c0_i32_1 = arith.constant 0 : i32
    return %arg0, %c0_i32, %c0_i32_0 : i32, i32, i32
  }
  func.func @transform_3(%arg0: i32) -> (i32, i32) {
    %c0_i32 = arith.constant 0 : i32
    %c0_i32_0 = arith.constant 0 : i32
    %c0_i32_1 = arith.constant 0 : i32
    return %c0_i32, %c0_i32_0 : i32, i32
  }
  func.func @transform_4(%arg0: i32) -> (i32, i32) {
    %c0_i32 = arith.constant 0 : i32
    %c0_i32_0 = arith.constant 0 : i32
    %c0_i32_1 = arith.constant 0 : i32
    return %c0_i32, %c0_i32_0 : i32, i32
  }
  func.func @transform_5(%arg0: i32) -> (i32, i32) {
    %c0_i32 = arith.constant 0 : i32
    %c0_i32_0 = arith.constant 0 : i32
    %c0_i32_1 = arith.constant 0 : i32
    return %c0_i32, %c0_i32_0 : i32, i32
  }
  func.func @transform_6(%arg0: i32) -> (i32, i32) {
    %c0_i32 = arith.constant 0 : i32
    %c0_i32_0 = arith.constant 0 : i32
    %c0_i32_1 = arith.constant 0 : i32
    return %c0_i32, %c0_i32_0 : i32, i32
  }
  func.func @transform_7(%arg0: i32) -> (i32, i32) {
    %c0_i32 = arith.constant 0 : i32
    %c0_i32_0 = arith.constant 0 : i32
    %c0_i32_1 = arith.constant 0 : i32
    return %c0_i32, %c0_i32_0 : i32, i32
  }
  func.func @transform_8(%arg0: i32) -> (i32, i32) {
    %c0_i32 = arith.constant 0 : i32
    %c0_i32_0 = arith.constant 0 : i32
    %c0_i32_1 = arith.constant 0 : i32
    return %c0_i32, %c0_i32_0 : i32, i32
  }
  func.func @transform_9(%arg0: i32) -> (i32, i32, i32) {
    %c0_i32 = arith.constant 0 : i32
    %c0_i32_0 = arith.constant 0 : i32
    %c0_i32_1 = arith.constant 0 : i32
    return %arg0, %c0_i32, %c0_i32_0 : i32, i32, i32
  }
}

</mosaic_0001>

<bundles_post_ra>
// kernel: tpu_custom_call.1
= control target key start
LH: loop header
LB: loop body
LE: loop exit
PB: predicated region body
PF: predicated region fallthrough
CT: control target
= control target key end

     0   :  { %s17036_s0 = inlined_call_operand.vmem [shape: f32[32,8,32], index: 0, kind: input, shape index: {}]   ;;  %s17037_s1 = inlined_call_operand.vmem [shape: f32[32,1,8], index: 1, kind: input, shape index: {}]   ;;  %s17038_s2 = inlined_call_operand.vmem [shape: f32[32,8,1], index: 2, kind: input, shape index: {}]   ;;  %s17039_s3 = inlined_call_operand.vmem [shape: f32[32,384], index: 3, kind: input, shape index: {}]   ;;  %s17040_s4 = inlined_call_operand.vmem [shape: f32[1,384], index: 4, kind: input, shape index: {}]   ;;  %s17041_s5 = inlined_call_operand.vmem [shape: f32[128,32], index: 5, kind: input, shape index: {}]   ;;  %s17042_s6 = inlined_call_operand.vmem [shape: f32[1,32], index: 6, kind: input, shape index: {}]   ;;  %s17043_s7 = inlined_call_operand.vmem [shape: f32[32,1], index: 7, kind: input, shape index: {}]   ;;  %s17044_s8 = inlined_call_operand.<no memory space> [shape: f32[1,1], index: 8, kind: input, shape index: {}]   ;;  %s17045_s9 = inlined_call_operand.hbm [shape: f32[2,16,128], index: 9, kind: output, shape index: {}]  }
   0x1   :  { %14 = sst [smem:[#allocation2]] %s17044_s8 }
   0x2   :  { %15 = vsyncpa [#allocation4], 0 }
   0x3   :  { %17 = vsyncpa [#allocation4 + $0x1], 0  ;;  %s14480_s11 = smov 0   ;;  %s14482_s12 = smov 0  }
   0x4   :  { %s14484_s13 = smov 0   ;;  %s14486_s14 = smov 0  }
   0x5 LB: > { %s14501_s8 = sadd.s32 4294967295, %s14416_s14   ;;  %s12516_s15 = sadd.s32 4294967294, %s14416_s14   ;;  %s14416_s14 = sphi %s14486_s14, %s17356_s14   ;;  %s14412_s13 = sphi %s14484_s13, %s17355_s13   ;;  %s14408_s12 = sphi %s14482_s12, %s17354_s12   ;;  %s14404_s11 = sphi %s14480_s11, %s17353_s11  }
   0x6   : > { %s14505_s16 = sadd.s32 1, %s14416_s14   ;;  %s234_s17 = sadd.s32 1, %s14412_s13 }
   0x7   : > { %s231_s18 = ssub.s32 %s14416_s14, %s14505_s16  ;;  %p244_p0 = scmp.ne.s32.totalorder %s14412_s13, %s14408_s12 }
   0x8   : > { %p232_p1 = scmp.eq.s32.totalorder %s231_s18, 0  ;;  %p245_p2 = scmp.eq.s32.totalorder %s14501_s8, 1 }
   0x9   : > { %p250_p3 = scmp.ne.s32.totalorder %s14408_s12, %s14404_s11  ;;  %p251_p4 = scmp.eq.s32.totalorder %s12516_s15, 1 }
   0xa   : > { %s14516_s19 = scalar_select %p232_p1, %s14412_s13, %s234_s17  }
   0xb   : > { %p14518_p5 = por %p245_p2, %p244_p0  ;;  %p14522_p6 = por %p251_p4, %p250_p3 }
   0xc   : > { %p12519_p7 = scmp.ge.s32.totalorder %s14416_s14, 1  ;;  %p313_p8 = scmp.lt.s32.totalorder %s14416_s14, 3 }
   0xe   : > { %p314_p9 = pnand %p12519_p7, %p313_p8 }
  0x10   : > { %317 = sbr.rel (%p314_p9) target bundleno = 3073 (0xc01), region = 56 }
  0x17   : > { %v392_v0 = vld [vmem:[%s17039_s3 + $0x8] sm:$0xff]  ;;  %v395_v1 = vld [vmem:[%s17039_s3 + $0x20] sm:$0xff]  ;;  %s12521_s28 = sshll.u32 %s14501_s8, 4  ;;  %v394_v4 = vld [vmem:[%s17039_s3 + $0x18] sm:$0xff]  ;;  %v17046_v7 = vmov 0.0   ;;  %vm420_vm0 = vcmask 261120   ;;  %v405_v35 = vlaneseq }
  0x18   : > { %v391_v2 = vld [vmem:[%s17039_s3] sm:$0xff]  ;;  %v13877_v3 = vpack.c.bf16 %v395_v1, %v392_v0  ;;  %v398_v5 = vld [vmem:[%s17039_s3 + $0x38] sm:$0xff]  ;;  %v401_v6 = vld [vmem:[%s17039_s3 + $0x50] sm:$0xff]  ;;  %533 = vmatprep.mubr.f32.mxu0 %v17046_v7  ;;  %p359_p10 = scmp.lt.s32.totalorder %s12521_s28, 31  ;;  %611 = vmatprep.mubr.f32.mxu1 %v17046_v7  ;;  %vm14419_vm1 = vmmov 0   ;;  %s14420_s29 = smov 96  }
  0x19   : > { %v13879_v8 = vpack.c.bf16 %v394_v4, %v391_v2  ;;  %v13881_v9 = vpack.c.bf16 %v401_v6, %v398_v5  ;;  %v397_v10 = vld [vmem:[%s17039_s3 + $0x30] sm:$0xff]  ;;  %v400_v11 = vld [vmem:[%s17039_s3 + $0x48] sm:$0xff]  ;;  %v399_v16 = vld [vmem:[%s17039_s3 + $0x40] sm:$0xff]  ;;  %v406_v36 = vshrl.u32 %v405_v35, 7  ;;  %vm2151_vm2 = vcmask 64512   ;;  %s14422_s22 = smov 32  }
  0x1a   : > { %v393_v12 = vld [vmem:[%s17039_s3 + $0x10] sm:$0xff]  ;;  %13878 = vmatprep.subr.bf16.mxu0 %v13877_v3  ;;  %s17358_s28 = smov (!%p359_p10, %s12521_s28), 31  ;;  %13933 = vmatprep.subr.bf16.mxu1 %v13877_v3  ;;  %v396_v13 = vld [vmem:[%s17039_s3 + $0x28] sm:$0xff]  ;;  %v13883_v14 = vpack.c.bf16 %v400_v11, %v397_v10  ;;  %v402_v17 = vld [vmem:[%s17039_s3 + $0x58] sm:$0xff]  ;;  %vm11464_vm3 = vcmask 523264   ;;  %vm11481_vm4 = vcmask 785408  }
  0x1b   : > { %13880 = vmatpush1.bf16.msra.mxu0 %v13879_v8  ;;  %13935 = vmatpush1.bf16.msra.mxu1 %v13879_v8  ;;  %s12522_s10 = sshll.u32 %s17358_s28, 3  ;;  %v13885_v15 = vpack.c.bf16 %v396_v13, %v393_v12  ;;  %v13889_v19 = vpack.c.bf16 %v402_v17, %v399_v16  ;;  %v407_v37 = vsub.s32 0, %v406_v36  ;;  %v403_v38 = vld [vmem:[%s17040_s4] sm:$0x7]  ;;  %v411_v39 = vsub.s32 1, %v406_v36  ;;  %s14966_s17 = scalar_lea.vmem %s17037_s1, %s17358_s28 }
  0x1c   : > { %13882 = vmatprep.subr.bf16.mxu0 %v13881_v9  ;;  %13934 = vmatprep.subr.bf16.mxu1 %v13881_v9  ;;  %s14569_s18 = scalar_lea.vmem %s17036_s0, %s12522_s10  ;;  %v415_v0 = vsub.s32 2, %v406_v36  ;;  %s11686_s24 = sld [smem:[#allocation2]]  ;;  %vm11945_vm5 = vcmask 7168   ;;  %vm12394_vm6 = vcmask 1041409   ;;  %vm12396_vm7 = vcmask 1042434  }
  0x1d   : > { %v375_v18 = vld [vmem:[%s14569_s18] sm:$0xff]  ;;  %v388_v20 = vld [vmem:[%s14569_s18 + $0x68] sm:$0xff]  ;;  %v389_v22 = vld [vmem:[%s14569_s18 + $0x70] sm:$0xff]  ;;  %v14648_v40 = vrot.slane %v403_v38, %v407_v37  ;;  %v14650_v41 = vrot.slane %v403_v38, %v411_v39  ;;  %s16889_s26 = scalar_lea.vmem %s17038_s2, %s12522_s10  ;;  %vm12398_vm8 = vcmask 1043459   ;;  %vm12400_vm9 = vcmask 1044484   ;;  %s355_s28 = sand.u32 1, %s14408_s12  }
  0x1e   : > { %v376_v21 = vld [vmem:[%s14569_s18 + $0x8] sm:$0xff]  ;;  %v377_v23 = vld [vmem:[%s14569_s18 + $0x10] sm:$0xff]  ;;  %v390_v24 = vld [vmem:[%s14569_s18 + $0x78] sm:$0xff]  ;;  %v14733_v6 = vrot.slane %v403_v38, %v415_v0  ;;  %vm12402_vm10 = vcmask 1045509   ;;  %s12520_s10 = sshll.u32 %s355_s28, 4  ;;  %vm12404_vm11 = vcmask 1046534  }
  0x1f   : > { %13884 = vmatpush1.bf16.msra.mxu0 %v13883_v14  ;;  %13936 = vmatpush1.bf16.msra.mxu1 %v13883_v14  ;;  %v378_v25 = vld [vmem:[%s14569_s18 + $0x18] sm:$0xff]  ;;  %v379_v26 = vld [vmem:[%s14569_s18 + $0x20] sm:$0xff]  ;;  %v380_v27 = vld [vmem:[%s14569_s18 + $0x28] sm:$0xff]  ;;  %vm12406_vm12 = vcmask 1047559   ;;  %s16973_s27 = scalar_lea.vmem [#allocation3], %s12520_s10  ;;  %s12788_s15 = sshll.u32 %s14501_s8, 8 }
  0x20   : > { %13886 = vmatprep.subr.bf16.mxu1 %v13885_v15  ;;  %13189 = vmatprep.subr.mxu0 %v17046_v7  ;;  %v381_v28 = vld [vmem:[%s14569_s18 + $0x30] sm:$0xff]  ;;  %v382_v29 = vld [vmem:[%s14569_s18 + $0x38] sm:$0xff]  ;;  %v383_v30 = vld [vmem:[%s14569_s18 + $0x40] sm:$0xff]  ;;  %s12433_s30 = sshll.u32 %s16973_s27, 4  ;;  %s16995_s8 = scalar_lea.sflag [#allocation4], %s355_s28  ;;  %s16982_s30 = int_to_ptr.vmem [resolvable:$true] %s12433_s30 }
  0x21   : > { %v384_v31 = vld [vmem:[%s14569_s18 + $0x48] sm:$0xff]  ;;  %v385_v32 = vld [vmem:[%s14569_s18 + $0x50] sm:$0xff]  ;;  %v386_v33 = vld [vmem:[%s14569_s18 + $0x58] sm:$0xff]  ;;  %s14354_s23 = scalar_lea.vmem %s16982_s30, 256 }
  0x22   : > { %12526 = vmatmul.mubr.msk.f32.vlgmr.msra.gmra.mrb[0].mxu0 %vm420_vm0, %v375_v18  ;;  %12539 = vmatmul.mubr.msk.f32.vlgmr.msra.gmra.mrb[0].mxu1 %vm420_vm0, %v388_v20  ;;  %v387_v34 = vld [vmem:[%s14569_s18 + $0x60] sm:$0xff]  ;;  %s14421_s18 = smov 64   ;;  %p14355_p11 = scmp.ne.s32.totalorder %s16982_s30, %s14354_s23 }
  0x23   : > { %539 = vmatprep.mubr.f32.mxu0 %v17046_v7  ;;  %617 = vmatprep.mubr.f32.mxu1 %v17046_v7 }
  0x24   : > { %13888 = vmatpush3.bf16.msra.mxu1 %v13885_v15  ;;  %p14356_p12 = pnand %p14355_p11, %p14518_p5 }
  0x25   : > { %13890 = vmatprep.subr.bf16.mxu1 %v13889_v19 }
  0x26   : > { %12527 = vmatmul.mubr.msk.f32.gmra.mrb[2].mxu0 %vm420_vm0, %v376_v21  ;;  %12540 = vmatmul.mubr.msk.f32.gmra.mrb[2].mxu1 %vm420_vm0, %v389_v22  ;;  %p14357_p13 = pneg %p14356_p12 }
  0x27   : > { %545 = vmatprep.mubr.f32.mxu0 %v17046_v7  ;;  %623 = vmatprep.mubr.f32.mxu1 %v17046_v7 }
  0x28   : > { %13892 = vmatpush3.bf16.msra.mxu1 %v13889_v19 }
  0x29   : > { %13149 = vmatprep.subr.mxu1 %v17046_v7 }
  0x2a   : > { %12528 = vmatmul.mubr.msk.f32.gmra.mrb[4].mxu0 %vm420_vm0, %v377_v23  ;;  %12541 = vmatmul.mubr.msk.f32.gmra.mrb[4].mxu1 %vm420_vm0, %v390_v24 }
  0x2b   : > { %551 = vmatprep.mubr.f32.mxu0 %v17046_v7  ;;  %13125 = vmatprep.mubr.msk.f32.mxu1 %vm420_vm0, %v375_v18 }
  0x2e   : > { %12529 = vmatmul.mubr.msk.f32.gmra.mrb[6].mxu0 %vm420_vm0, %v378_v25  ;;  %13126 = vmatmul.mubr.msk.f32.vlgmr.msra.gmra.mrb[6].mxu1 %vm420_vm0, %v376_v21 }
  0x2f   : > { %557 = vmatprep.mubr.f32.mxu0 %v17046_v7  ;;  %13128 = vmatprep.mubr.msk.f32.mxu1 %vm420_vm0, %v377_v23 }
  0x32   : > { %12530 = vmatmul.mubr.msk.f32.gmra.mrb[8].mxu0 %vm420_vm0, %v379_v26  ;;  %13129 = vmatmul.mubr.msk.f32.gmra.mrb[8].mxu1 %vm420_vm0, %v378_v25 }
  0x33   : > { %563 = vmatprep.mubr.f32.mxu0 %v17046_v7  ;;  %13131 = vmatprep.mubr.msk.f32.mxu1 %vm420_vm0, %v379_v26 }
  0x36   : > { %12531 = vmatmul.mubr.msk.f32.gmra.mrb[10].mxu0 %vm420_vm0, %v380_v27  ;;  %13132 = vmatmul.mubr.msk.f32.gmra.mrb[10].mxu1 %vm420_vm0, %v380_v27 }
  0x37   : > { %569 = vmatprep.mubr.f32.mxu0 %v17046_v7  ;;  %13134 = vmatprep.mubr.msk.f32.mxu1 %vm420_vm0, %v381_v28 }
  0x3a   : > { %12532 = vmatmul.mubr.msk.f32.gmra.mrb[12].mxu0 %vm420_vm0, %v381_v28  ;;  %13135 = vmatmul.mubr.msk.f32.gmra.mrb[12].mxu1 %vm420_vm0, %v382_v29 }
  0x3b   : > { %575 = vmatprep.mubr.f32.mxu0 %v17046_v7  ;;  %13137 = vmatprep.mubr.msk.f32.mxu1 %vm420_vm0, %v383_v30 }
  0x3e   : > { %12533 = vmatmul.mubr.msk.f32.gmra.mrb[14].mxu0 %vm420_vm0, %v382_v29  ;;  %13138 = vmatmul.mubr.msk.f32.gmra.mrb[14].mxu1 %vm420_vm0, %v384_v31 }
  0x3f   : > { %581 = vmatprep.mubr.f32.mxu0 %v17046_v7  ;;  %13140 = vmatprep.mubr.msk.f32.mxu1 %vm420_vm0, %v385_v32 }
  0x42   : > { %12534 = vmatmul.mubr.msk.f32.gmra.mrb[16].mxu0 %vm420_vm0, %v383_v30  ;;  %13141 = vmatmul.mubr.msk.f32.gmra.mrb[16].mxu1 %vm420_vm0, %v386_v33 }
  0x43   : > { %587 = vmatprep.mubr.f32.mxu0 %v17046_v7  ;;  %13143 = vmatprep.mubr.msk.f32.mxu1 %vm420_vm0, %v387_v34 }
  0x46   : > { %12535 = vmatmul.mubr.msk.f32.gmra.mrb[18].mxu0 %vm420_vm0, %v384_v31  ;;  %13144 = vmatmul.mubr.msk.f32.gmra.mrb[18].mxu1 %vm420_vm0, %v388_v20 }
  0x47   : > { %593 = vmatprep.mubr.f32.mxu0 %v17046_v7  ;;  %13146 = vmatprep.mubr.msk.f32.mxu1 %vm420_vm0, %v389_v22 }
  0x4a   : > { %12536 = vmatmul.mubr.msk.f32.gmra.mrb[20].mxu0 %vm420_vm0, %v385_v32  ;;  %13147 = vmatmul.mubr.msk.f32.gmra.mrb[20].mxu1 %vm420_vm0, %v390_v24 }
  0x4b   : > { %599 = vmatprep.mubr.f32.mxu0 %v17046_v7  ;;  %13151 = vmatprep.mubr.msk.f32.mxu1 %vm14419_vm1, %v17046_v7 }
  0x4e   : > { %12537 = vmatmul.mubr.msk.f32.gmra.mrb[22].mxu0 %vm420_vm0, %v386_v33 }
  0x4f   : > { %605 = vmatprep.mubr.f32.mxu0 %v17046_v7 }
  0x52   : > { %12538 = vmatmul.mubr.msk.f32.gmra.mrb[24].mxu0 %vm420_vm0, %v387_v34 }
  0x53   : > { %13191 = vmatprep.mubr.msk.f32.mxu0 %vm14419_vm1, %v17046_v7 }
  0xf5   : > { %v535_v42 = vpop.f32.mrb[0].mxu0  ;;  %v14655_v45 = vpop.f32.mrb[0].mxu1 }
  0xf6   : > { %v14653_v43 = vadd.f32 %v535_v42, %v14648_v40  ;;  %v537_v44 = vpop.f32.mrb[1].mxu0  ;;  %v14660_v47 = vpop.f32.mrb[1].mxu1 }
  0xf7   : > { %v14658_v46 = vadd.f32 %v537_v44, %v14650_v41 }
  0xf8   : > { %3416 = vrot.lane.b32.xlu1 %v14653_v43, %s14420_s29 }
  0xf9   : > { %v541_v48 = vpop.f32.mrb[2].mxu0  ;;  %3418 = vrot.lane.b32.xlu0 %v14658_v46, %s14420_s29  ;;  %13150 = vmatpush3.xpose.msk.msra.mxu1 %vm420_vm0, %v14658_v46  ;;  %v14672_v51 = vpop.f32.mrb[2].mxu1 }
  0xfa   : > { %v14669_v49 = vadd.f32 %v541_v48, %v14648_v40  ;;  %v543_v50 = vpop.f32.mrb[3].mxu0  ;;  %13154 = vmatprep.subr.mxu1 %v17046_v7  ;;  %v14677_v53 = vpop.f32.mrb[3].mxu1 }
  0xfb   : > { %v14675_v52 = vadd.f32 %v543_v50, %v14650_v41 }
  0xfc   : > { %17130 = vst [vmem:[#allocation6_spill] sm:$0xff] %v14669_v49  ;;  %13152 = vmatmul.mubr.msk.f32.vlgmr.msra.gmra.mrb[22].mxu1 %vm420_vm0, %v14653_v43  ;;  %3494 = vrot.lane.b32.xlu1 %v14669_v49, %s14420_s29 }
  0xfd   : > { %17131 = vst [vmem:[#allocation7_spill] sm:$0xff] %v14675_v52  ;;  %v547_v54 = vpop.f32.mrb[4].mxu0  ;;  %13155 = vmatpush3.xpose.msk.msra.mxu1 %vm420_vm0, %v14675_v52  ;;  %13156 = vmatprep.mubr.msk.f32.mxu1 %vm14419_vm1, %v17046_v7  ;;  %v14691_v57 = vpop.f32.mrb[4].mxu1 }
  0xfe   : > { %v14688_v55 = vadd.f32 %v547_v54, %v14648_v40  ;;  %v549_v56 = vpop.f32.mrb[5].mxu0  ;;  %13159 = vmatprep.subr.mxu1 %v17046_v7  ;;  %v14696_v59 = vpop.f32.mrb[5].mxu1 }
  0xff   : > { %v14694_v58 = vadd.f32 %v549_v56, %v14650_v41 }
 0x100   : > { %17132 = vst [vmem:[#allocation8_spill] sm:$0xff] %v14688_v55  ;;  %13157 = vmatmul.mubr.msk.f32.vlgmr.msra.gmra.mrb[24].mxu1 %vm420_vm0, %v14669_v49  ;;  %3572 = vrot.lane.b32.xlu0 %v14688_v55, %s14420_s29 }
 0x101   : > { %v553_v60 = vpop.f32.mrb[6].mxu0  ;;  %13160 = vmatpush3.xpose.msk.msra.mxu1 %vm420_vm0, %v14694_v58  ;;  %13161 = vmatprep.mubr.msk.f32.mxu1 %vm14419_vm1, %v17046_v7  ;;  %v14719_v1 = vpop.f32.mrb[6].mxu1 }
 0x102   : > { %v14707_v61 = vadd.f32 %v553_v60, %v14648_v40  ;;  %v555_v62 = vpop.f32.mrb[7].mxu0  ;;  %13164 = vmatprep.subr.mxu1 %v17046_v7  ;;  %3496 = vrot.lane.b32.xlu1 %v14675_v52, %s14420_s29  ;;  %v14725_v3 = vpop.f32.mrb[7].mxu1 }
 0x103   : > { %v14713_v63 = vadd.f32 %v555_v62, %v14650_v41 }
 0x104   : > { %17133 = vst [vmem:[#allocation9_spill] sm:$0xff] %v14707_v61  ;;  %13162 = vmatmul.mubr.msk.f32.vlgmr.msra.gmra.mrb[26].mxu1 %vm420_vm0, %v14688_v55  ;;  %3574 = vrot.lane.b32.xlu0 %v14694_v58, %s14420_s29 }
 0x105   : > { %17134 = vst [vmem:[#allocation10_spill] sm:$0xff] %v14713_v63  ;;  %v559_v2 = vpop.f32.mrb[8].mxu0  ;;  %13165 = vmatpush3.xpose.msk.msra.mxu1 %vm420_vm0, %v14713_v63  ;;  %13166 = vmatprep.mubr.msk.f32.mxu1 %vm14419_vm1, %v17046_v7  ;;  %v13130_v8 = vpop.f32.mrb[8].mxu1 }
 0x106   : > { %v14728_v4 = vadd.f32 %v559_v2, %v14648_v40  ;;  %v561_v5 = vpop.f32.mrb[9].mxu0  ;;  %13169 = vmatprep.subr.mxu1 %v17046_v7  ;;  %3650 = vrot.lane.b32.xlu1 %v14707_v61, %s14420_s29  ;;  %v706_v10 = vpop.f32.mrb[9].mxu1  ;;  %v14743_v11 = vadd.f32 %v13130_v8, %v14733_v6 }
 0x107   : > { %v14736_v9 = vadd.f32 %v561_v5, %v14650_v41  ;;  %v14750_v13 = vadd.f32 %v706_v10, %v14733_v6 }
 0x108   : > { %17135 = vst [vmem:[#allocation11_spill] sm:$0xff] %v14728_v4  ;;  %13167 = vmatmul.mubr.msk.f32.vlgmr.msra.gmra.mrb[28].mxu1 %vm420_vm0, %v14707_v61  ;;  %3728 = vrot.lane.b32.xlu0 %v14728_v4, %s14420_s29  ;;  %17137 = vst [vmem:[#allocation13_spill] sm:$0xff] %v14743_v11 }
 0x109   : > { %17136 = vst [vmem:[#allocation12_spill] sm:$0xff] %v14736_v9  ;;  %v565_v12 = vpop.f32.mrb[10].mxu0  ;;  %13170 = vmatpush3.xpose.msk.msra.mxu1 %vm420_vm0, %v14736_v9  ;;  %13171 = vmatprep.mubr.msk.f32.mxu1 %vm14419_vm1, %v17046_v7  ;;  %17138 = vst [vmem:[#allocation14_spill] sm:$0xff] %v14750_v13  ;;  %v13133_v16 = vpop.f32.mrb[10].mxu1 }
 0x10a   : > { %v14753_v14 = vadd.f32 %v565_v12, %v14648_v40  ;;  %v567_v15 = vpop.f32.mrb[11].mxu0  ;;  %13174 = vmatprep.subr.mxu1 %v17046_v7  ;;  %3652 = vrot.lane.b32.xlu1 %v14713_v63, %s14420_s29  ;;  %v14762_v18 = vadd.f32 %v13133_v16, %v14733_v6  ;;  %v716_v19 = vpop.f32.mrb[11].mxu1 }
 0x10b   : > { %v14759_v17 = vadd.f32 %v567_v15, %v14650_v41  ;;  %v14769_v20 = vadd.f32 %v716_v19, %v14733_v6 }
 0x10c   : > { %17139 = vst [vmem:[#allocation15_spill] sm:$0xff] %v14753_v14  ;;  %17141 = vst [vmem:[#allocation17_spill] sm:$0xff] %v14762_v18  ;;  %13172 = vmatmul.mubr.msk.f32.vlgmr.msra.gmra.mrb[30].mxu1 %vm420_vm0, %v14728_v4  ;;  %3730 = vrot.lane.b32.xlu0 %v14736_v9, %s14420_s29 }
 0x10d   : > { %17140 = vst [vmem:[#allocation16_spill] sm:$0xff] %v14759_v17  ;;  %17142 = vst [vmem:[#allocation18_spill] sm:$0xff] %v14769_v20  ;;  %v571_v21 = vpop.f32.mrb[12].mxu0  ;;  %13175 = vmatpush3.xpose.msk.msra.mxu1 %vm420_vm0, %v14759_v17  ;;  %13176 = vmatprep.mubr.msk.f32.mxu1 %vm14419_vm1, %v17046_v7  ;;  %v13136_v23 = vpop.f32.mrb[12].mxu1 }
 0x10e   : > { %v573_v22 = vpop.f32.mrb[13].mxu0  ;;  %13179 = vmatprep.subr.mxu1 %v17046_v7  ;;  %3806 = vrot.lane.b32.xlu1 %v14753_v14, %s14420_s29  ;;  %v14782_v25 = vadd.f32 %v13136_v23, %v14733_v6  ;;  %v726_v26 = vpop.f32.mrb[13].mxu1  ;;  %v14794_v29 = vadd.f32 %v571_v21, %v14648_v40 }
 0x10f   : > { %v14779_v24 = vadd.f32 %v573_v22, %v14650_v41  ;;  %v14787_v27 = vadd.f32 %v726_v26, %v14733_v6 }
 0x110   : > { %17144 = vst [vmem:[#allocation20_spill] sm:$0xff] %v14782_v25  ;;  %13177 = vmatmul.mubr.msk.f32.vlgmr.msra.gmra.mrb[32].mxu1 %vm420_vm0, %v14753_v14  ;;  %17146 = vst [vmem:[#allocation22_spill] sm:$0xff] %v14794_v29 }
 0x111   : > { %17143 = vst [vmem:[#allocation19_spill] sm:$0xff] %v14779_v24  ;;  %17145 = vst [vmem:[#allocation21_spill] sm:$0xff] %v14787_v27  ;;  %v577_v28 = vpop.f32.mrb[14].mxu0  ;;  %13180 = vmatpush3.xpose.msk.msra.mxu1 %vm420_vm0, %v14779_v24  ;;  %13181 = vmatprep.mubr.msk.f32.mxu1 %vm14419_vm1, %v17046_v7  ;;  %v13139_v31 = vpop.f32.mrb[14].mxu1 }
 0x112   : > { %v579_v30 = vpop.f32.mrb[15].mxu0  ;;  %13184 = vmatprep.subr.mxu1 %v17046_v7  ;;  %3808 = vrot.lane.b32.xlu1 %v14759_v17, %s14420_s29  ;;  %v14803_v33 = vadd.f32 %v13139_v31, %v14733_v6  ;;  %v736_v34 = vpop.f32.mrb[15].mxu1  ;;  %v14815_v37 = vadd.f32 %v577_v28, %v14648_v40 }
 0x113   : > { %v14800_v32 = vadd.f32 %v579_v30, %v14650_v41  ;;  %v14808_v35 = vadd.f32 %v736_v34, %v14733_v6 }
 0x114   : > { %13182 = vmatmul.mubr.msk.f32.vlgmr.msra.gmra.mrb[34].mxu1 %vm420_vm0, %v14794_v29  ;;  %17148 = vst [vmem:[#allocation24_spill] sm:$0xff] %v14815_v37 }
 0x115   : > { %17147 = vst [vmem:[#allocation23_spill] sm:$0xff] %v14800_v32  ;;  %v583_v36 = vpop.f32.mrb[16].mxu0  ;;  %13185 = vmatpush3.xpose.msk.msra.mxu1 %vm420_vm0, %v14800_v32  ;;  %13186 = vmatprep.mubr.msk.f32.mxu1 %vm14419_vm1, %v17046_v7  ;;  %v13142_v39 = vpop.f32.mrb[16].mxu1 }
 0x116   : > { %v585_v38 = vpop.f32.mrb[17].mxu0  ;;  %13194 = vmatprep.subr.mxu1 %v17046_v7  ;;  %v14822_v44 = vadd.f32 %v13142_v39, %v14733_v6  ;;  %v746_v48 = vpop.f32.mrb[17].mxu1  ;;  %v14834_v56 = vadd.f32 %v583_v36, %v14648_v40  ;;  %v14886_v36 = vadd.f32 %v14660_v47, %v14650_v41  ;;  %v14910_v47 = vadd.f32 %v14677_v53, %v14650_v41 }
 0x117   : > { %v14819_v42 = vadd.f32 %v585_v38, %v14650_v41  ;;  %v14827_v50 = vadd.f32 %v746_v48, %v14733_v6  ;;  %v14938_v53 = vadd.f32 %v14725_v3, %v14733_v6 }
 0x118   : > { %13187 = vmatmul.mubr.msk.f32.vlgmr.msra.gmra.mrb[36].mxu1 %vm420_vm0, %v14815_v37  ;;  %17150 = vst [vmem:[#allocation26_spill] sm:$0xff] %v14834_v56  ;;  %17157 = vst [vmem:[#allocation33_spill] sm:$0xff] %v14910_v47 }
 0x119   : > { %17149 = vst [vmem:[#allocation25_spill] sm:$0xff] %v14819_v42  ;;  %v589_v54 = vpop.f32.mrb[18].mxu0  ;;  %13190 = vmatpush3.xpose.msk.msra.mxu0 %vm420_vm0, %v14819_v42  ;;  %13196 = vmatprep.mubr.msk.f32.mxu1 %vm14419_vm1, %v17046_v7  ;;  %v13145_v62 = vpop.f32.mrb[18].mxu1  ;;  %17159 = vst [vmem:[#allocation35_spill] sm:$0xff] %v14938_v53 }
 0x11a   : > { %v591_v60 = vpop.f32.mrb[19].mxu0  ;;  %13199 = vmatprep.subr.mxu0 %v17046_v7  ;;  %v14841_v2 = vadd.f32 %v13145_v62, %v14733_v6  ;;  %v756_v5 = vpop.f32.mrb[19].mxu1  ;;  %v14853_v12 = vadd.f32 %v589_v54, %v14648_v40  ;;  %v14917_v62 = vadd.f32 %v14696_v59, %v14650_v41 }
 0x11b   : > { %v14838_v0 = vadd.f32 %v591_v60, %v14650_v41  ;;  %v14846_v8 = vadd.f32 %v756_v5, %v14733_v6  ;;  %v14902_v60 = vadd.f32 %v14655_v45, %v14648_v40  ;;  %v14924_v45 = vadd.f32 %v14672_v51, %v14648_v40 }
 0x11c   : > { %13192 = vmatmul.mubr.msk.f32.vlgmr.msra.gmra.mrb[26].mxu0 %vm420_vm0, %v14834_v56  ;;  %v14946_v51 = vadd.f32 %v14719_v1, %v14733_v6 }
 0x11d   : > { %v595_v10 = vpop.f32.mrb[20].mxu0  ;;  %13195 = vmatpush3.xpose.msk.msra.mxu1 %vm420_vm0, %v14838_v0  ;;  %13201 = vmatprep.mubr.msk.f32.mxu0 %vm14419_vm1, %v17046_v7  ;;  %v13148_v16 = vpop.f32.mrb[20].mxu1  ;;  %17158 = vst [vmem:[#allocation34_spill] sm:$0xff] %v14924_v45 }
 0x11e   : > { %v597_v15 = vpop.f32.mrb[21].mxu0  ;;  %13204 = vmatprep.subr.mxu1 %v17046_v7  ;;  %v14860_v21 = vadd.f32 %v13148_v16, %v14733_v6  ;;  %v766_v22 = vpop.f32.mrb[21].mxu1  ;;  %v14872_v28 = vadd.f32 %v595_v10, %v14648_v40  ;;  %17160 = vst [vmem:[#allocation36_spill] sm:$0xff] %v14946_v51  ;;  %v14969_v16 = vld [vmem:[%s14966_s17] ss:$0 sm:$0xff] }
 0x11f   : > { %v14857_v19 = vadd.f32 %v597_v15, %v14650_v41  ;;  %v14865_v23 = vadd.f32 %v766_v22, %v14733_v6  ;;  %17161 = vst [vmem:[#allocation37_spill] sm:$0xff] %v14969_v16 }
 0x120   : > { %17152 = vst [vmem:[#allocation28_spill] sm:$0xff] %v14860_v21  ;;  %13197 = vmatmul.mubr.msk.f32.vlgmr.msra.gmra.mrb[38].mxu1 %vm420_vm0, %v14853_v12  ;;  %17154 = vst [vmem:[#allocation30_spill] sm:$0xff] %v14872_v28 }
 0x121   : > { %17151 = vst [vmem:[#allocation27_spill] sm:$0xff] %v14857_v19  ;;  %17153 = vst [vmem:[#allocation29_spill] sm:$0xff] %v14865_v23  ;;  %v601_v26 = vpop.f32.mrb[22].mxu0  ;;  %13200 = vmatpush3.xpose.msk.msra.mxu0 %vm420_vm0, %v14857_v19  ;;  %13206 = vmatprep.mubr.msk.f32.mxu1 %vm14419_vm1, %v17046_v7 }
 0x122   : > { %v603_v30 = vpop.f32.mrb[23].mxu0  ;;  %13209 = vmatprep.subr.mxu0 %v17046_v7  ;;  %v14889_v38 = vadd.f32 %v601_v26, %v14648_v40 }
 0x123   : > { %v14876_v31 = vadd.f32 %v603_v30, %v14650_v41 }
 0x124   : > { %13202 = vmatmul.mubr.msk.f32.vlgmr.msra.gmra.mrb[28].mxu0 %vm420_vm0, %v14872_v28 }
 0x125   : > { %17155 = vst [vmem:[#allocation31_spill] sm:$0xff] %v14876_v31  ;;  %v607_v34 = vpop.f32.mrb[24].mxu0  ;;  %13205 = vmatpush3.xpose.msk.msra.mxu1 %vm420_vm0, %v14876_v31  ;;  %13211 = vmatprep.mubr.msk.f32.mxu0 %vm14419_vm1, %v17046_v7 }
 0x126   : > { %v609_v39 = vpop.f32.mrb[25].mxu0  ;;  %13214 = vmatprep.subr.mxu1 %v17046_v7  ;;  %v14896_v54 = vadd.f32 %v607_v34, %v14648_v40 }
 0x127   : > { %v14893_v48 = vadd.f32 %v609_v39, %v14650_v41  ;;  %v14934_v41 = vadd.f32 %v14691_v57, %v14648_v40 }
 0x128   : > { %13207 = vmatmul.mubr.msk.f32.vlgmr.msra.gmra.mrb[40].mxu1 %vm420_vm0, %v14889_v38 }
 0x129   : > { %17156 = vst [vmem:[#allocation32_spill] sm:$0xff] %v14893_v48  ;;  %13210 = vmatpush3.xpose.msk.msra.mxu0 %vm420_vm0, %v14893_v48  ;;  %13215 = vmatpush3.xpose.msk.msra.mxu1 %vm420_vm0, %v14886_v36 }
 0x12a   : > { %13216 = vmatprep.mubr.msk.f32.mxu1 %vm14419_vm1, %v17046_v7  ;;  %13219 = vmatprep.subr.mxu0 %v17046_v7 }
 0x12b   : > { %13224 = vmatprep.subr.mxu1 %v17046_v7 }
 0x12c   : > { %13212 = vmatmul.mubr.msk.f32.vlgmr.msra.gmra.mrb[30].mxu0 %vm420_vm0, %v14896_v54  ;;  %13217 = vmatmul.mubr.msk.f32.vlgmr.msra.gmra.mrb[42].mxu1 %vm420_vm0, %v14902_v60 }
 0x12d   : > { %13220 = vmatpush3.xpose.msk.msra.mxu0 %vm420_vm0, %v14910_v47  ;;  %13221 = vmatprep.mubr.msk.f32.mxu0 %vm14419_vm1, %v17046_v7 }
 0x12e   : > { %13225 = vmatpush3.xpose.msk.msra.mxu1 %vm420_vm0, %v14917_v62  ;;  %13226 = vmatprep.mubr.msk.f32.mxu1 %vm14419_vm1, %v17046_v7 }
 0x12f   : > { %13229 = vmatprep.subr.mxu0 %v17046_v7  ;;  %13234 = vmatprep.subr.mxu1 %v17046_v7 }
 0x130   : > { %13222 = vmatmul.mubr.msk.f32.vlgmr.msra.gmra.mrb[32].mxu0 %vm420_vm0, %v14924_v45 }
 0x131   : > { %13227 = vmatmul.mubr.msk.f32.vlgmr.msra.gmra.mrb[44].mxu1 %vm420_vm0, %v14934_v41  ;;  %13230 = vmatpush3.msra.mxu0 %v14938_v53 }
 0x132   : > { %13235 = vmatpush3.msra.mxu1 %v14946_v51  ;;  %13231 = vmatprep.mubr.msk.f32.mxu0 %vm14419_vm1, %v17046_v7 }
 0x133   : > { %13239 = vmatprep.subr.mxu0 %v17046_v7  ;;  %13236 = vmatprep.mubr.msk.f32.mxu1 %vm14419_vm1, %v17046_v7 }
 0x134   : > { %13244 = vmatprep.subr.mxu1 %v17046_v7 }
 0x1cf   : > { %v863_v40 = vpop.f32.mrb[22].mxu1 }
 0x1d0   : > { %v2007_v57 = vmul.f32 1.442695, %v863_v40  ;;  %v13153_v59 = vpop.f32.mrb[23].mxu1  ;;  %v14975_v40 = vld [vmem:[%s14966_s17 + $0x1] ss:$0 sm:$0xff] }
 0x1d1   : > { %17162 = vst [vmem:[#allocation38_spill] sm:$0xff] %v14975_v40 }
 0x1d2   : > { %13986 = vpow2.f32 %v2007_v57 }
 0x1d3   : > { %v939_v1 = vpop.f32.mrb[24].mxu1 }
 0x1d4   : > { %v2009_v3 = vmul.f32 1.442695, %v939_v1  ;;  %v13158_v6 = vpop.f32.mrb[25].mxu1 }
 0x1d6   : > { %13988 = vpow2.f32 %v2009_v3 }
 0x1d7   : > { %v1015_v5 = vpop.f32.mrb[26].mxu1 }
 0x1d8   : > { %v2011_v10 = vmul.f32 1.442695, %v1015_v5  ;;  %v13163_v15 = vpop.f32.mrb[27].mxu1 }
 0x1da   : > { %13990 = vpow2.f32 %v2011_v10  ;;  %v14983_v10 = vld [vmem:[%s14966_s17 + $0x2] ss:$0 sm:$0xff] }
 0x1db   : > { %v1091_v22 = vpop.f32.mrb[28].mxu1  ;;  %17163 = vst [vmem:[#allocation39_spill] sm:$0xff] %v14983_v10 }
 0x1dc   : > { %v13987_v26 = vpop.eup %13986  ;;  %v2013_v30 = vmul.f32 1.442695, %v1091_v22  ;;  %v13168_v34 = vpop.f32.mrb[29].mxu1 }
 0x1dd   : > { %v14972_v39 = vmul.f32 %v13987_v26, %v14969_v16 }
 0x1de   : > { %13992 = vpow2.f32 %v2013_v30 }
 0x1df   : > { %v1167_v57 = vpop.f32.mrb[30].mxu1  ;;  %v2152_v59 = vsel %vm2151_vm2, %v14972_v39, 0.0 }
 0x1e0   : > { %v13989_v1 = vpop.eup %13988  ;;  %v2015_v3 = vmul.f32 1.442695, %v1167_v57  ;;  %2153 = vadd.xlane.f32.xlu0 %v2152_v59  ;;  %v13173_v6 = vpop.f32.mrb[31].mxu1  ;;  %v14991_v57 = vld [vmem:[%s14966_s17 + $0x3] ss:$0 sm:$0xff] }
 0x1e1   : > { %v14980_v5 = vmul.f32 %v13989_v1, %v14975_v40  ;;  %17164 = vst [vmem:[#allocation40_spill] sm:$0xff] %v14991_v57 }
 0x1e2   : > { %13994 = vpow2.f32 %v2015_v3 }
 0x1e3   : > { %v1243_v15 = vpop.f32.mrb[32].mxu1  ;;  %v2155_v22 = vsel %vm2151_vm2, %v14980_v5, 0.0 }
 0x1e4   : > { %v13991_v26 = vpop.eup %13990  ;;  %v2017_v30 = vmul.f32 1.442695, %v1243_v15  ;;  %2156 = vadd.xlane.f32.xlu0 %v2155_v22  ;;  %v13178_v34 = vpop.f32.mrb[33].mxu1  ;;  %v14999_v15 = vld [vmem:[%s14966_s17 + $0x4] ss:$0 sm:$0xff] }
 0x1e5   : > { %v14988_v7 = vmul.f32 %v13991_v26, %v14983_v10  ;;  %17165 = vst [vmem:[#allocation41_spill] sm:$0xff] %v14999_v15 }
 0x1e6   : > { %13996 = vpow2.f32 %v2017_v30 }
 0x1e7   : > { %v1319_v59 = vpop.f32.mrb[34].mxu1  ;;  %v2158_v1 = vsel %vm2151_vm2, %v14988_v7, 0.0 }
 0x1e8   : > { %v13993_v3 = vpop.eup %13992  ;;  %v2019_v6 = vmul.f32 1.442695, %v1319_v59  ;;  %2159 = vadd.xlane.f32.xlu1 %v2158_v1  ;;  %v13183_v40 = vpop.f32.mrb[35].mxu1 }
 0x1e9   : > { %v14996_v16 = vmul.f32 %v13993_v3, %v14991_v57  ;;  %v15007_v40 = vld [vmem:[%s14966_s17 + $0x5] ss:$0 sm:$0xff] }
 0x1ea   : > { %13998 = vpow2.f32 %v2019_v6  ;;  %17166 = vst [vmem:[#allocation42_spill] sm:$0xff] %v15007_v40 }
 0x1eb   : > { %v1395_v22 = vpop.f32.mrb[36].mxu1  ;;  %v2161_v26 = vsel %vm2151_vm2, %v14996_v16, 0.0 }
 0x1ec   : > { %v13995_v30 = vpop.eup %13994  ;;  %v2021_v34 = vmul.f32 1.442695, %v1395_v22  ;;  %2162 = vadd.xlane.f32.xlu1 %v2161_v26  ;;  %v13188_v10 = vpop.f32.mrb[37].mxu1 }
 0x1ed   : > { %v15004_v14 = vmul.f32 %v13995_v30, %v14999_v15  ;;  %v15015_v10 = vld [vmem:[%s14966_s17 + $0x6] ss:$0 sm:$0xff] }
 0x1ee   : > { %14000 = vpow2.f32 %v2021_v34  ;;  %17167 = vst [vmem:[#allocation43_spill] sm:$0xff] %v15015_v10 }
 0x1ef   : > { %v1471_v59 = vpop.f32.mrb[26].mxu0  ;;  %v2164_v1 = vsel %vm2151_vm2, %v15004_v14, 0.0 }
 0x1f0   : > { %v13997_v3 = vpop.eup %13996  ;;  %v2023_v6 = vmul.f32 1.442695, %v1471_v59  ;;  %2165 = vadd.xlane.f32.xlu0 %v2164_v1  ;;  %v13193_v57 = vpop.f32.mrb[27].mxu0 }
 0x1f1   : > { %v15012_v17 = vmul.f32 %v13997_v3, %v15007_v40  ;;  %v15023_v57 = vld [vmem:[%s14966_s17 + $0x7] ss:$0 sm:$0xff] }
 0x1f2   : > { %14002 = vpow2.f32 %v2023_v6  ;;  %17168 = vst [vmem:[#allocation44_spill] sm:$0xff] %v15023_v57 }
 0x1f3   : > { %v1547_v22 = vpop.f32.mrb[38].mxu1  ;;  %v2167_v26 = vsel %vm2151_vm2, %v15012_v17, 0.0 }
 0x1f4   : > { %v13999_v30 = vpop.eup %13998  ;;  %v2025_v34 = vmul.f32 1.442695, %v1547_v22  ;;  %2168 = vadd.xlane.f32.xlu1 %v2167_v26  ;;  %v13198_v15 = vpop.f32.mrb[39].mxu1 }
 0x1f5   : > { %v15020_v61 = vmul.f32 %v13999_v30, %v15015_v10  ;;  %v15031_v15 = vld [vmem:[%s14966_s17 + $0x8] ss:$0 sm:$0xff] }
 0x1f6   : > { %14004 = vpow2.f32 %v2025_v34  ;;  %17169 = vst [vmem:[#allocation45_spill] sm:$0xff] %v15031_v15 }
 0x1f7   : > { %v1623_v59 = vpop.f32.mrb[28].mxu0  ;;  %v2170_v1 = vsel %vm2151_vm2, %v15020_v61, 0.0 }
 0x1f8   : > { %v14001_v3 = vpop.eup %14000  ;;  %v2027_v6 = vmul.f32 1.442695, %v1623_v59  ;;  %2171 = vadd.xlane.f32.xlu0 %v2170_v1  ;;  %v13203_v40 = vpop.f32.mrb[29].mxu0 }
 0x1f9   : > { %v15028_v63 = vmul.f32 %v14001_v3, %v15023_v57  ;;  %v15039_v40 = vld [vmem:[%s14966_s17 + $0x9] ss:$0 sm:$0xff] }
 0x1fa   : > { %14006 = vpow2.f32 %v2027_v6  ;;  %17170 = vst [vmem:[#allocation46_spill] sm:$0xff] %v15039_v40 }
 0x1fb   : > { %v1699_v22 = vpop.f32.mrb[40].mxu1  ;;  %v2173_v26 = vsel %vm2151_vm2, %v15028_v63, 0.0 }
 0x1fc   : > { %v14003_v30 = vpop.eup %14002  ;;  %v2029_v34 = vmul.f32 1.442695, %v1699_v22  ;;  %2174 = vadd.xlane.f32.xlu1 %v2173_v26  ;;  %v13208_v10 = vpop.f32.mrb[41].mxu1 }
 0x1fd   : > { %v15036_v49 = vmul.f32 %v14003_v30, %v15031_v15  ;;  %v15047_v10 = vld [vmem:[%s14966_s17 + $0xa] ss:$0 sm:$0xff] }
 0x1fe   : > { %14008 = vpow2.f32 %v2029_v34  ;;  %17171 = vst [vmem:[#allocation47_spill] sm:$0xff] %v15047_v10 }
 0x1ff   : > { %v1775_v59 = vpop.f32.mrb[30].mxu0  ;;  %v2176_v1 = vsel %vm2151_vm2, %v15036_v49, 0.0  ;;  %v1851_v3 = vpop.f32.mrb[42].mxu1 }
 0x200   : > { %v14005_v6 = vpop.eup %14004  ;;  %v2031_v57 = vmul.f32 1.442695, %v1775_v59  ;;  %2177 = vadd.xlane.f32.xlu0 %v2176_v1  ;;  %v13213_v52 = vpop.f32.mrb[31].mxu0  ;;  %v15055_v1 = vld [vmem:[%s14966_s17 + $0xb] ss:$0 sm:$0xff] }
 0x201   : > { %v13218_v22 = vpop.f32.mrb[43].mxu1  ;;  %v15044_v26 = vmul.f32 %v14005_v6, %v15039_v40  ;;  %17172 = vst [vmem:[#allocation48_spill] sm:$0xff] %v15055_v1  ;;  %v15063_v40 = vld [vmem:[%s14966_s17 + $0xc] ss:$0 sm:$0xff] }
 0x202   : > { %14010 = vpow2.f32 %v2031_v57  ;;  %17173 = vst [vmem:[#allocation49_spill] sm:$0xff] %v15063_v40 }
 0x203   : > { %v2179_v30 = vsel %vm2151_vm2, %v15044_v26, 0.0  ;;  %v1927_v34 = vpop.f32.mrb[32].mxu0 }
 0x204   : > { %v14007_v15 = vpop.eup %14006  ;;  %2180 = vadd.xlane.f32.xlu1 %v2179_v30  ;;  %v2003_v21 = vpop.f32.mrb[44].mxu1 }
 0x205   : > { %v13223_v4 = vpop.f32.mrb[33].mxu0  ;;  %v15052_v59 = vmul.f32 %v14007_v15, %v15047_v10  ;;  %v13228_v52 = vpop.f32.mrb[45].mxu1  ;;  %v15077_v10 = vld [vmem:[%s14966_s17 + $0xd] ss:$0 sm:$0xff] }
 0x206   : > { %17174 = vst [vmem:[#allocation50_spill] sm:$0xff] %v15077_v10 }
 0x207   : > { %v2182_v6 = vsel %vm2151_vm2, %v15052_v59, 0.0 }
 0x208   : > { %v14009_v57 = vpop.eup %14008  ;;  %2183 = vadd.xlane.f32.xlu0 %v2182_v6  ;;  %v2033_v6 = vmul.f32 1.442695, %v1851_v3 }
 0x209   : > { %v15060_v22 = vmul.f32 %v14009_v57, %v15055_v1  ;;  %v2035_v57 = vmul.f32 1.442695, %v1927_v34  ;;  %v15092_v34 = vpop.permute.xlu1 %3416 }
 0x20a   : > { %14012 = vpow2.f32 %v2033_v6  ;;  %v15096_v6 = vpop.permute.xlu0 %3418 }
 0x20b   : > { %v2185_v4 = vsel %vm2151_vm2, %v15060_v22, 0.0  ;;  %14014 = vpow2.f32 %v2035_v57 }
 0x20c   : > { %v14011_v15 = vpop.eup %14010  ;;  %2186 = vadd.xlane.f32.xlu1 %v2185_v4 }
 0x20d   : > { %v15068_v30 = vmul.f32 %v14011_v15, %v15063_v40  ;;  %v15080_v15 = vld [vmem:[%s14966_s17 + $0xe] ss:$0 sm:$0xff] }
 0x20e   : > { %17175 = vst [vmem:[#allocation51_spill] sm:$0xff] %v15080_v15  ;;  %v15100_v57 = vpop.permute.xlu0 %3572 }
 0x20f   : > { %v2188_v52 = vsel %vm2151_vm2, %v15068_v30, 0.0 }
 0x210   : > { %2189 = vadd.xlane.f32.xlu0 %v2188_v52 }
 0x214   : > { %v14013_v1 = vpop.eup %14012 }
 0x215   : > { %v14015_v4 = vpop.eup %14014  ;;  %v15083_v40 = vmul.f32 %v14013_v1, %v15077_v10  ;;  %v15098_v1 = vpop.permute.xlu1 %3494 }
 0x216   : > { %v15086_v52 = vmul.f32 %v14015_v4, %v15080_v15  ;;  %17176 = vst [vmem:[#allocation52_spill] sm:$0xff] %v15098_v1  ;;  %v15127_v1 = vld [vmem:[%s14966_s17 + $0xf] ss:$0 sm:$0xff] }
 0x218   : > { %v2194_v3 = vsel %vm2151_vm2, %v15086_v52, 0.0 }
 0x219   : > { %v15102_v4 = vpop.permute.xlu1 %3496 }
 0x21d   : > { %3964 = vrot.lane.b32.xlu1 %v14800_v32, %s14420_s29  ;;  %v2191_v32 = vsel %vm2151_vm2, %v15083_v40, 0.0 }
 0x226   : > { %3886 = vrot.lane.b32.xlu0 %v14779_v24, %s14420_s29 }
 0x241   : > { %2192 = vadd.xlane.f32.xlu1 %v2191_v32  ;;  %v15106_v32 = vpop.permute.xlu0 %3574 }
 0x245   : > { %2195 = vadd.xlane.f32.xlu0 %v2194_v3  ;;  %v15108_v3 = vpop.permute.xlu1 %3650  ;;  %v15112_v15 = vpop.permute.xlu0 %3728 }
 0x246   : > { %17177 = vst [vmem:[#allocation53_spill] sm:$0xff] %v15108_v3 }
 0x249   : > { %v15116_v10 = vpop.permute.xlu1 %3652 }
 0x24a   : > { %17178 = vst [vmem:[#allocation54_spill] sm:$0xff] %v15116_v10 }
 0x24d   : > { %v15122_v24 = vpop.permute.xlu1 %3806 }
 0x24e   : > { %17179 = vst [vmem:[#allocation55_spill] sm:$0xff] %v15122_v24 }
 0x252   : > { %3962 = vrot.lane.b32.xlu1 %v14815_v37, %s14420_s29  ;;  %v2037_v37 = vmul.f32 1.442695, %v2003_v21 }
 0x254   : > { %14016 = vpow2.f32 %v2037_v37  ;;  %v15131_v37 = vpop.permute.xlu1 %3808 }
 0x255   : > { %17180 = vst [vmem:[#allocation56_spill] sm:$0xff] %v15131_v37 }
 0x25b   : > { %3884 = vrot.lane.b32.xlu0 %v14794_v29, %s14420_s29  ;;  %v15120_v29 = vpop.permute.xlu0 %3730 }
 0x25e   : > { %v14017_v21 = vpop.eup %14016 }
 0x25f   : > { %4042 = vrot.lane.b32.xlu0 %v14819_v42, %s14420_s29 }
 0x263   : > { %4040 = vrot.lane.b32.xlu0 %v14834_v56, %s14420_s29 }
 0x267   : > { %4198 = vrot.lane.b32.xlu0 %v14857_v19, %s14420_s29  ;;  %v15134_v19 = vmul.f32 %v14017_v21, %v15127_v1 }
 0x26b   : > { %4196 = vrot.lane.b32.xlu0 %v14872_v28, %s14420_s29 }
 0x26d   : > { %v2154_v42 = vpop.xlane.xlu0 %2153 }
 0x26e   : > { %v2200_v3 = vadd.f32 1e-08, %v2154_v42  ;;  %v2197_v42 = vsel %vm2151_vm2, %v15134_v19, 0.0 }
 0x26f   : > { %4354 = vrot.lane.b32.xlu0 %v14893_v48, %s14420_s29 }
 0x270   : > { %14018 = vrcp.f32 %v2200_v3 }
 0x271   : > { %v2157_v56 = vpop.xlane.xlu0 %2156 }
 0x272   : > { %v2201_v10 = vadd.f32 1e-08, %v2157_v56 }
 0x273   : > { %4352 = vrot.lane.b32.xlu0 %v14896_v54, %s14420_s29 }
 0x274   : > { %14020 = vrcp.f32 %v2201_v10 }
 0x275   : > { %v2160_v28 = vpop.xlane.xlu1 %2159 }
 0x276   : > { %v2202_v24 = vadd.f32 1e-08, %v2160_v28  ;;  %2198 = vadd.xlane.f32.xlu1 %v2197_v42  ;;  %v17181_v42 = vmov 0.0  }
 0x277   : > { %4510 = vrot.lane.b32.xlu0 %v14910_v47, %s14420_s29 }
 0x278   : > { %14022 = vrcp.f32 %v2202_v24 }
 0x279   : > { %v2163_v3 = vpop.xlane.xlu1 %2162 }
 0x27a   : > { %v14019_v48 = vpop.eup %14018  ;;  %v2203_v37 = vadd.f32 1e-08, %v2163_v3 }
 0x27b   : > { %4508 = vrot.lane.b32.xlu0 %v14924_v45, %s14420_s29  ;;  %v2232_v56 = vmul.f32 %v14019_v48, %v14972_v39 }
 0x27c   : > { %14024 = vrcp.f32 %v2203_v37 }
 0x27d   : > { %13232 = vmatmul.mubr.msk.f32.vlgmr.msra.gmra.mrb[34].mxu0 %vm2151_vm2, %v2232_v56  ;;  %v2166_v10 = vpop.xlane.xlu0 %2165 }
 0x27e   : > { %v14021_v21 = vpop.eup %14020  ;;  %13240 = vmatpush3.msra.mxu0 %v14750_v13  ;;  %v2204_v28 = vadd.f32 1e-08, %v2166_v10  ;;  %13241 = vmatprep.mubr.msk.f32.mxu0 %vm14419_vm1, %v17181_v42 }
 0x27f   : > { %4809 = vrot.lane.b32.xlu0 %v14938_v53, %s14420_s29  ;;  %v2233_v24 = vmul.f32 %v14021_v21, %v14980_v5  ;;  %13249 = vmatprep.subr.mxu0 %v17181_v42 }
 0x280   : > { %14026 = vrcp.f32 %v2204_v28 }
 0x281   : > { %13237 = vmatmul.mubr.msk.f32.vlgmr.msra.gmra.mrb[46].mxu1 %vm2151_vm2, %v2233_v24  ;;  %v2169_v48 = vpop.xlane.xlu1 %2168 }
 0x282   : > { %v14023_v39 = vpop.eup %14022  ;;  %13245 = vmatpush3.msra.mxu1 %v14743_v11  ;;  %v2205_v37 = vadd.f32 1e-08, %v2169_v48  ;;  %13246 = vmatprep.mubr.msk.f32.mxu1 %vm14419_vm1, %v17181_v42 }
 0x283   : > { %4963 = vrot.lane.b32.xlu0 %v14750_v13, %s14420_s29  ;;  %v2234_v3 = vmul.f32 %v14023_v39, %v14988_v7  ;;  %13254 = vmatprep.subr.mxu1 %v17181_v42 }
 0x284   : > { %14028 = vrcp.f32 %v2205_v37 }
 0x285   : > { %13242 = vmatmul.mubr.msk.f32.vlgmr.msra.gmra.mrb[36].mxu0 %vm2151_vm2, %v2234_v3  ;;  %v2172_v5 = vpop.xlane.xlu0 %2171 }
 0x286   : > { %v14025_v56 = vpop.eup %14024  ;;  %13250 = vmatpush3.msra.mxu0 %v14769_v20  ;;  %v2206_v10 = vadd.f32 1e-08, %v2172_v5  ;;  %13251 = vmatprep.mubr.msk.f32.mxu0 %vm14419_vm1, %v17181_v42 }
 0x287   : > { %5271 = vrot.lane.b32.xlu0 %v14787_v27, %s14420_s29  ;;  %4120 = vrot.lane.b32.xlu1 %v14838_v0, %s14420_s29  ;;  %v2235_v7 = vmul.f32 %v14025_v56, %v14996_v16 }
 0x288   : > { %14030 = vrcp.f32 %v2206_v10  ;;  %13259 = vmatprep.subr.mxu0 %v17181_v42 }
 0x289   : > { %13247 = vmatmul.mubr.msk.f32.vlgmr.msra.gmra.mrb[48].mxu1 %vm2151_vm2, %v2235_v7  ;;  %v2175_v21 = vpop.xlane.xlu1 %2174 }
 0x28a   : > { %v14027_v28 = vpop.eup %14026  ;;  %13255 = vmatpush3.msra.mxu1 %v14762_v18  ;;  %v2207_v24 = vadd.f32 1e-08, %v2175_v21  ;;  %13256 = vmatprep.mubr.msk.f32.mxu1 %vm14419_vm1, %v17181_v42 }
 0x28b   : > { %5425 = vrot.lane.b32.xlu0 %v14808_v35, %s14420_s29  ;;  %4118 = vrot.lane.b32.xlu1 %v14853_v12, %s14420_s29  ;;  %v2236_v16 = vmul.f32 %v14027_v28, %v15004_v14 }
 0x28c   : > { %14032 = vrcp.f32 %v2207_v24  ;;  %13264 = vmatprep.subr.mxu1 %v17181_v42 }
 0x28d   : > { %13252 = vmatmul.mubr.msk.f32.vlgmr.msra.gmra.mrb[38].mxu0 %vm2151_vm2, %v2236_v16  ;;  %v2178_v48 = vpop.xlane.xlu0 %2177 }
 0x28e   : > { %v14029_v39 = vpop.eup %14028  ;;  %13260 = vmatpush3.msra.mxu0 %v14787_v27  ;;  %v2208_v37 = vadd.f32 1e-08, %v2178_v48  ;;  %13261 = vmatprep.mubr.msk.f32.mxu0 %vm14419_vm1, %v17181_v42 }
 0x28f   : > { %5579 = vrot.lane.b32.xlu0 %v14827_v50, %s14420_s29  ;;  %4276 = vrot.lane.b32.xlu1 %v14876_v31, %s14420_s29  ;;  %v2237_v14 = vmul.f32 %v14029_v39, %v15012_v17 }
 0x290   : > { %14034 = vrcp.f32 %v2208_v37  ;;  %13269 = vmatprep.subr.mxu0 %v17181_v42 }
 0x291   : > { %13257 = vmatmul.mubr.msk.f32.vlgmr.msra.gmra.mrb[50].mxu1 %vm2151_vm2, %v2237_v14  ;;  %v2181_v3 = vpop.xlane.xlu1 %2180 }
 0x292   : > { %v14031_v5 = vpop.eup %14030  ;;  %13265 = vmatpush3.msra.mxu1 %v14782_v25  ;;  %v2209_v56 = vadd.f32 1e-08, %v2181_v3  ;;  %13266 = vmatprep.mubr.msk.f32.mxu1 %vm14419_vm1, %v17181_v42 }
 0x293   : > { %5733 = vrot.lane.b32.xlu0 %v14846_v8, %s14420_s29  ;;  %4274 = vrot.lane.b32.xlu1 %v14889_v38, %s14420_s29  ;;  %v2238_v17 = vmul.f32 %v14031_v5, %v15020_v61 }
 0x294   : > { %14036 = vrcp.f32 %v2209_v56  ;;  %13274 = vmatprep.subr.mxu1 %v17181_v42 }
 0x295   : > { %13262 = vmatmul.mubr.msk.f32.vlgmr.msra.gmra.mrb[40].mxu0 %vm2151_vm2, %v2238_v17  ;;  %v2184_v10 = vpop.xlane.xlu0 %2183 }
 0x296   : > { %v14033_v7 = vpop.eup %14032  ;;  %13270 = vmatpush3.msra.mxu0 %v14808_v35  ;;  %v2210_v21 = vadd.f32 1e-08, %v2184_v10  ;;  %13271 = vmatprep.mubr.msk.f32.mxu0 %vm14419_vm1, %v17181_v42  ;;  %v17184_v10 = vld [vmem:[#allocation7_spill] sm:$0xff] }
 0x297   : > { %5887 = vrot.lane.b32.xlu0 %v14865_v23, %s14420_s29  ;;  %4432 = vrot.lane.b32.xlu1 %v14886_v36, %s14420_s29  ;;  %v2239_v61 = vmul.f32 %v14033_v7, %v15028_v63 }
 0x298   : > { %14038 = vrcp.f32 %v2210_v21  ;;  %13279 = vmatprep.subr.mxu0 %v17181_v42 }
 0x299   : > { %13267 = vmatmul.mubr.msk.f32.vlgmr.msra.gmra.mrb[52].mxu1 %vm2151_vm2, %v2239_v61  ;;  %v2187_v28 = vpop.xlane.xlu1 %2186 }
 0x29a   : > { %v14035_v24 = vpop.eup %14034  ;;  %13275 = vmatpush3.msra.mxu1 %v14803_v33  ;;  %v2211_v16 = vadd.f32 1e-08, %v2187_v28  ;;  %13276 = vmatprep.mubr.msk.f32.mxu1 %vm14419_vm1, %v17181_v42  ;;  %v17185_v28 = vld [vmem:[#allocation6_spill] sm:$0xff] }
 0x29b   : > { %6042 = vrot.lane.b32.xlu0 %v14658_v46, %s14421_s18  ;;  %4430 = vrot.lane.b32.xlu1 %v14902_v60, %s14420_s29  ;;  %v2240_v63 = vmul.f32 %v14035_v24, %v15036_v49 }
 0x29c   : > { %14040 = vrcp.f32 %v2211_v16  ;;  %13284 = vmatprep.subr.mxu1 %v17181_v42 }
 0x29d   : > { %13272 = vmatmul.mubr.msk.f32.vlgmr.msra.gmra.mrb[42].mxu0 %vm2151_vm2, %v2240_v63  ;;  %v2190_v48 = vpop.xlane.xlu0 %2189  ;;  %v15282_v17 = vpop.permute.xlu1 %3964  ;;  %v17186_v63 = vld [vmem:[#allocation10_spill] sm:$0xff] }
 0x29e   : > { %v14037_v39 = vpop.eup %14036  ;;  %13280 = vmatpush3.msra.mxu0 %v14827_v50  ;;  %v2212_v37 = vadd.f32 1e-08, %v2190_v48  ;;  %13281 = vmatprep.mubr.msk.f32.mxu0 %vm14419_vm1, %v17181_v42 }
 0x29f   : > { %6040 = vrot.lane.b32.xlu0 %v14653_v43, %s14421_s18  ;;  %4588 = vrot.lane.b32.xlu1 %v14917_v62, %s14420_s29  ;;  %v2241_v49 = vmul.f32 %v14037_v39, %v15044_v26  ;;  %v17187_v39 = vld [vmem:[#allocation9_spill] sm:$0xff] }
 0x2a0   : > { %14042 = vrcp.f32 %v2212_v37  ;;  %13289 = vmatprep.subr.mxu0 %v17181_v42 }
 0x2a1   : > { %13277 = vmatmul.mubr.msk.f32.vlgmr.msra.gmra.mrb[54].mxu1 %vm2151_vm2, %v2241_v49  ;;  %v3887_v7 = vpop.permute.xlu0 %3886 }
 0x2a2   : > { %v14039_v14 = vpop.eup %14038  ;;  %13285 = vmatpush3.msra.mxu1 %v14822_v44  ;;  %13286 = vmatprep.mubr.msk.f32.mxu1 %vm14419_vm1, %v17181_v42 }
 0x2a3   : > { %6198 = vrot.lane.b32.xlu0 %v14694_v58, %s14421_s18  ;;  %4586 = vrot.lane.b32.xlu1 %v14934_v41, %s14420_s29  ;;  %v2242_v3 = vmul.f32 %v14039_v14, %v15052_v59  ;;  %v17188_v14 = vld [vmem:[#allocation16_spill] sm:$0xff] }
 0x2a4   : > { %13294 = vmatprep.subr.mxu1 %v17181_v42 }
 0x2a5   : > { %13282 = vmatmul.mubr.msk.f32.vlgmr.msra.gmra.mrb[44].mxu0 %vm2151_vm2, %v2242_v3 }
 0x2a6   : > { %v14041_v26 = vpop.eup %14040  ;;  %13290 = vmatpush3.msra.mxu0 %v14846_v8  ;;  %13291 = vmatprep.mubr.msk.f32.mxu0 %vm14419_vm1, %v17181_v42 }
 0x2a7   : > { %6196 = vrot.lane.b32.xlu0 %v14688_v55, %s14421_s18  ;;  %4886 = vrot.lane.b32.xlu1 %v14946_v51, %s14420_s29  ;;  %v2243_v5 = vmul.f32 %v14041_v26, %v15060_v22  ;;  %v17182_v22 = vld [vmem:[#allocation11_spill] sm:$0xff] }
 0x2a8   : > { %13299 = vmatprep.subr.mxu0 %v17181_v42 }
 0x2a9   : > { %13287 = vmatmul.mubr.msk.f32.vlgmr.msra.gmra.mrb[56].mxu1 %vm2151_vm2, %v2243_v5 }
 0x2aa   : > { %v14043_v59 = vpop.eup %14042  ;;  %13295 = vmatpush3.msra.mxu1 %v14841_v2  ;;  %13296 = vmatprep.mubr.msk.f32.mxu1 %vm14419_vm1, %v17181_v42 }
 0x2ab   : > { %6354 = vrot.lane.b32.xlu0 %v14736_v9, %s14421_s18  ;;  %5040 = vrot.lane.b32.xlu1 %v14743_v11, %s14420_s29  ;;  %v2244_v56 = vmul.f32 %v14043_v59, %v15068_v30  ;;  %v17183_v30 = vld [vmem:[#allocation28_spill] sm:$0xff]  ;;  %v17189_v59 = vld [vmem:[#allocation15_spill] sm:$0xff] }
 0x2ac   : > { %13304 = vmatprep.subr.mxu1 %v17181_v42 }
 0x2ad   : > { %13292 = vmatmul.mubr.msk.f32.vlgmr.msra.gmra.mrb[46].mxu0 %vm2151_vm2, %v2244_v56 }
 0x2ae   : > { %13300 = vmatpush3.msra.mxu0 %v14865_v23  ;;  %13301 = vmatprep.mubr.msk.f32.mxu0 %vm14419_vm1, %v17181_v42 }
 0x2af   : > { %6352 = vrot.lane.b32.xlu0 %v17182_v22, %s14421_s18  ;;  %5117 = vrot.lane.b32.xlu1 %v14769_v20, %s14420_s29  ;;  %v17221_v22 = vld [vmem:[#allocation47_spill] sm:$0xff] }
 0x2b0   : > { %13309 = vmatprep.subr.mxu0 %v17181_v42 }
 0x2b3   : > { %5194 = vrot.lane.b32.xlu1 %v14762_v18, %s14420_s29 }
 0x2b7   : > { %5348 = vrot.lane.b32.xlu1 %v14782_v25, %s14420_s29 }
 0x2bb   : > { %5502 = vrot.lane.b32.xlu1 %v14803_v33, %s14420_s29 }
 0x2bf   : > { %5656 = vrot.lane.b32.xlu1 %v14822_v44, %s14420_s29 }
 0x2c3   : > { %5810 = vrot.lane.b32.xlu1 %v14841_v2, %s14420_s29 }
 0x2c7   : > { %5964 = vrot.lane.b32.xlu1 %v17183_v30, %s14420_s29 }
 0x2cb   : > { %6120 = vrot.lane.b32.xlu1 %v17184_v10, %s14421_s18 }
 0x2ce   : > { %v2193_v21 = vpop.xlane.xlu1 %2192 }
 0x2cf   : > { %v2213_v61 = vadd.f32 1e-08, %v2193_v21  ;;  %6118 = vrot.lane.b32.xlu1 %v17185_v28, %s14421_s18 }
 0x2d1   : > { %14044 = vrcp.f32 %v2213_v61 }
 0x2d2   : > { %v2196_v24 = vpop.xlane.xlu0 %2195 }
 0x2d3   : > { %v2214_v16 = vadd.f32 1e-08, %v2196_v24  ;;  %6276 = vrot.lane.b32.xlu1 %v17186_v63, %s14421_s18  ;;  %v17232_v63 = vld [vmem:[#allocation50_spill] sm:$0xff] }
 0x2d5   : > { %14046 = vrcp.f32 %v2214_v16 }
 0x2d6   : > { %v3885_v48 = vpop.permute.xlu0 %3884 }
 0x2d7   : > { %6274 = vrot.lane.b32.xlu1 %v17187_v39, %s14421_s18 }
 0x2da   : > { %v4043_v37 = vpop.permute.xlu0 %4042 }
 0x2db   : > { %v14045_v49 = vpop.eup %14044  ;;  %6432 = vrot.lane.b32.xlu1 %v17188_v14, %s14421_s18 }
 0x2dc   : > { %v2245_v3 = vmul.f32 %v14045_v49, %v15083_v40 }
 0x2de   : > { %v4041_v26 = vpop.permute.xlu0 %4040  ;;  %13297 = vmatmul.mubr.msk.f32.vlgmr.msra.gmra.mrb[58].mxu1 %vm2151_vm2, %v2245_v3  ;;  %v17190_v3 = vld [vmem:[#allocation52_spill] sm:$0xff] }
 0x2df   : > { %v14047_v5 = vpop.eup %14046  ;;  %13305 = vmatpush3.msra.mxu1 %v17183_v30  ;;  %6430 = vrot.lane.b32.xlu1 %v17189_v59, %s14421_s18 }
 0x2e0   : > { %v2246_v56 = vmul.f32 %v14047_v5, %v15086_v52  ;;  %13306 = vmatprep.mubr.msk.f32.mxu1 %vm14419_vm1, %v17181_v42  ;;  %13314 = vmatprep.subr.mxu1 %v17181_v42  ;;  %v17192_v5 = vld [vmem:[#allocation53_spill] sm:$0xff] }
 0x2e2   : > { %13302 = vmatmul.mubr.msk.f32.vlgmr.msra.gmra.mrb[48].mxu0 %vm2151_vm2, %v2246_v56  ;;  %v4199_v21 = vpop.permute.xlu0 %4198  ;;  %v17194_v56 = vld [vmem:[#allocation55_spill] sm:$0xff] }
 0x2e3   : > { %13310 = vmatpush3.xpose.msk.msra.mxu0 %vm420_vm0, %v15096_v6  ;;  %13311 = vmatprep.mubr.msk.f32.mxu0 %vm14419_vm1, %v17181_v42  ;;  %v3963_v6 = vpop.permute.xlu1 %3962 }
 0x2e4   : > { %13319 = vmatprep.subr.mxu0 %v17181_v42 }
 0x2e6   : > { %13312 = vmatmul.mubr.msk.f32.vlgmr.msra.gmra.mrb[50].mxu0 %vm420_vm0, %v15092_v34  ;;  %v4197_v40 = vpop.permute.xlu0 %4196 }
 0x2e7   : > { %13320 = vmatpush3.xpose.msk.msra.mxu0 %vm420_vm0, %v15106_v32  ;;  %13321 = vmatprep.mubr.msk.f32.mxu0 %vm14419_vm1, %v17181_v42 }
 0x2e8   : > { %13329 = vmatprep.subr.mxu0 %v17181_v42 }
 0x2ea   : > { %13322 = vmatmul.mubr.msk.f32.vlgmr.msra.gmra.mrb[52].mxu0 %vm420_vm0, %v15100_v57  ;;  %v4355_v52 = vpop.permute.xlu0 %4354 }
 0x2eb   : > { %13330 = vmatpush3.xpose.msk.msra.mxu0 %vm420_vm0, %v15120_v29  ;;  %13331 = vmatprep.mubr.msk.f32.mxu0 %vm14419_vm1, %v17181_v42 }
 0x2ec   : > { %13339 = vmatprep.subr.mxu0 %v17181_v42 }
 0x2ee   : > { %13332 = vmatmul.mubr.msk.f32.vlgmr.msra.gmra.mrb[54].mxu0 %vm420_vm0, %v15112_v15  ;;  %v4353_v34 = vpop.permute.xlu0 %4352 }
 0x2ef   : > { %13340 = vmatpush3.xpose.msk.msra.mxu0 %vm420_vm0, %v3887_v7  ;;  %13341 = vmatprep.mubr.msk.f32.mxu0 %vm14419_vm1, %v17181_v42 }
 0x2f0   : > { %13349 = vmatprep.subr.mxu0 %v17181_v42 }
 0x2f2   : > { %13342 = vmatmul.mubr.msk.f32.vlgmr.msra.gmra.mrb[56].mxu0 %vm420_vm0, %v3885_v48  ;;  %v4511_v29 = vpop.permute.xlu0 %4510 }
 0x2f3   : > { %13350 = vmatpush3.xpose.msk.msra.mxu0 %vm420_vm0, %v4043_v37  ;;  %13351 = vmatprep.mubr.msk.f32.mxu0 %vm14419_vm1, %v17181_v42 }
 0x2f4   : > { %13359 = vmatprep.subr.mxu0 %v17181_v42 }
 0x2f6   : > { %13352 = vmatmul.mubr.msk.f32.vlgmr.msra.gmra.mrb[58].mxu0 %vm420_vm0, %v4041_v26  ;;  %v4509_v15 = vpop.permute.xlu0 %4508  ;;  %v17191_v26 = vld [vmem:[#allocation54_spill] sm:$0xff] }
 0x2f7   : > { %13360 = vmatpush3.xpose.msk.msra.mxu0 %vm420_vm0, %v4199_v21  ;;  %13361 = vmatprep.mubr.msk.f32.mxu0 %vm14419_vm1, %v17181_v42 }
 0x2f8   : > { %13369 = vmatprep.subr.mxu0 %v17181_v42 }
 0x2fa   : > { %13362 = vmatmul.mubr.msk.f32.vlgmr.msra.gmra.mrb[60].mxu0 %vm420_vm0, %v4197_v40  ;;  %v4810_v57 = vpop.permute.xlu0 %4809 }
 0x2fb   : > { %13370 = vmatpush3.xpose.msk.msra.mxu0 %vm420_vm0, %v4355_v52  ;;  %13371 = vmatprep.mubr.msk.f32.mxu0 %vm14419_vm1, %v17181_v42 }
 0x2fc   : > { %13379 = vmatprep.subr.mxu0 %v17181_v42 }
 0x2fe   : > { %13372 = vmatmul.mubr.msk.f32.vlgmr.msra.gmra.mrb[62].mxu0 %vm420_vm0, %v4353_v34 }
 0x2ff   : > { %13380 = vmatpush3.xpose.msk.msra.mxu0 %vm420_vm0, %v4511_v29  ;;  %13381 = vmatprep.mubr.msk.f32.mxu0 %vm14419_vm1, %v17181_v42 }
 0x300   : > { %13389 = vmatprep.subr.mxu0 %v17181_v42 }
 0x302   : > { %13382 = vmatmul.mubr.msk.f32.vlgmr.msra.gmra.mrb[64].mxu0 %vm420_vm0, %v4509_v15 }
 0x303   : > { %13390 = vmatpush3.msra.mxu0 %v4810_v57  ;;  %v2199_v32 = vpop.xlane.xlu1 %2198  ;;  %13391 = vmatprep.mubr.msk.f32.mxu0 %vm14419_vm1, %v17181_v42 }
 0x304   : > { %v2215_v7 = vadd.f32 1e-08, %v2199_v32  ;;  %13399 = vmatprep.subr.mxu0 %v17181_v42 }
 0x306   : > { %14048 = vrcp.f32 %v2215_v7 }
 0x307   : > { %v4121_v61 = vpop.permute.xlu1 %4120 }
 0x30b   : > { %v4119_v24 = vpop.permute.xlu1 %4118 }
 0x30f   : > { %v4277_v16 = vpop.permute.xlu1 %4276 }
 0x310   : > { %v14049_v48 = vpop.eup %14048 }
 0x311   : > { %v2247_v37 = vmul.f32 %v14049_v48, %v15134_v19 }
 0x313   : > { %13307 = vmatmul.mubr.msk.f32.vlgmr.msra.gmra.mrb[60].mxu1 %vm2151_vm2, %v2247_v37  ;;  %v4275_v49 = vpop.permute.xlu1 %4274 }
 0x314   : > { %13315 = vmatpush3.xpose.msk.msra.mxu1 %vm420_vm0, %v15102_v4  ;;  %13316 = vmatprep.mubr.msk.f32.mxu1 %vm14419_vm1, %v17181_v42  ;;  %v17193_v4 = vld [vmem:[#allocation56_spill] sm:$0xff] }
 0x315   : > { %13324 = vmatprep.subr.mxu1 %v17181_v42 }
 0x317   : > { %13317 = vmatmul.mubr.msk.f32.vlgmr.msra.gmra.mrb[62].mxu1 %vm420_vm0, %v17190_v3  ;;  %v4433_v19 = vpop.permute.xlu1 %4432 }
 0x318   : > { %13325 = vmatpush3.xpose.msk.msra.mxu1 %vm420_vm0, %v17191_v26  ;;  %13326 = vmatprep.mubr.msk.f32.mxu1 %vm14419_vm1, %v17181_v42 }
 0x319   : > { %13334 = vmatprep.subr.mxu1 %v17181_v42 }
 0x31b   : > { %13327 = vmatmul.mubr.msk.f32.vlgmr.msra.gmra.mrb[64].mxu1 %vm420_vm0, %v17192_v5  ;;  %v4431_v21 = vpop.permute.xlu1 %4430 }
 0x31c   : > { %13335 = vmatpush3.xpose.msk.msra.mxu1 %vm420_vm0, %v17193_v4  ;;  %13336 = vmatprep.mubr.msk.f32.mxu1 %vm14419_vm1, %v17181_v42 }
 0x31d   : > { %13344 = vmatprep.subr.mxu1 %v17181_v42 }
 0x31f   : > { %13337 = vmatmul.mubr.msk.f32.vlgmr.msra.gmra.mrb[66].mxu1 %vm420_vm0, %v17194_v56  ;;  %v4589_v40 = vpop.permute.xlu1 %4588 }
 0x320   : > { %13345 = vmatpush3.xpose.msk.msra.mxu1 %vm420_vm0, %v15282_v17  ;;  %13346 = vmatprep.mubr.msk.f32.mxu1 %vm14419_vm1, %v17181_v42 }
 0x321   : > { %13354 = vmatprep.subr.mxu1 %v17181_v42 }
 0x323   : > { %13347 = vmatmul.mubr.msk.f32.vlgmr.msra.gmra.mrb[68].mxu1 %vm420_vm0, %v3963_v6  ;;  %v4587_v17 = vpop.permute.xlu1 %4586 }
 0x324   : > { %13355 = vmatpush3.xpose.msk.msra.mxu1 %vm420_vm0, %v4121_v61  ;;  %13356 = vmatprep.mubr.msk.f32.mxu1 %vm14419_vm1, %v17181_v42 }
 0x325   : > { %13364 = vmatprep.subr.mxu1 %v17181_v42 }
 0x327   : > { %13357 = vmatmul.mubr.msk.f32.vlgmr.msra.gmra.mrb[70].mxu1 %vm420_vm0, %v4119_v24  ;;  %v4887_v52 = vpop.permute.xlu1 %4886 }
 0x328   : > { %13365 = vmatpush3.xpose.msk.msra.mxu1 %vm420_vm0, %v4277_v16  ;;  %13366 = vmatprep.mubr.msk.f32.mxu1 %vm14419_vm1, %v17181_v42 }
 0x329   : > { %13374 = vmatprep.subr.mxu1 %v17181_v42 }
 0x32b   : > { %13367 = vmatmul.mubr.msk.f32.vlgmr.msra.gmra.mrb[72].mxu1 %vm420_vm0, %v4275_v49 }
 0x32c   : > { %13375 = vmatpush3.xpose.msk.msra.mxu1 %vm420_vm0, %v4433_v19  ;;  %13376 = vmatprep.mubr.msk.f32.mxu1 %vm14419_vm1, %v17181_v42 }
 0x32d   : > { %13384 = vmatprep.subr.mxu1 %v17181_v42 }
 0x32f   : > { %13377 = vmatmul.mubr.msk.f32.vlgmr.msra.gmra.mrb[74].mxu1 %vm420_vm0, %v4431_v21 }
 0x330   : > { %13385 = vmatpush3.xpose.msk.msra.mxu1 %vm420_vm0, %v4589_v40  ;;  %13386 = vmatprep.mubr.msk.f32.mxu1 %vm14419_vm1, %v17181_v42 }
 0x331   : > { %13394 = vmatprep.subr.mxu1 %v17181_v42 }
 0x333   : > { %13387 = vmatmul.mubr.msk.f32.vlgmr.msra.gmra.mrb[76].mxu1 %vm420_vm0, %v4587_v17 }
 0x334   : > { %13395 = vmatpush3.msra.mxu1 %v4887_v52  ;;  %13396 = vmatprep.mubr.msk.f32.mxu1 %vm14419_vm1, %v17181_v42 }
 0x335   : > { %13404 = vmatprep.subr.mxu1 %v17181_v42 }
 0x350   : > { %v15405_v34 = vpop.f32.mrb[34].mxu0 }
 0x351   : > { %17195 = vst [vmem:[#allocation7_spill] sm:$0xff] %v15405_v34  ;;  %v13233_v29 = vpop.f32.mrb[35].mxu0 }
 0x354   : > { %v15407_v15 = vpop.f32.mrb[46].mxu1 }
 0x355   : > { %17196 = vst [vmem:[#allocation6_spill] sm:$0xff] %v15407_v15  ;;  %v13238_v6 = vpop.f32.mrb[47].mxu1 }
 0x358   : > { %v15409_v57 = vpop.f32.mrb[36].mxu0 }
 0x359   : > { %17197 = vst [vmem:[#allocation52_spill] sm:$0xff] %v15409_v57  ;;  %v13243_v32 = vpop.f32.mrb[37].mxu0 }
 0x35c   : > { %v15411_v7 = vpop.f32.mrb[48].mxu1 }
 0x35d   : > { %17198 = vst [vmem:[#allocation54_spill] sm:$0xff] %v15411_v7  ;;  %v13248_v61 = vpop.f32.mrb[49].mxu1 }
 0x360   : > { %v15413_v24 = vpop.f32.mrb[38].mxu0 }
 0x361   : > { %17199 = vst [vmem:[#allocation53_spill] sm:$0xff] %v15413_v24  ;;  %v13253_v16 = vpop.f32.mrb[39].mxu0 }
 0x364   : > { %v15415_v48 = vpop.f32.mrb[50].mxu1 }
 0x365   : > { %17200 = vst [vmem:[#allocation56_spill] sm:$0xff] %v15415_v48  ;;  %v13258_v37 = vpop.f32.mrb[51].mxu1 }
 0x368   : > { %v15417_v49 = vpop.f32.mrb[40].mxu0 }
 0x369   : > { %17201 = vst [vmem:[#allocation55_spill] sm:$0xff] %v15417_v49  ;;  %v13263_v3 = vpop.f32.mrb[41].mxu0 }
 0x36c   : > { %v15419_v26 = vpop.f32.mrb[52].mxu1 }
 0x36d   : > { %17202 = vst [vmem:[#allocation57_spill] sm:$0xff] %v15419_v26  ;;  %v13268_v19 = vpop.f32.mrb[53].mxu1 }
 0x370   : > { %v15421_v5 = vpop.f32.mrb[42].mxu0 }
 0x371   : > { %17203 = vst [vmem:[#allocation58_spill] sm:$0xff] %v15421_v5  ;;  %v13273_v4 = vpop.f32.mrb[43].mxu0 }
 0x374   : > { %v15423_v56 = vpop.f32.mrb[54].mxu1 }
 0x375   : > { %17204 = vst [vmem:[#allocation59_spill] sm:$0xff] %v15423_v56  ;;  %v13278_v21 = vpop.f32.mrb[55].mxu1 }
 0x378   : > { %v15425_v40 = vpop.f32.mrb[44].mxu0 }
 0x379   : > { %17205 = vst [vmem:[#allocation60_spill] sm:$0xff] %v15425_v40  ;;  %v13283_v17 = vpop.f32.mrb[45].mxu0 }
 0x37c   : > { %v15427_v52 = vpop.f32.mrb[56].mxu1 }
 0x37d   : > { %17206 = vst [vmem:[#allocation61_spill] sm:$0xff] %v15427_v52  ;;  %v13288_v29 = vpop.f32.mrb[57].mxu1 }
 0x380   : > { %v15429_v6 = vpop.f32.mrb[46].mxu0 }
 0x381   : > { %17207 = vst [vmem:[#allocation62_spill] sm:$0xff] %v15429_v6  ;;  %v13293_v32 = vpop.f32.mrb[47].mxu0 }
 0x382   : > { %v17210_v32 = vld [vmem:[#allocation37_spill] sm:$0xff] }
 0x3b1   : > { %v15431_v61 = vpop.f32.mrb[58].mxu1 }
 0x3b2   : > { %17208 = vst [vmem:[#allocation63_spill] sm:$0xff] %v15431_v61  ;;  %v13298_v16 = vpop.f32.mrb[59].mxu1 }
 0x3b5   : > { %v15433_v37 = vpop.f32.mrb[48].mxu0 }
 0x3b6   : > { %17209 = vst [vmem:[#allocation64_spill] sm:$0xff] %v15433_v37  ;;  %v13303_v3 = vpop.f32.mrb[49].mxu0 }
 0x3b9   : > { %v3490_v19 = vpop.f32.mrb[50].mxu0 }
 0x3ba   : > { %v4664_v4 = vmul.f32 1.442695, %v3490_v19  ;;  %v13313_v5 = vpop.f32.mrb[51].mxu0  ;;  %v17211_v19 = vld [vmem:[#allocation39_spill] sm:$0xff] }
 0x3bc   : > { %14050 = vpow2.f32 %v4664_v4 }
 0x3bd   : > { %v3646_v21 = vpop.f32.mrb[52].mxu0 }
 0x3be   : > { %v4668_v56 = vmul.f32 1.442695, %v3646_v21  ;;  %v13323_v40 = vpop.f32.mrb[53].mxu0 }
 0x3c0   : > { %14052 = vpow2.f32 %v4668_v56 }
 0x3c1   : > { %v3802_v17 = vpop.f32.mrb[54].mxu0 }
 0x3c2   : > { %v13333_v52 = vpop.f32.mrb[55].mxu0  ;;  %v4672_v7 = vmul.f32 1.442695, %v3802_v17  ;;  %v17213_v17 = vld [vmem:[#allocation38_spill] sm:$0xff] }
 0x3c5   : > { %v3958_v29 = vpop.f32.mrb[56].mxu0 }
 0x3c6   : > { %v14051_v49 = vpop.eup %14050  ;;  %v13343_v6 = vpop.f32.mrb[57].mxu0  ;;  %v4676_v15 = vmul.f32 1.442695, %v3958_v29 }
 0x3c7   : > { %v15436_v26 = vmul.f32 %v14051_v49, %v17210_v32 }
 0x3c9   : > { %v4114_v16 = vpop.f32.mrb[58].mxu0  ;;  %v4712_v3 = vsel %vm2151_vm2, %v15436_v26, 0.0 }
 0x3ca   : > { %v14053_v37 = vpop.eup %14052  ;;  %4713 = vadd.xlane.f32.xlu0 %v4712_v3  ;;  %v13353_v5 = vpop.f32.mrb[59].mxu0  ;;  %v4680_v34 = vmul.f32 1.442695, %v4114_v16 }
 0x3cb   : > { %v15441_v4 = vmul.f32 %v14053_v37, %v17211_v19 }
 0x3cd   : > { %v4270_v40 = vpop.f32.mrb[60].mxu0  ;;  %v4718_v56 = vsel %vm2151_vm2, %v15441_v4, 0.0 }
 0x3ce   : > { %4719 = vadd.xlane.f32.xlu0 %v4718_v56  ;;  %v13363_v52 = vpop.f32.mrb[61].mxu0 }
 0x3d1   : > { %v4426_v6 = vpop.f32.mrb[62].mxu0 }
 0x3d2   : > { %v13373_v21 = vpop.f32.mrb[63].mxu0  ;;  %v4688_v16 = vmul.f32 1.442695, %v4426_v6 }
 0x3d5   : > { %v15445_v49 = vpop.f32.mrb[64].mxu0 }
 0x3d6   : > { %v13383_v32 = vpop.f32.mrb[65].mxu0 }
 0x3e6   : > { %v15447_v61 = vpop.f32.mrb[60].mxu1 }
 0x3e7   : > { %17212 = vst [vmem:[#allocation37_spill] sm:$0xff] %v15447_v61  ;;  %v13308_v24 = vpop.f32.mrb[61].mxu1 }
 0x3ea   : > { %v3568_v48 = vpop.f32.mrb[62].mxu1 }
 0x3eb   : > { %v4666_v3 = vmul.f32 1.442695, %v3568_v48  ;;  %v13318_v5 = vpop.f32.mrb[63].mxu1  ;;  %v4684_v48 = vmul.f32 1.442695, %v4270_v40  ;;  %v17215_v40 = vld [vmem:[#allocation41_spill] sm:$0xff] }
 0x3ed   : > { %14054 = vpow2.f32 %v4666_v3 }
 0x3ee   : > { %v3724_v37 = vpop.f32.mrb[64].mxu1  ;;  %14056 = vpow2.f32 %v4672_v7 }
 0x3ef   : > { %v4670_v19 = vmul.f32 1.442695, %v3724_v37  ;;  %v13328_v57 = vpop.f32.mrb[65].mxu1 }
 0x3f1   : > { %14058 = vpow2.f32 %v4670_v19  ;;  %v17214_v19 = vld [vmem:[#allocation40_spill] sm:$0xff] }
 0x3f2   : > { %v3880_v56 = vpop.f32.mrb[66].mxu1  ;;  %14060 = vpow2.f32 %v4676_v15 }
 0x3f3   : > { %v4674_v52 = vmul.f32 1.442695, %v3880_v56  ;;  %v13338_v21 = vpop.f32.mrb[67].mxu1 }
 0x3f5   : > { %14062 = vpow2.f32 %v4674_v52 }
 0x3f6   : > { %v4036_v32 = vpop.f32.mrb[68].mxu1  ;;  %14064 = vpow2.f32 %v4680_v34 }
 0x3f7   : > { %v14055_v61 = vpop.eup %14054  ;;  %v4678_v24 = vmul.f32 1.442695, %v4036_v32  ;;  %v13348_v59 = vpop.f32.mrb[69].mxu1 }
 0x3f8   : > { %v15450_v3 = vmul.f32 %v14055_v61, %v17213_v17  ;;  %v14057_v57 = vpop.eup %14056  ;;  %v17216_v17 = vld [vmem:[#allocation42_spill] sm:$0xff] }
 0x3f9   : > { %14066 = vpow2.f32 %v4678_v24  ;;  %v15460_v52 = vmul.f32 %v14057_v57, %v17215_v40 }
 0x3fa   : > { %v4192_v7 = vpop.f32.mrb[70].mxu1  ;;  %v4715_v29 = vsel %vm2151_vm2, %v15450_v3, 0.0  ;;  %14068 = vpow2.f32 %v4684_v48 }
 0x3fb   : > { %v14059_v5 = vpop.eup %14058  ;;  %v4682_v37 = vmul.f32 1.442695, %v4192_v7  ;;  %4716 = vadd.xlane.f32.xlu1 %v4715_v29  ;;  %v13358_v15 = vpop.f32.mrb[71].mxu1  ;;  %v4724_v29 = vsel %vm2151_vm2, %v15460_v52, 0.0 }
 0x3fc   : > { %v15455_v56 = vmul.f32 %v14059_v5, %v17214_v19  ;;  %v14061_v59 = vpop.eup %14060 }
 0x3fd   : > { %14070 = vpow2.f32 %v4682_v37  ;;  %v17217_v37 = vld [vmem:[#allocation43_spill] sm:$0xff] }
 0x3fe   : > { %v4348_v34 = vpop.f32.mrb[72].mxu1  ;;  %v4721_v61 = vsel %vm2151_vm2, %v15455_v56, 0.0  ;;  %14072 = vpow2.f32 %v4688_v16  ;;  %v15470_v57 = vmul.f32 %v14061_v59, %v17217_v37  ;;  %v17218_v16 = vld [vmem:[#allocation44_spill] sm:$0xff] }
 0x3ff   : > { %v14063_v21 = vpop.eup %14062  ;;  %v4686_v32 = vmul.f32 1.442695, %v4348_v34  ;;  %4722 = vadd.xlane.f32.xlu0 %v4721_v61  ;;  %v13368_v24 = vpop.f32.mrb[73].mxu1 }
 0x400   : > { %v15463_v48 = vmul.f32 %v14063_v21, %v17216_v17  ;;  %v14065_v6 = vpop.eup %14064  ;;  %v4730_v21 = vsel %vm2151_vm2, %v15470_v57, 0.0  ;;  %v17219_v24 = vld [vmem:[#allocation45_spill] sm:$0xff] }
 0x401   : > { %14074 = vpow2.f32 %v4686_v32  ;;  %v15480_v17 = vmul.f32 %v14065_v6, %v17219_v24  ;;  %v17222_v6 = vld [vmem:[#allocation48_spill] sm:$0xff] }
 0x402   : > { %v4504_v7 = vpop.f32.mrb[74].mxu1  ;;  %v4727_v5 = vsel %vm2151_vm2, %v15463_v48, 0.0 }
 0x403   : > { %v14067_v15 = vpop.eup %14066  ;;  %4725 = vadd.xlane.f32.xlu0 %v4724_v29  ;;  %4728 = vadd.xlane.f32.xlu1 %v4727_v5  ;;  %v13378_v19 = vpop.f32.mrb[75].mxu1  ;;  %v17220_v5 = vld [vmem:[#allocation46_spill] sm:$0xff] }
 0x404   : > { %v15473_v34 = vmul.f32 %v14067_v15, %v17218_v16  ;;  %v14069_v61 = vpop.eup %14068  ;;  %v4736_v19 = vsel %vm2151_vm2, %v15480_v17, 0.0 }
 0x405   : > { %v15490_v14 = vmul.f32 %v14069_v61, %v17221_v22 }
 0x406   : > { %v4660_v40 = vpop.f32.mrb[76].mxu1  ;;  %v4733_v32 = vsel %vm2151_vm2, %v15473_v34, 0.0 }
 0x407   : > { %v14071_v59 = vpop.eup %14070  ;;  %4731 = vadd.xlane.f32.xlu0 %v4730_v21  ;;  %4734 = vadd.xlane.f32.xlu1 %v4733_v32  ;;  %v13388_v29 = vpop.f32.mrb[77].mxu1  ;;  %v4742_v32 = vsel %vm2151_vm2, %v15490_v14, 0.0 }
 0x408   : > { %v15483_v37 = vmul.f32 %v14071_v59, %v17220_v5  ;;  %v14073_v15 = vpop.eup %14072  ;;  %v17224_v59 = vld [vmem:[#allocation49_spill] sm:$0xff]  ;;  %v4964_v5 = vpop.permute.xlu0 %4963 }
 0x409   : > { %v15500_v29 = vmul.f32 %v14073_v15, %v17224_v59  ;;  %v17228_v15 = vld [vmem:[#allocation19_spill] sm:$0xff]  ;;  %v4692_v59 = vmul.f32 1.442695, %v15445_v49 }
 0x40a   : > { %v4739_v16 = vsel %vm2151_vm2, %v15483_v37, 0.0 }
 0x40b   : > { %v14075_v9 = vpop.eup %14074  ;;  %4737 = vadd.xlane.f32.xlu0 %v4736_v19  ;;  %4740 = vadd.xlane.f32.xlu1 %v4739_v16  ;;  %17225 = vst [vmem:[#allocation38_spill] sm:$0xff] %v15500_v29  ;;  %v4748_v22 = vsel %vm2151_vm2, %v15500_v29, 0.0  ;;  %v17226_v19 = vld [vmem:[#allocation23_spill] sm:$0xff]  ;;  %v15521_v29 = vpop.permute.xlu1 %5040 }
 0x40c   : > { %v15493_v21 = vmul.f32 %v14075_v9, %v17222_v6  ;;  %v15504_v61 = vpop.permute.xlu0 %5271 }
 0x40e   : > { %17223 = vst [vmem:[#allocation39_spill] sm:$0xff] %v15493_v21  ;;  %v4745_v24 = vsel %vm2151_vm2, %v15493_v21, 0.0 }
 0x40f   : > { %4743 = vadd.xlane.f32.xlu0 %v4742_v32  ;;  %4746 = vadd.xlane.f32.xlu1 %v4745_v24  ;;  %v4690_v32 = vmul.f32 1.442695, %v4504_v7 }
 0x410   : > { %v15506_v9 = vpop.permute.xlu0 %5425 }
 0x411   : > { %14076 = vpow2.f32 %v4690_v32  ;;  %v17235_v32 = vld [vmem:[#allocation51_spill] sm:$0xff] }
 0x412   : > { %14078 = vpow2.f32 %v4692_v59 }
 0x413   : > { %4749 = vadd.xlane.f32.xlu0 %v4748_v22  ;;  %v4694_v22 = vmul.f32 1.442695, %v4660_v40 }
 0x414   : > { %v15510_v16 = vpop.permute.xlu0 %5579 }
 0x415   : > { %14080 = vpow2.f32 %v4694_v22 }
 0x418   : > { %v15512_v6 = vpop.permute.xlu0 %5733 }
 0x419   : > { %17227 = vst [vmem:[#allocation40_spill] sm:$0xff] %v15512_v6  ;;  %v5118_v6 = vpop.permute.xlu1 %5117 }
 0x41b   : > { %v14077_v55 = vpop.eup %14076 }
 0x41c   : > { %v15516_v24 = vpop.permute.xlu0 %5887  ;;  %v14079_v21 = vpop.eup %14078 }
 0x41d   : > { %17229 = vst [vmem:[#allocation41_spill] sm:$0xff] %v15516_v24  ;;  %v15530_v49 = vpop.permute.xlu1 %5194  ;;  %v15535_v59 = vmul.f32 %v14079_v21, %v17235_v32 }
 0x41f   : > { %v14081_v7 = vpop.eup %14080  ;;  %17236 = vst [vmem:[#allocation46_spill] sm:$0xff] %v15535_v59 }
 0x420   : > { %6588 = vrot.lane.b32.xlu1 %v17226_v19, %s14421_s18  ;;  %v15519_v39 = vpop.permute.xlu0 %6042  ;;  %v15538_v22 = vmul.f32 %v14081_v7, %v15127_v1 }
 0x421   : > { %17230 = vst [vmem:[#allocation42_spill] sm:$0xff] %v15519_v39 }
 0x422   : > { %17237 = vst [vmem:[#allocation47_spill] sm:$0xff] %v15538_v22 }
 0x424   : > { %v15523_v19 = vpop.permute.xlu0 %6040 }
 0x425   : > { %17231 = vst [vmem:[#allocation43_spill] sm:$0xff] %v15523_v19 }
 0x428   : > { %v15528_v24 = vpop.permute.xlu0 %6198 }
 0x429   : > { %6510 = vrot.lane.b32.xlu0 %v17228_v15, %s14421_s18  ;;  %v15526_v15 = vmul.f32 %v14077_v55, %v17232_v63  ;;  %17234 = vst [vmem:[#allocation45_spill] sm:$0xff] %v15528_v24  ;;  %v4754_v55 = vsel %vm2151_vm2, %v15535_v59, 0.0  ;;  %v4757_v63 = vsel %vm2151_vm2, %v15538_v22, 0.0  ;;  %v15546_v24 = vpop.permute.xlu1 %5348 }
 0x42b   : > { %17233 = vst [vmem:[#allocation44_spill] sm:$0xff] %v15526_v15  ;;  %v4751_v40 = vsel %vm2151_vm2, %v15526_v15, 0.0 }
 0x42c   : > { %v15540_v19 = vpop.permute.xlu0 %6196 }
 0x42d   : > { %17238 = vst [vmem:[#allocation48_spill] sm:$0xff] %v15540_v19  ;;  %v15550_v21 = vpop.permute.xlu1 %5502  ;;  %v17239_v19 = vld [vmem:[#allocation24_spill] sm:$0xff] }
 0x430   : > { %v15548_v39 = vpop.permute.xlu0 %6354 }
 0x431   : > { %v15554_v1 = vpop.permute.xlu1 %5656 }
 0x434   : > { %v15552_v32 = vpop.permute.xlu0 %6352 }
 0x435   : > { %v15558_v59 = vpop.permute.xlu1 %5810 }
 0x444   : > { %4752 = vadd.xlane.f32.xlu1 %v4751_v40 }
 0x448   : > { %4755 = vadd.xlane.f32.xlu1 %v4754_v55  ;;  %4758 = vadd.xlane.f32.xlu0 %v4757_v63  ;;  %v17240_v55 = vld [vmem:[#allocation22_spill] sm:$0xff]  ;;  %v15564_v63 = vpop.permute.xlu1 %5964 }
 0x457   : > { %v4714_v7 = vpop.xlane.xlu0 %4713 }
 0x458   : > { %v4760_v40 = vadd.f32 1e-08, %v4714_v7  ;;  %v17241_v7 = vld [vmem:[#allocation25_spill] sm:$0xff] }
 0x459   : > { %6586 = vrot.lane.b32.xlu1 %v17239_v19, %s14421_s18 }
 0x45a   : > { %14082 = vrcp.f32 %v4760_v40  ;;  %v15573_v40 = vpop.permute.xlu1 %6120 }
 0x45b   : > { %v4720_v22 = vpop.xlane.xlu0 %4719 }
 0x45c   : > { %v4762_v15 = vadd.f32 1e-08, %v4720_v22 }
 0x45d   : > { %6744 = vrot.lane.b32.xlu1 %v14838_v0, %s14421_s18 }
 0x45e   : > { %14084 = vrcp.f32 %v4762_v15  ;;  %6508 = vrot.lane.b32.xlu0 %v17240_v55, %s14421_s18  ;;  %v17242_v15 = vld [vmem:[#allocation26_spill] sm:$0xff] }
 0x461   : > { %6742 = vrot.lane.b32.xlu1 %v14853_v12, %s14421_s18 }
 0x462   : > { %6666 = vrot.lane.b32.xlu0 %v17241_v7, %s14421_s18 }
 0x464   : > { %v14083_v19 = vpop.eup %14082 }
 0x465   : > { %6900 = vrot.lane.b32.xlu1 %v14876_v31, %s14421_s18  ;;  %v4792_v22 = vmul.f32 %v14083_v19, %v15436_v26  ;;  %v17243_v26 = vld [vmem:[#allocation27_spill] sm:$0xff]  ;;  %v15587_v19 = vpop.permute.xlu1 %6118 }
 0x466   : > { %6664 = vrot.lane.b32.xlu0 %v17242_v15, %s14421_s18 }
 0x467   : > { %13392 = vmatmul.mubr.msk.f32.vlgmr.msra.gmra.mrb[66].mxu0 %vm2151_vm2, %v4792_v22 }
 0x468   : > { %v14085_v55 = vpop.eup %14084  ;;  %13400 = vmatpush3.msra.mxu0 %v4964_v5  ;;  %13401 = vmatprep.mubr.msk.f32.mxu0 %vm14419_vm1, %v17181_v42  ;;  %v17244_v5 = vld [vmem:[#allocation30_spill] sm:$0xff] }
 0x469   : > { %6898 = vrot.lane.b32.xlu1 %v14889_v38, %s14421_s18  ;;  %13409 = vmatprep.subr.mxu0 %v17181_v42  ;;  %v4794_v31 = vmul.f32 %v14085_v55, %v15441_v4  ;;  %v15598_v4 = vpop.permute.xlu1 %6276 }
 0x46a   : > { %6822 = vrot.lane.b32.xlu0 %v17243_v26, %s14421_s18 }
 0x46b   : > { %13402 = vmatmul.mubr.msk.f32.vlgmr.msra.gmra.mrb[68].mxu0 %vm2151_vm2, %v4794_v31  ;;  %v17245_v31 = vld [vmem:[#allocation32_spill] sm:$0xff] }
 0x46c   : > { %13410 = vmatpush3.msra.mxu0 %v5118_v6  ;;  %13411 = vmatprep.mubr.msk.f32.mxu0 %vm14419_vm1, %v17181_v42 }
 0x46d   : > { %7056 = vrot.lane.b32.xlu1 %v14886_v36, %s14421_s18  ;;  %13419 = vmatprep.subr.mxu0 %v17181_v42  ;;  %v15606_v6 = vpop.permute.xlu1 %6274 }
 0x46e   : > { %6820 = vrot.lane.b32.xlu0 %v17244_v5, %s14421_s18 }
 0x471   : > { %7054 = vrot.lane.b32.xlu1 %v14902_v60, %s14421_s18  ;;  %v15614_v55 = vpop.permute.xlu1 %6432 }
 0x472   : > { %6978 = vrot.lane.b32.xlu0 %v17245_v31, %s14421_s18 }
 0x475   : > { %7212 = vrot.lane.b32.xlu1 %v14917_v62, %s14421_s18  ;;  %v15622_v22 = vpop.permute.xlu1 %6430 }
 0x476   : > { %6976 = vrot.lane.b32.xlu0 %v14896_v54, %s14421_s18 }
 0x479   : > { %7210 = vrot.lane.b32.xlu1 %v14934_v41, %s14421_s18 }
 0x47a   : > { %7134 = vrot.lane.b32.xlu0 %v14910_v47, %s14421_s18 }
 0x47d   : > { %7508 = vrot.lane.b32.xlu1 %v14946_v51, %s14421_s18 }
 0x47e   : > { %7132 = vrot.lane.b32.xlu0 %v14924_v45, %s14421_s18 }
 0x481   : > { %7660 = vrot.lane.b32.xlu1 %v14743_v11, %s14421_s18 }
 0x482   : > { %7432 = vrot.lane.b32.xlu0 %v14938_v53, %s14421_s18 }
 0x485   : > { %7736 = vrot.lane.b32.xlu1 %v14769_v20, %s14421_s18 }
 0x486   : > { %7584 = vrot.lane.b32.xlu0 %v14750_v13, %s14421_s18 }
 0x488   : > { %v4717_v51 = vpop.xlane.xlu1 %4716 }
 0x489   : > { %v4761_v47 = vadd.f32 1e-08, %v4717_v51  ;;  %7812 = vrot.lane.b32.xlu1 %v14762_v18, %s14421_s18 }
 0x48a   : > { %7888 = vrot.lane.b32.xlu0 %v14787_v27, %s14421_s18 }
 0x48b   : > { %14086 = vrcp.f32 %v4761_v47 }
 0x48c   : > { %v4723_v11 = vpop.xlane.xlu0 %4722 }
 0x48d   : > { %v4763_v45 = vadd.f32 1e-08, %v4723_v11  ;;  %7964 = vrot.lane.b32.xlu1 %v14782_v25, %s14421_s18 }
 0x48e   : > { %8040 = vrot.lane.b32.xlu0 %v14808_v35, %s14421_s18 }
 0x48f   : > { %14088 = vrcp.f32 %v4763_v45 }
 0x490   : > { %v4726_v20 = vpop.xlane.xlu0 %4725  ;;  %v4729_v13 = vpop.xlane.xlu1 %4728 }
 0x491   : > { %v4764_v53 = vadd.f32 1e-08, %v4726_v20  ;;  %v4765_v51 = vadd.f32 1e-08, %v4729_v13  ;;  %8116 = vrot.lane.b32.xlu1 %v14803_v33, %s14421_s18 }
 0x492   : > { %8192 = vrot.lane.b32.xlu0 %v14827_v50, %s14421_s18 }
 0x493   : > { %14090 = vrcp.f32 %v4764_v53 }
 0x494   : > { %14092 = vrcp.f32 %v4765_v51  ;;  %v4732_v11 = vpop.xlane.xlu0 %4731  ;;  %v4735_v47 = vpop.xlane.xlu1 %4734 }
 0x495   : > { %v14087_v18 = vpop.eup %14086  ;;  %v4766_v25 = vadd.f32 1e-08, %v4732_v11  ;;  %v4767_v27 = vadd.f32 1e-08, %v4735_v47  ;;  %8268 = vrot.lane.b32.xlu1 %v14822_v44, %s14421_s18 }
 0x496   : > { %8344 = vrot.lane.b32.xlu0 %v14846_v8, %s14421_s18  ;;  %v4793_v13 = vmul.f32 %v14087_v18, %v15450_v3 }
 0x497   : > { %14094 = vrcp.f32 %v4766_v25 }
 0x498   : > { %14096 = vrcp.f32 %v4767_v27  ;;  %13397 = vmatmul.mubr.msk.f32.vlgmr.msra.gmra.mrb[78].mxu1 %vm2151_vm2, %v4793_v13  ;;  %v4738_v20 = vpop.xlane.xlu0 %4737  ;;  %v4741_v45 = vpop.xlane.xlu1 %4740 }
 0x499   : > { %v14089_v53 = vpop.eup %14088  ;;  %13405 = vmatpush3.msra.mxu1 %v15521_v29  ;;  %v4768_v51 = vadd.f32 1e-08, %v4738_v20  ;;  %v4769_v11 = vadd.f32 1e-08, %v4741_v45  ;;  %8420 = vrot.lane.b32.xlu1 %v14841_v2, %s14421_s18 }
 0x49a   : > { %8496 = vrot.lane.b32.xlu0 %v14865_v23, %s14421_s18  ;;  %13406 = vmatprep.mubr.msk.f32.mxu1 %vm14419_vm1, %v17181_v42  ;;  %v4795_v18 = vmul.f32 %v14089_v53, %v15455_v56 }
 0x49b   : > { %14098 = vrcp.f32 %v4768_v51  ;;  %13414 = vmatprep.subr.mxu1 %v17181_v42  ;;  %v17251_v51 = vld [vmem:[#allocation9_spill] sm:$0xff] }
 0x49c   : > { %14100 = vrcp.f32 %v4769_v11  ;;  %13407 = vmatmul.mubr.msk.f32.vlgmr.msra.gmra.mrb[80].mxu1 %vm2151_vm2, %v4795_v18  ;;  %v4744_v25 = vpop.xlane.xlu0 %4743  ;;  %v4747_v27 = vpop.xlane.xlu1 %4746  ;;  %v17252_v11 = vld [vmem:[#allocation12_spill] sm:$0xff]  ;;  %v17253_v18 = vld [vmem:[#allocation41_spill] sm:$0xff] }
 0x49d   : > { %v14091_v3 = vpop.eup %14090  ;;  %13415 = vmatpush3.msra.mxu1 %v15530_v49  ;;  %v4770_v29 = vadd.f32 1e-08, %v4744_v25  ;;  %v4771_v47 = vadd.f32 1e-08, %v4747_v27  ;;  %8572 = vrot.lane.b32.xlu1 %v17183_v30, %s14421_s18  ;;  %v17255_v25 = vld [vmem:[#allocation11_spill] sm:$0xff] }
 0x49e   : > { %v14093_v13 = vpop.eup %14092  ;;  %8650 = vrot.lane.b32.xlu0 %v14658_v46, %s14422_s22  ;;  %13416 = vmatprep.mubr.msk.f32.mxu1 %vm14419_vm1, %v17181_v42  ;;  %v4796_v56 = vmul.f32 %v14091_v3, %v15460_v52  ;;  %v17256_v27 = vld [vmem:[#allocation15_spill] sm:$0xff] }
 0x49f   : > { %14102 = vrcp.f32 %v4770_v29  ;;  %13424 = vmatprep.subr.mxu1 %v17181_v42  ;;  %v4797_v49 = vmul.f32 %v14093_v13, %v15463_v48  ;;  %v17257_v3 = vld [vmem:[#allocation19_spill] sm:$0xff] }
 0x4a0   : > { %14104 = vrcp.f32 %v4771_v47  ;;  %13412 = vmatmul.mubr.msk.f32.vlgmr.msra.gmra.mrb[70].mxu0 %vm2151_vm2, %v4796_v56  ;;  %v4750_v20 = vpop.xlane.xlu0 %4749  ;;  %v17258_v29 = vld [vmem:[#allocation23_spill] sm:$0xff]  ;;  %v15744_v47 = vpop.permute.xlu1 %6588 }
 0x4a1   : > { %v14095_v45 = vpop.eup %14094  ;;  %13420 = vmatpush3.msra.mxu0 %v15504_v61  ;;  %v4772_v53 = vadd.f32 1e-08, %v4750_v20  ;;  %13417 = vmatmul.mubr.msk.f32.vlgmr.msra.gmra.mrb[82].mxu1 %vm2151_vm2, %v4797_v49 }
 0x4a2   : > { %v14097_v46 = vpop.eup %14096  ;;  %13425 = vmatpush3.msra.mxu1 %v15546_v24  ;;  %8728 = vrot.lane.b32.xlu1 %v17184_v10, %s14422_s22  ;;  %v4798_v52 = vmul.f32 %v14095_v45, %v15470_v57 }
 0x4a3   : > { %14106 = vrcp.f32 %v4772_v53  ;;  %8648 = vrot.lane.b32.xlu0 %v14653_v43, %s14422_s22  ;;  %13421 = vmatprep.mubr.msk.f32.mxu0 %vm14419_vm1, %v17181_v42  ;;  %v4799_v48 = vmul.f32 %v14097_v46, %v15473_v34 }
 0x4a4   : > { %13426 = vmatprep.mubr.msk.f32.mxu1 %vm14419_vm1, %v17181_v42  ;;  %13429 = vmatprep.subr.mxu0 %v17181_v42  ;;  %v6511_v13 = vpop.permute.xlu0 %6510 }
 0x4a5   : > { %v14099_v61 = vpop.eup %14098  ;;  %13434 = vmatprep.subr.mxu1 %v17181_v42  ;;  %13422 = vmatmul.mubr.msk.f32.vlgmr.msra.gmra.mrb[72].mxu0 %vm2151_vm2, %v4798_v52 }
 0x4a6   : > { %v14101_v10 = vpop.eup %14100  ;;  %13430 = vmatpush3.msra.mxu0 %v15506_v9  ;;  %13427 = vmatmul.mubr.msk.f32.vlgmr.msra.gmra.mrb[84].mxu1 %vm2151_vm2, %v4799_v48  ;;  %v4800_v43 = vmul.f32 %v14099_v61, %v15480_v17 }
 0x4a7   : > { %13435 = vmatpush3.msra.mxu1 %v15550_v21  ;;  %8726 = vrot.lane.b32.xlu1 %v17185_v28, %s14422_s22  ;;  %v4801_v57 = vmul.f32 %v14101_v10, %v15483_v37  ;;  %v17246_v28 = vld [vmem:[#allocation10_spill] sm:$0xff]  ;;  %v17247_v37 = vld [vmem:[#allocation39_spill] sm:$0xff]  ;;  %v17248_v21 = vld [vmem:[#allocation8_spill] sm:$0xff] }
 0x4a8   : > { %8806 = vrot.lane.b32.xlu0 %v14694_v58, %s14422_s22  ;;  %13431 = vmatprep.mubr.msk.f32.mxu0 %vm14419_vm1, %v17181_v42 }
 0x4a9   : > { %v14103_v34 = vpop.eup %14102  ;;  %13436 = vmatprep.mubr.msk.f32.mxu1 %vm14419_vm1, %v17181_v42  ;;  %13439 = vmatprep.subr.mxu0 %v17181_v42 }
 0x4aa   : > { %v14105_v17 = vpop.eup %14104  ;;  %13444 = vmatprep.subr.mxu1 %v17181_v42  ;;  %13432 = vmatmul.mubr.msk.f32.vlgmr.msra.gmra.mrb[74].mxu0 %vm2151_vm2, %v4800_v43  ;;  %v4802_v58 = vmul.f32 %v14103_v34, %v15490_v14  ;;  %v17249_v14 = vld [vmem:[#allocation38_spill] sm:$0xff] }
 0x4ab   : > { %13437 = vmatmul.mubr.msk.f32.vlgmr.msra.gmra.mrb[86].mxu1 %vm2151_vm2, %v4801_v57  ;;  %13440 = vmatpush3.msra.mxu0 %v15510_v16  ;;  %v4803_v9 = vmul.f32 %v14105_v17, %v17247_v37  ;;  %v17259_v57 = vld [vmem:[#allocation44_spill] sm:$0xff] }
 0x4ac   : > { %13445 = vmatpush3.msra.mxu1 %v15554_v1  ;;  %8884 = vrot.lane.b32.xlu1 %v17246_v28, %s14422_s22  ;;  %v17250_v1 = vld [vmem:[#allocation40_spill] sm:$0xff] }
 0x4ad   : > { %v14107_v24 = vpop.eup %14106  ;;  %8804 = vrot.lane.b32.xlu0 %v17248_v21, %s14422_s22  ;;  %13441 = vmatprep.mubr.msk.f32.mxu0 %vm14419_vm1, %v17181_v42  ;;  %v17261_v21 = vld [vmem:[#allocation47_spill] sm:$0xff] }
 0x4ae   : > { %13446 = vmatprep.mubr.msk.f32.mxu1 %vm14419_vm1, %v17181_v42  ;;  %13449 = vmatprep.subr.mxu0 %v17181_v42  ;;  %v4804_v16 = vmul.f32 %v14107_v24, %v17249_v14 }
 0x4af   : > { %13454 = vmatprep.subr.mxu1 %v17181_v42  ;;  %13442 = vmatmul.mubr.msk.f32.vlgmr.msra.gmra.mrb[76].mxu0 %vm2151_vm2, %v4802_v58 }
 0x4b0   : > { %13447 = vmatmul.mubr.msk.f32.vlgmr.msra.gmra.mrb[88].mxu1 %vm2151_vm2, %v4803_v9  ;;  %13450 = vmatpush3.msra.mxu0 %v17250_v1  ;;  %v17260_v9 = vld [vmem:[#allocation46_spill] sm:$0xff] }
 0x4b1   : > { %13455 = vmatpush3.msra.mxu1 %v15558_v59  ;;  %8882 = vrot.lane.b32.xlu1 %v17251_v51, %s14422_s22  ;;  %v17254_v59 = vld [vmem:[#allocation16_spill] sm:$0xff]  ;;  %v17262_v51 = vld [vmem:[#allocation42_spill] sm:$0xff] }
 0x4b2   : > { %8962 = vrot.lane.b32.xlu0 %v17252_v11, %s14422_s22  ;;  %13451 = vmatprep.mubr.msk.f32.mxu0 %vm14419_vm1, %v17181_v42 }
 0x4b3   : > { %13459 = vmatprep.subr.mxu0 %v17181_v42  ;;  %13452 = vmatmul.mubr.msk.f32.vlgmr.msra.gmra.mrb[78].mxu0 %vm2151_vm2, %v4804_v16 }
 0x4b4   : > { %13460 = vmatpush3.msra.mxu0 %v17253_v18  ;;  %13456 = vmatprep.mubr.msk.f32.mxu1 %vm14419_vm1, %v17181_v42  ;;  %v17264_v18 = vld [vmem:[#allocation45_spill] sm:$0xff] }
 0x4b5   : > { %9040 = vrot.lane.b32.xlu1 %v17254_v59, %s14422_s22  ;;  %13464 = vmatprep.subr.mxu1 %v17181_v42 }
 0x4b6   : > { %8960 = vrot.lane.b32.xlu0 %v17255_v25, %s14422_s22  ;;  %13461 = vmatprep.mubr.msk.f32.mxu0 %vm14419_vm1, %v17181_v42 }
 0x4b7   : > { %13469 = vmatprep.subr.mxu0 %v17181_v42 }
 0x4b9   : > { %9038 = vrot.lane.b32.xlu1 %v17256_v27, %s14422_s22 }
 0x4ba   : > { %9118 = vrot.lane.b32.xlu0 %v17257_v3, %s14422_s22 }
 0x4bd   : > { %9196 = vrot.lane.b32.xlu1 %v17258_v29, %s14422_s22 }
 0x4d1   : > { %v4753_v56 = vpop.xlane.xlu1 %4752 }
 0x4d2   : > { %v4773_v49 = vadd.f32 1e-08, %v4753_v56 }
 0x4d4   : > { %14108 = vrcp.f32 %v4773_v49 }
 0x4d5   : > { %v4756_v20 = vpop.xlane.xlu1 %4755  ;;  %v4759_v45 = vpop.xlane.xlu0 %4758 }
 0x4d6   : > { %v4774_v53 = vadd.f32 1e-08, %v4756_v20  ;;  %v4775_v46 = vadd.f32 1e-08, %v4759_v45 }
 0x4d8   : > { %14110 = vrcp.f32 %v4774_v53 }
 0x4d9   : > { %14112 = vrcp.f32 %v4775_v46  ;;  %v6587_v52 = vpop.permute.xlu1 %6586  ;;  %v6509_v48 = vpop.permute.xlu0 %6508 }
 0x4dd   : > { %v6745_v61 = vpop.permute.xlu1 %6744  ;;  %v6667_v10 = vpop.permute.xlu0 %6666 }
 0x4de   : > { %v14109_v43 = vpop.eup %14108 }
 0x4df   : > { %v4805_v34 = vmul.f32 %v14109_v43, %v17259_v57 }
 0x4e1   : > { %13457 = vmatmul.mubr.msk.f32.vlgmr.msra.gmra.mrb[90].mxu1 %vm2151_vm2, %v4805_v34  ;;  %v6743_v17 = vpop.permute.xlu1 %6742  ;;  %v6665_v58 = vpop.permute.xlu0 %6664 }
 0x4e2   : > { %v14111_v28 = vpop.eup %14110  ;;  %13465 = vmatpush3.msra.mxu1 %v15564_v63  ;;  %13466 = vmatprep.mubr.msk.f32.mxu1 %vm14419_vm1, %v17181_v42  ;;  %v17263_v63 = vld [vmem:[#allocation43_spill] sm:$0xff] }
 0x4e3   : > { %v14113_v37 = vpop.eup %14112  ;;  %v4806_v24 = vmul.f32 %v14111_v28, %v17260_v9  ;;  %13474 = vmatprep.subr.mxu1 %v17181_v42 }
 0x4e4   : > { %v4807_v14 = vmul.f32 %v14113_v37, %v17261_v21 }
 0x4e5   : > { %13462 = vmatmul.mubr.msk.f32.vlgmr.msra.gmra.mrb[80].mxu0 %vm2151_vm2, %v4806_v24  ;;  %v6901_v16 = vpop.permute.xlu1 %6900  ;;  %v6823_v1 = vpop.permute.xlu0 %6822 }
 0x4e6   : > { %13470 = vmatpush3.xpose.msk.msra.mxu0 %vm420_vm0, %v17262_v51  ;;  %13467 = vmatmul.mubr.msk.f32.vlgmr.msra.gmra.mrb[92].mxu1 %vm2151_vm2, %v4807_v14 }
 0x4e7   : > { %13471 = vmatprep.mubr.msk.f32.mxu0 %vm14419_vm1, %v17181_v42  ;;  %13479 = vmatprep.subr.mxu0 %v17181_v42 }
 0x4e8   : > { %13476 = vmatprep.mubr.msk.f32.mxu1 %vm14419_vm1, %v17181_v42 }
 0x4e9   : > { %13475 = vmatpush3.xpose.msk.msra.mxu1 %vm420_vm0, %v15573_v40  ;;  %13472 = vmatmul.mubr.msk.f32.vlgmr.msra.gmra.mrb[82].mxu0 %vm420_vm0, %v17263_v63  ;;  %v6821_v11 = vpop.permute.xlu0 %6820  ;;  %v6899_v59 = vpop.permute.xlu1 %6898  ;;  %v17265_v40 = vld [vmem:[#allocation48_spill] sm:$0xff] }
 0x4ea   : > { %13480 = vmatpush3.xpose.msk.msra.mxu0 %vm420_vm0, %v17264_v18  ;;  %13484 = vmatprep.subr.mxu1 %v17181_v42 }
 0x4eb   : > { %13481 = vmatprep.mubr.msk.f32.mxu0 %vm14419_vm1, %v17181_v42  ;;  %13489 = vmatprep.subr.mxu0 %v17181_v42 }
 0x4ec   : > { %13477 = vmatmul.mubr.msk.f32.vlgmr.msra.gmra.mrb[94].mxu1 %vm420_vm0, %v15587_v19 }
 0x4ed   : > { %13485 = vmatpush3.xpose.msk.msra.mxu1 %vm420_vm0, %v15598_v4  ;;  %13482 = vmatmul.mubr.msk.f32.vlgmr.msra.gmra.mrb[84].mxu0 %vm420_vm0, %v17265_v40  ;;  %v6979_v25 = vpop.permute.xlu0 %6978  ;;  %v7057_v27 = vpop.permute.xlu1 %7056 }
 0x4ee   : > { %13490 = vmatpush3.xpose.msk.msra.mxu0 %vm420_vm0, %v15548_v39  ;;  %13486 = vmatprep.mubr.msk.f32.mxu1 %vm14419_vm1, %v17181_v42 }
 0x4ef   : > { %13494 = vmatprep.subr.mxu1 %v17181_v42  ;;  %13491 = vmatprep.mubr.msk.f32.mxu0 %vm14419_vm1, %v17181_v42 }
 0x4f0   : > { %13487 = vmatmul.mubr.msk.f32.vlgmr.msra.gmra.mrb[96].mxu1 %vm420_vm0, %v15606_v6  ;;  %13499 = vmatprep.subr.mxu0 %v17181_v42 }
 0x4f1   : > { %13495 = vmatpush3.xpose.msk.msra.mxu1 %vm420_vm0, %v15614_v55  ;;  %13492 = vmatmul.mubr.msk.f32.vlgmr.msra.gmra.mrb[86].mxu0 %vm420_vm0, %v15552_v32  ;;  %v6977_v39 = vpop.permute.xlu0 %6976  ;;  %v7055_v32 = vpop.permute.xlu1 %7054 }
 0x4f2   : > { %13500 = vmatpush3.xpose.msk.msra.mxu0 %vm420_vm0, %v6511_v13  ;;  %13496 = vmatprep.mubr.msk.f32.mxu1 %vm14419_vm1, %v17181_v42 }
 0x4f3   : > { %13504 = vmatprep.subr.mxu1 %v17181_v42  ;;  %13501 = vmatprep.mubr.msk.f32.mxu0 %vm14419_vm1, %v17181_v42 }
 0x4f4   : > { %13497 = vmatmul.mubr.msk.f32.vlgmr.msra.gmra.mrb[98].mxu1 %vm420_vm0, %v15622_v22  ;;  %13509 = vmatprep.subr.mxu0 %v17181_v42 }
 0x4f5   : > { %13505 = vmatpush3.xpose.msk.msra.mxu1 %vm420_vm0, %v15744_v47  ;;  %13502 = vmatmul.mubr.msk.f32.vlgmr.msra.gmra.mrb[88].mxu0 %vm420_vm0, %v6509_v48  ;;  %v7135_v19 = vpop.permute.xlu0 %7134  ;;  %v7213_v4 = vpop.permute.xlu1 %7212 }
 0x4f6   : > { %13510 = vmatpush3.xpose.msk.msra.mxu0 %vm420_vm0, %v6667_v10  ;;  %13506 = vmatprep.mubr.msk.f32.mxu1 %vm14419_vm1, %v17181_v42 }
 0x4f7   : > { %13514 = vmatprep.subr.mxu1 %v17181_v42  ;;  %13511 = vmatprep.mubr.msk.f32.mxu0 %vm14419_vm1, %v17181_v42 }
 0x4f8   : > { %13507 = vmatmul.mubr.msk.f32.vlgmr.msra.gmra.mrb[100].mxu1 %vm420_vm0, %v6587_v52  ;;  %13519 = vmatprep.subr.mxu0 %v17181_v42 }
 0x4f9   : > { %13515 = vmatpush3.xpose.msk.msra.mxu1 %vm420_vm0, %v6745_v61  ;;  %13512 = vmatmul.mubr.msk.f32.vlgmr.msra.gmra.mrb[90].mxu0 %vm420_vm0, %v6665_v58  ;;  %v7133_v6 = vpop.permute.xlu0 %7132  ;;  %v7211_v55 = vpop.permute.xlu1 %7210 }
 0x4fa   : > { %13520 = vmatpush3.xpose.msk.msra.mxu0 %vm420_vm0, %v6823_v1  ;;  %13516 = vmatprep.mubr.msk.f32.mxu1 %vm14419_vm1, %v17181_v42 }
 0x4fb   : > { %13524 = vmatprep.subr.mxu1 %v17181_v42  ;;  %13521 = vmatprep.mubr.msk.f32.mxu0 %vm14419_vm1, %v17181_v42 }
 0x4fc   : > { %13517 = vmatmul.mubr.msk.f32.vlgmr.msra.gmra.mrb[102].mxu1 %vm420_vm0, %v6743_v17  ;;  %13529 = vmatprep.subr.mxu0 %v17181_v42 }
 0x4fd   : > { %13525 = vmatpush3.xpose.msk.msra.mxu1 %vm420_vm0, %v6901_v16  ;;  %13522 = vmatmul.mubr.msk.f32.vlgmr.msra.gmra.mrb[92].mxu0 %vm420_vm0, %v6821_v11  ;;  %v7433_v22 = vpop.permute.xlu0 %7432  ;;  %v7509_v3 = vpop.permute.xlu1 %7508 }
 0x4fe   : > { %13530 = vmatpush3.xpose.msk.msra.mxu0 %vm420_vm0, %v6979_v25  ;;  %13526 = vmatprep.mubr.msk.f32.mxu1 %vm14419_vm1, %v17181_v42 }
 0x4ff   : > { %13534 = vmatprep.subr.mxu1 %v17181_v42  ;;  %13531 = vmatprep.mubr.msk.f32.mxu0 %vm14419_vm1, %v17181_v42 }
 0x500   : > { %13527 = vmatmul.mubr.msk.f32.vlgmr.msra.gmra.mrb[104].mxu1 %vm420_vm0, %v6899_v59  ;;  %13539 = vmatprep.subr.mxu0 %v17181_v42 }
 0x501   : > { %13535 = vmatpush3.xpose.msk.msra.mxu1 %vm420_vm0, %v7057_v27  ;;  %13532 = vmatmul.mubr.msk.f32.vlgmr.msra.gmra.mrb[94].mxu0 %vm420_vm0, %v6977_v39 }
 0x502   : > { %13540 = vmatpush3.xpose.msk.msra.mxu0 %vm420_vm0, %v7135_v19  ;;  %13536 = vmatprep.mubr.msk.f32.mxu1 %vm14419_vm1, %v17181_v42 }
 0x503   : > { %13544 = vmatprep.subr.mxu1 %v17181_v42  ;;  %13541 = vmatprep.mubr.msk.f32.mxu0 %vm14419_vm1, %v17181_v42 }
 0x504   : > { %13537 = vmatmul.mubr.msk.f32.vlgmr.msra.gmra.mrb[106].mxu1 %vm420_vm0, %v7055_v32  ;;  %13549 = vmatprep.subr.mxu0 %v17181_v42 }
 0x505   : > { %13545 = vmatpush3.xpose.msk.msra.mxu1 %vm420_vm0, %v7213_v4  ;;  %13542 = vmatmul.mubr.msk.f32.vlgmr.msra.gmra.mrb[96].mxu0 %vm420_vm0, %v7133_v6 }
 0x506   : > { %13550 = vmatpush3.msra.mxu0 %v7433_v22  ;;  %13546 = vmatprep.mubr.msk.f32.mxu1 %vm14419_vm1, %v17181_v42 }
 0x507   : > { %13554 = vmatprep.subr.mxu1 %v17181_v42  ;;  %13551 = vmatprep.mubr.msk.f32.mxu0 %vm14419_vm1, %v17181_v42 }
 0x508   : > { %13547 = vmatmul.mubr.msk.f32.vlgmr.msra.gmra.mrb[108].mxu1 %vm420_vm0, %v7211_v55  ;;  %13559 = vmatprep.subr.mxu0 %v17181_v42 }
 0x509   : > { %13555 = vmatpush3.msra.mxu1 %v7509_v3  ;;  %13556 = vmatprep.mubr.msk.f32.mxu1 %vm14419_vm1, %v17181_v42 }
 0x50a   : > { %13564 = vmatprep.subr.mxu1 %v17181_v42 }
 0x53a   : > { %v15855_v29 = vpop.f32.mrb[66].mxu0 }
 0x53b   : > { %17266 = vst [vmem:[#allocation49_spill] sm:$0xff] %v15855_v29  ;;  %v13393_v47 = vpop.f32.mrb[67].mxu0 }
 0x53e   : > { %v15857_v13 = vpop.f32.mrb[68].mxu0 }
 0x53f   : > { %17267 = vst [vmem:[#allocation50_spill] sm:$0xff] %v15857_v13  ;;  %v13403_v56 = vpop.f32.mrb[69].mxu0 }
 0x56b   : > { %v15859_v49 = vpop.f32.mrb[78].mxu1 }
 0x56c   : > { %17268 = vst [vmem:[#allocation51_spill] sm:$0xff] %v15859_v49  ;;  %v13398_v20 = vpop.f32.mrb[79].mxu1 }
 0x56f   : > { %v15861_v45 = vpop.f32.mrb[80].mxu1 }
 0x570   : > { %17269 = vst [vmem:[#allocation25_spill] sm:$0xff] %v15861_v45  ;;  %v13408_v53 = vpop.f32.mrb[81].mxu1 }
 0x573   : > { %v15863_v46 = vpop.f32.mrb[70].mxu0 }
 0x574   : > { %17270 = vst [vmem:[#allocation26_spill] sm:$0xff] %v15863_v46  ;;  %v15865_v52 = vpop.f32.mrb[82].mxu1  ;;  %v13413_v48 = vpop.f32.mrb[71].mxu0  ;;  %v15998_v46 = vld [vmem:[%s14966_s17 + $0xe] ss:$0 sm:$0xff] }
 0x575   : > { %17271 = vst [vmem:[#allocation27_spill] sm:$0xff] %v15865_v52  ;;  %v13418_v61 = vpop.f32.mrb[83].mxu1  ;;  %17292 = vst [vmem:[#allocation45_spill] sm:$0xff] %v15998_v46 }
 0x578   : > { %v15867_v10 = vpop.f32.mrb[72].mxu0 }
 0x579   : > { %17272 = vst [vmem:[#allocation30_spill] sm:$0xff] %v15867_v10  ;;  %v15869_v43 = vpop.f32.mrb[84].mxu1  ;;  %v13423_v57 = vpop.f32.mrb[73].mxu0  ;;  %v15990_v10 = vld [vmem:[%s14966_s17 + $0xd] ss:$0 sm:$0xff] }
 0x57a   : > { %17273 = vst [vmem:[#allocation32_spill] sm:$0xff] %v15869_v43  ;;  %v13428_v34 = vpop.f32.mrb[85].mxu1  ;;  %17291 = vst [vmem:[#allocation43_spill] sm:$0xff] %v15990_v10 }
 0x57d   : > { %v15871_v17 = vpop.f32.mrb[74].mxu0 }
 0x57e   : > { %17274 = vst [vmem:[#allocation10_spill] sm:$0xff] %v15871_v17  ;;  %v15873_v58 = vpop.f32.mrb[86].mxu1  ;;  %v13433_v28 = vpop.f32.mrb[75].mxu0 }
 0x57f   : > { %17275 = vst [vmem:[#allocation39_spill] sm:$0xff] %v15873_v58  ;;  %v13438_v37 = vpop.f32.mrb[87].mxu1 }
 0x582   : > { %v15875_v9 = vpop.f32.mrb[76].mxu0 }
 0x583   : > { %17276 = vst [vmem:[#allocation8_spill] sm:$0xff] %v15875_v9  ;;  %v15877_v24 = vpop.f32.mrb[88].mxu1  ;;  %v13443_v21 = vpop.f32.mrb[77].mxu0 }
 0x584   : > { %17277 = vst [vmem:[#allocation38_spill] sm:$0xff] %v15877_v24  ;;  %v13448_v14 = vpop.f32.mrb[89].mxu1 }
 0x586   : > { %v15879_v16 = vpop.f32.mrb[78].mxu0 }
 0x587   : > { %17278 = vst [vmem:[#allocation40_spill] sm:$0xff] %v15879_v16  ;;  %v13453_v1 = vpop.f32.mrb[79].mxu0 }
 0x588   : > { %v15888_v1 = vld [vmem:[%s14966_s17] ss:$0 sm:$0xff] }
 0x5b4   : > { %v15881_v51 = vpop.f32.mrb[90].mxu1 }
 0x5b5   : > { %17279 = vst [vmem:[#allocation9_spill] sm:$0xff] %v15881_v51  ;;  %v13458_v63 = vpop.f32.mrb[91].mxu1  ;;  %v15984_v51 = vld [vmem:[%s14966_s17 + $0xc] ss:$0 sm:$0xff] }
 0x5b6   : > { %17290 = vst [vmem:[#allocation42_spill] sm:$0xff] %v15984_v51 }
 0x5b8   : > { %v15883_v11 = vpop.f32.mrb[80].mxu0 }
 0x5b9   : > { %17280 = vst [vmem:[#allocation12_spill] sm:$0xff] %v15883_v11  ;;  %v15885_v18 = vpop.f32.mrb[92].mxu1  ;;  %v13463_v59 = vpop.f32.mrb[81].mxu0 }
 0x5ba   : > { %17281 = vst [vmem:[#allocation41_spill] sm:$0xff] %v15885_v18  ;;  %v13468_v40 = vpop.f32.mrb[93].mxu1 }
 0x5bc   : > { %v6114_v25 = vpop.f32.mrb[82].mxu0 }
 0x5bd   : > { %v7288_v27 = vmul.f32 1.442695, %v6114_v25  ;;  %v13473_v39 = vpop.f32.mrb[83].mxu0 }
 0x5bf   : > { %14114 = vpow2.f32 %v7288_v27  ;;  %v6192_v32 = vpop.f32.mrb[94].mxu1 }
 0x5c0   : > { %v7290_v19 = vmul.f32 1.442695, %v6192_v32  ;;  %v13478_v4 = vpop.f32.mrb[95].mxu1  ;;  %v6270_v6 = vpop.f32.mrb[84].mxu0 }
 0x5c1   : > { %v7292_v55 = vmul.f32 1.442695, %v6270_v6  ;;  %v13483_v22 = vpop.f32.mrb[85].mxu0 }
 0x5c2   : > { %14116 = vpow2.f32 %v7290_v19 }
 0x5c3   : > { %14118 = vpow2.f32 %v7292_v55  ;;  %v6348_v3 = vpop.f32.mrb[96].mxu1  ;;  %v15896_v55 = vld [vmem:[%s14966_s17 + $0x1] ss:$0 sm:$0xff] }
 0x5c4   : > { %v7294_v47 = vmul.f32 1.442695, %v6348_v3  ;;  %v13488_v56 = vpop.f32.mrb[97].mxu1  ;;  %v6426_v20 = vpop.f32.mrb[86].mxu0  ;;  %v15902_v3 = vld [vmem:[%s14966_s17 + $0x2] ss:$0 sm:$0xff] }
 0x5c5   : > { %v7296_v53 = vmul.f32 1.442695, %v6426_v20  ;;  %v13493_v48 = vpop.f32.mrb[87].mxu0 }
 0x5c6   : > { %14120 = vpow2.f32 %v7294_v47 }
 0x5c7   : > { %14122 = vpow2.f32 %v7296_v53  ;;  %v6504_v61 = vpop.f32.mrb[98].mxu1 }
 0x5c8   : > { %v7298_v57 = vmul.f32 1.442695, %v6504_v61  ;;  %v13498_v34 = vpop.f32.mrb[99].mxu1  ;;  %v6582_v28 = vpop.f32.mrb[88].mxu0 }
 0x5c9   : > { %v14115_v37 = vpop.eup %14114  ;;  %v7300_v21 = vmul.f32 1.442695, %v6582_v28  ;;  %v13503_v14 = vpop.f32.mrb[89].mxu0 }
 0x5ca   : > { %14124 = vpow2.f32 %v7298_v57  ;;  %v15891_v63 = vmul.f32 %v15888_v1, %v14115_v37  ;;  %v15912_v14 = vld [vmem:[%s14966_s17 + $0x3] ss:$0 sm:$0xff] }
 0x5cb   : > { %14126 = vpow2.f32 %v7300_v21  ;;  %v6660_v59 = vpop.f32.mrb[100].mxu1 }
 0x5cc   : > { %v14117_v40 = vpop.eup %14116  ;;  %v7302_v25 = vmul.f32 1.442695, %v6660_v59  ;;  %v13508_v27 = vpop.f32.mrb[101].mxu1  ;;  %v7336_v32 = vsel %vm2151_vm2, %v15891_v63, 0.0 }
 0x5cd   : > { %v6738_v39 = vpop.f32.mrb[90].mxu0  ;;  %v14119_v19 = vpop.eup %14118  ;;  %7337 = vadd.xlane.f32.xlu0 %v7336_v32  ;;  %v15899_v22 = vmul.f32 %v15896_v55, %v14117_v40 }
 0x5ce   : > { %v7304_v4 = vmul.f32 1.442695, %v6738_v39  ;;  %v13513_v6 = vpop.f32.mrb[91].mxu0  ;;  %14128 = vpow2.f32 %v7302_v25  ;;  %v15905_v47 = vmul.f32 %v15902_v3, %v14119_v19 }
 0x5cf   : > { %v6816_v56 = vpop.f32.mrb[102].mxu1  ;;  %v7339_v20 = vsel %vm2151_vm2, %v15899_v22, 0.0 }
 0x5d0   : > { %14130 = vpow2.f32 %v7304_v4  ;;  %v14121_v53 = vpop.eup %14120  ;;  %v7306_v48 = vmul.f32 1.442695, %v6816_v56  ;;  %7340 = vadd.xlane.f32.xlu1 %v7339_v20  ;;  %v13518_v61 = vpop.f32.mrb[103].mxu1  ;;  %v7342_v34 = vsel %vm2151_vm2, %v15905_v47, 0.0  ;;  %v15920_v4 = vld [vmem:[%s14966_s17 + $0x4] ss:$0 sm:$0xff] }
 0x5d1   : > { %v6894_v57 = vpop.f32.mrb[92].mxu0  ;;  %v14123_v28 = vpop.eup %14122  ;;  %7343 = vadd.xlane.f32.xlu0 %v7342_v34  ;;  %v15915_v59 = vmul.f32 %v15912_v14, %v14121_v53  ;;  %17282 = vst [vmem:[#allocation16_spill] sm:$0xff] %v15920_v4 }
 0x5d2   : > { %v7308_v37 = vmul.f32 1.442695, %v6894_v57  ;;  %v13523_v21 = vpop.f32.mrb[93].mxu0  ;;  %14132 = vpow2.f32 %v7306_v48  ;;  %v15923_v6 = vmul.f32 %v15920_v4, %v14123_v28  ;;  %v15926_v48 = vld [vmem:[%s14966_s17 + $0x5] ss:$0 sm:$0xff] }
 0x5d3   : > { %v6972_v40 = vpop.f32.mrb[104].mxu1  ;;  %v7345_v19 = vsel %vm2151_vm2, %v15915_v59, 0.0  ;;  %17283 = vst [vmem:[#allocation11_spill] sm:$0xff] %v15926_v48 }
 0x5d4   : > { %14134 = vpow2.f32 %v7308_v37  ;;  %v14125_v25 = vpop.eup %14124  ;;  %v7310_v27 = vmul.f32 1.442695, %v6972_v40  ;;  %v13528_v39 = vpop.f32.mrb[105].mxu1 }
 0x5d5   : > { %v7050_v32 = vpop.f32.mrb[94].mxu0  ;;  %v14127_v56 = vpop.eup %14126  ;;  %7346 = vadd.xlane.f32.xlu0 %v7345_v19  ;;  %v15929_v61 = vmul.f32 %v15926_v48, %v14125_v25  ;;  %v7348_v39 = vsel %vm2151_vm2, %v15923_v6, 0.0 }
 0x5d6   : > { %v7312_v20 = vmul.f32 1.442695, %v7050_v32  ;;  %v13533_v53 = vpop.f32.mrb[95].mxu0  ;;  %14136 = vpow2.f32 %v7310_v27  ;;  %v15936_v32 = vld [vmem:[%s14966_s17 + $0x6] ss:$0 sm:$0xff] }
 0x5d7   : > { %v7128_v57 = vpop.f32.mrb[106].mxu1  ;;  %v7351_v34 = vsel %vm2151_vm2, %v15929_v61, 0.0  ;;  %17284 = vst [vmem:[#allocation15_spill] sm:$0xff] %v15936_v32  ;;  %v15939_v25 = vmul.f32 %v15936_v32, %v14127_v56  ;;  %v15942_v53 = vld [vmem:[%s14966_s17 + $0x7] ss:$0 sm:$0xff] }
 0x5d8   : > { %14138 = vpow2.f32 %v7312_v20  ;;  %v14129_v37 = vpop.eup %14128  ;;  %v7314_v28 = vmul.f32 1.442695, %v7128_v57  ;;  %7352 = vadd.xlane.f32.xlu1 %v7351_v34  ;;  %v13538_v21 = vpop.f32.mrb[107].mxu1  ;;  %17285 = vst [vmem:[#allocation19_spill] sm:$0xff] %v15942_v53 }
 0x5d9   : > { %v7206_v40 = vpop.f32.mrb[96].mxu0  ;;  %7349 = vadd.xlane.f32.xlu0 %v7348_v39  ;;  %v15945_v57 = vmul.f32 %v15942_v53, %v14129_v37  ;;  %v15952_v39 = vld [vmem:[%s14966_s17 + $0x8] ss:$0 sm:$0xff] }
 0x5da   : > { %v14131_v27 = vpop.eup %14130  ;;  %v7316_v19 = vmul.f32 1.442695, %v7206_v40  ;;  %v13543_v20 = vpop.f32.mrb[97].mxu0  ;;  %14140 = vpow2.f32 %v7314_v28  ;;  %v7354_v40 = vsel %vm2151_vm2, %v15939_v25, 0.0  ;;  %17286 = vst [vmem:[#allocation23_spill] sm:$0xff] %v15952_v39 }
 0x5db   : > { %v7284_v34 = vpop.f32.mrb[108].mxu1  ;;  %v7357_v21 = vsel %vm2151_vm2, %v15945_v57, 0.0  ;;  %v15955_v37 = vmul.f32 %v15952_v39, %v14131_v27  ;;  %v15968_v27 = vld [vmem:[%s14966_s17 + $0xa] ss:$0 sm:$0xff] }
 0x5dc   : > { %14142 = vpow2.f32 %v7316_v19  ;;  %v14133_v11 = vpop.eup %14132  ;;  %v7318_v56 = vmul.f32 1.442695, %v7284_v34  ;;  %7358 = vadd.xlane.f32.xlu1 %v7357_v21  ;;  %v13548_v16 = vpop.f32.mrb[109].mxu1  ;;  %v15958_v19 = vld [vmem:[%s14966_s17 + $0x9] ss:$0 sm:$0xff]  ;;  %17288 = vst [vmem:[#allocation46_spill] sm:$0xff] %v15968_v27 }
 0x5dd   : > { %7355 = vadd.xlane.f32.xlu0 %v7354_v40  ;;  %17287 = vst [vmem:[#allocation44_spill] sm:$0xff] %v15958_v19  ;;  %v15961_v20 = vmul.f32 %v15958_v19, %v14133_v11  ;;  %v7360_v21 = vsel %vm2151_vm2, %v15955_v37, 0.0  ;;  %v15974_v11 = vld [vmem:[%s14966_s17 + $0xb] ss:$0 sm:$0xff] }
 0x5de   : > { %v14135_v28 = vpop.eup %14134  ;;  %14144 = vpow2.f32 %v7318_v56  ;;  %17289 = vst [vmem:[#allocation47_spill] sm:$0xff] %v15974_v11 }
 0x5df   : > { %v7363_v16 = vsel %vm2151_vm2, %v15961_v20, 0.0  ;;  %v15971_v40 = vmul.f32 %v15968_v27, %v14135_v28 }
 0x5e0   : > { %v14137_v34 = vpop.eup %14136  ;;  %7364 = vadd.xlane.f32.xlu1 %v7363_v16 }
 0x5e1   : > { %7361 = vadd.xlane.f32.xlu0 %v7360_v21  ;;  %v15977_v56 = vmul.f32 %v15974_v11, %v14137_v34  ;;  %v7366_v17 = vsel %vm2151_vm2, %v15971_v40, 0.0 }
 0x5e2   : > { %v14139_v9 = vpop.eup %14138 }
 0x5e3   : > { %v7369_v16 = vsel %vm2151_vm2, %v15977_v56, 0.0  ;;  %v15987_v28 = vmul.f32 %v15984_v51, %v14139_v9 }
 0x5e4   : > { %v14141_v18 = vpop.eup %14140  ;;  %7370 = vadd.xlane.f32.xlu1 %v7369_v16 }
 0x5e5   : > { %7367 = vadd.xlane.f32.xlu0 %v7366_v17  ;;  %v15993_v34 = vmul.f32 %v15990_v10, %v14141_v18  ;;  %v7372_v9 = vsel %vm2151_vm2, %v15987_v28, 0.0  ;;  %v16006_v17 = vld [vmem:[%s14966_s17 + $0xf] ss:$0 sm:$0xff] }
 0x5e6   : > { %v14143_v21 = vpop.eup %14142  ;;  %17293 = vst [vmem:[#allocation48_spill] sm:$0xff] %v16006_v17 }
 0x5e7   : > { %v7375_v24 = vsel %vm2151_vm2, %v15993_v34, 0.0  ;;  %v16001_v16 = vmul.f32 %v15998_v46, %v14143_v21  ;;  %v17294_v21 = vld [vmem:[#allocation24_spill] sm:$0xff] }
 0x5e8   : > { %v14145_v58 = vpop.eup %14144  ;;  %7376 = vadd.xlane.f32.xlu1 %v7375_v24  ;;  %v17295_v24 = vld [vmem:[#allocation22_spill] sm:$0xff] }
 0x5e9   : > { %7373 = vadd.xlane.f32.xlu0 %v7372_v9  ;;  %v16009_v13 = vmul.f32 %v16006_v17, %v14145_v58  ;;  %v7378_v18 = vsel %vm2151_vm2, %v16001_v16, 0.0  ;;  %v16021_v9 = vpop.permute.xlu1 %7660  ;;  %v17296_v58 = vld [vmem:[#allocation31_spill] sm:$0xff] }
 0x5eb   : > { %v7381_v43 = vsel %vm2151_vm2, %v16009_v13, 0.0 }
 0x5ec   : > { %7379 = vadd.xlane.f32.xlu1 %v7378_v18 }
 0x5ed   : > { %7382 = vadd.xlane.f32.xlu0 %v7381_v43  ;;  %v16029_v43 = vpop.permute.xlu1 %7736 }
 0x5fd   : > { %9194 = vrot.lane.b32.xlu1 %v17294_v21, %s14422_s22 }
 0x601   : > { %9352 = vrot.lane.b32.xlu1 %v14838_v0, %s14422_s22  ;;  %v16035_v0 = vpop.permute.xlu0 %7584 }
 0x603   : > { %9116 = vrot.lane.b32.xlu0 %v17295_v24, %s14422_s22  ;;  %v17302_v24 = vld [vmem:[#allocation13_spill] sm:$0xff] }
 0x605   : > { %9350 = vrot.lane.b32.xlu1 %v14853_v12, %s14422_s22  ;;  %v16039_v12 = vpop.permute.xlu1 %7812 }
 0x607   : > { %9274 = vrot.lane.b32.xlu0 %v17241_v7, %s14422_s22  ;;  %v16045_v7 = vpop.permute.xlu0 %7888 }
 0x609   : > { %9508 = vrot.lane.b32.xlu1 %v17296_v58, %s14422_s22  ;;  %v17303_v58 = vld [vmem:[#allocation21_spill] sm:$0xff] }
 0x60b   : > { %9272 = vrot.lane.b32.xlu0 %v17242_v15, %s14422_s22  ;;  %v16049_v15 = vpop.permute.xlu1 %7964 }
 0x60d   : > { %9506 = vrot.lane.b32.xlu1 %v14889_v38, %s14422_s22  ;;  %v16055_v38 = vpop.permute.xlu0 %8040 }
 0x60f   : > { %9430 = vrot.lane.b32.xlu0 %v17243_v26, %s14422_s22 }
 0x611   : > { %9664 = vrot.lane.b32.xlu1 %v14886_v36, %s14422_s22  ;;  %v16059_v36 = vpop.permute.xlu1 %8116  ;;  %v16065_v26 = vpop.permute.xlu0 %8192 }
 0x613   : > { %9428 = vrot.lane.b32.xlu0 %v17244_v5, %s14422_s22  ;;  %v17298_v5 = vld [vmem:[#allocation35_spill] sm:$0xff] }
 0x615   : > { %9662 = vrot.lane.b32.xlu1 %v14902_v60, %s14422_s22  ;;  %v17297_v60 = vld [vmem:[#allocation33_spill] sm:$0xff]  ;;  %v16075_v18 = vpop.permute.xlu0 %8344 }
 0x617   : > { %9586 = vrot.lane.b32.xlu0 %v17245_v31, %s14422_s22  ;;  %v16069_v31 = vpop.permute.xlu1 %8268 }
 0x619   : > { %9820 = vrot.lane.b32.xlu1 %v14917_v62, %s14422_s22  ;;  %v17299_v62 = vld [vmem:[#allocation34_spill] sm:$0xff] }
 0x61b   : > { %9584 = vrot.lane.b32.xlu0 %v14896_v54, %s14422_s22  ;;  %v17300_v54 = vld [vmem:[#allocation14_spill] sm:$0xff]  ;;  %v16079_v21 = vpop.permute.xlu1 %8420 }
 0x61d   : > { %9818 = vrot.lane.b32.xlu1 %v14934_v41, %s14422_s22  ;;  %v17301_v41 = vld [vmem:[#allocation36_spill] sm:$0xff] }
 0x61f   : > { %9742 = vrot.lane.b32.xlu0 %v17297_v60, %s14422_s22  ;;  %v16085_v60 = vpop.permute.xlu0 %8496 }
 0x621   : > { %10040 = vrot.lane.b32.xlu1 %v17298_v5, %s14422_s22  ;;  %v17304_v5 = vld [vmem:[#allocation18_spill] sm:$0xff] }
 0x623   : > { %9740 = vrot.lane.b32.xlu0 %v17299_v62, %s14422_s22  ;;  %v16089_v62 = vpop.permute.xlu1 %8572 }
 0x625   : > { %10192 = vrot.lane.b32.xlu1 %v17300_v54, %s14422_s22  ;;  %v17305_v54 = vld [vmem:[#allocation17_spill] sm:$0xff] }
 0x627   : > { %10116 = vrot.lane.b32.xlu0 %v17301_v41, %s14422_s22  ;;  %v16095_v41 = vpop.permute.xlu0 %8650 }
 0x629   : > { %10268 = vrot.lane.b32.xlu1 %v17302_v24, %s14422_s22  ;;  %v16099_v24 = vpop.permute.xlu1 %8728 }
 0x62b   : > { %10496 = vrot.lane.b32.xlu0 %v17303_v58, %s14422_s22  ;;  %v17306_v58 = vld [vmem:[#allocation20_spill] sm:$0xff] }
 0x62d   : > { %10344 = vrot.lane.b32.xlu1 %v17304_v5, %s14422_s22  ;;  %v16105_v5 = vpop.permute.xlu0 %8648 }
 0x62f   : > { %10648 = vrot.lane.b32.xlu0 %v14808_v35, %s14422_s22  ;;  %v16109_v35 = vpop.permute.xlu1 %8726 }
 0x631   : > { %10420 = vrot.lane.b32.xlu1 %v17305_v54, %s14422_s22  ;;  %v16113_v54 = vpop.permute.xlu0 %8806 }
 0x633   : > { %10800 = vrot.lane.b32.xlu0 %v14827_v50, %s14422_s22  ;;  %v16115_v50 = vpop.permute.xlu1 %8884 }
 0x635   : > { %10572 = vrot.lane.b32.xlu1 %v17306_v58, %s14422_s22  ;;  %v16119_v58 = vpop.permute.xlu0 %8804 }
 0x637   : > { %10952 = vrot.lane.b32.xlu0 %v14846_v8, %s14422_s22  ;;  %v16121_v8 = vpop.permute.xlu1 %8882 }
 0x639   : > { %10724 = vrot.lane.b32.xlu1 %v14803_v33, %s14422_s22  ;;  %v16123_v29 = vpop.permute.xlu0 %8962 }
 0x63b   : > { %v16125_v52 = vpop.permute.xlu1 %9040 }
 0x63d   : > { %10876 = vrot.lane.b32.xlu1 %v14822_v44, %s14422_s22  ;;  %v16127_v33 = vpop.permute.xlu0 %8960 }
 0x63f   : > { %v16129_v23 = vpop.permute.xlu1 %9038 }
 0x641   : > { %11028 = vrot.lane.b32.xlu1 %v14841_v2, %s14422_s22  ;;  %v16131_v44 = vpop.permute.xlu0 %9118 }
 0x643   : > { %v16133_v45 = vpop.permute.xlu1 %9196 }
 0x65a   : > { %v7338_v49 = vpop.xlane.xlu0 %7337 }
 0x65b   : > { %v7384_v30 = vadd.f32 1e-08, %v7338_v49 }
 0x65d   : > { %14146 = vrcp.f32 %v7384_v30  ;;  %v7341_v2 = vpop.xlane.xlu1 %7340 }
 0x65e   : > { %v7385_v17 = vadd.f32 1e-08, %v7341_v2  ;;  %v7344_v46 = vpop.xlane.xlu0 %7343 }
 0x65f   : > { %v7386_v51 = vadd.f32 1e-08, %v7344_v46 }
 0x660   : > { %14148 = vrcp.f32 %v7385_v17 }
 0x661   : > { %14150 = vrcp.f32 %v7386_v51 }
 0x662   : > { %v7347_v10 = vpop.xlane.xlu0 %7346 }
 0x663   : > { %v7387_v27 = vadd.f32 1e-08, %v7347_v10 }
 0x665   : > { %14152 = vrcp.f32 %v7387_v27  ;;  %v7353_v11 = vpop.xlane.xlu1 %7352 }
 0x666   : > { %v7389_v39 = vadd.f32 1e-08, %v7353_v11  ;;  %v7350_v19 = vpop.xlane.xlu0 %7349 }
 0x667   : > { %v14147_v32 = vpop.eup %14146  ;;  %v7388_v53 = vadd.f32 1e-08, %v7350_v19 }
 0x668   : > { %14154 = vrcp.f32 %v7389_v39  ;;  %v7416_v4 = vmul.f32 %v14147_v32, %v15891_v63 }
 0x669   : > { %14156 = vrcp.f32 %v7388_v53  ;;  %v7359_v49 = vpop.xlane.xlu1 %7358 }
 0x66a   : > { %v14149_v30 = vpop.eup %14148  ;;  %v7391_v48 = vadd.f32 1e-08, %v7359_v49  ;;  %13552 = vmatmul.mubr.msk.f32.vlgmr.msra.gmra.mrb[98].mxu0 %vm2151_vm2, %v7416_v4  ;;  %v7356_v46 = vpop.xlane.xlu0 %7355 }
 0x66b   : > { %v14151_v17 = vpop.eup %14150  ;;  %13560 = vmatpush3.msra.mxu0 %v16035_v0  ;;  %v7390_v10 = vadd.f32 1e-08, %v7356_v46  ;;  %v7417_v51 = vmul.f32 %v14149_v30, %v15899_v22  ;;  %13561 = vmatprep.mubr.msk.f32.mxu0 %vm14419_vm1, %v17181_v42 }
 0x66c   : > { %14158 = vrcp.f32 %v7391_v48  ;;  %13569 = vmatprep.subr.mxu0 %v17181_v42  ;;  %v7418_v63 = vmul.f32 %v14151_v17, %v15905_v47 }
 0x66d   : > { %14160 = vrcp.f32 %v7390_v10  ;;  %13557 = vmatmul.mubr.msk.f32.vlgmr.msra.gmra.mrb[110].mxu1 %vm2151_vm2, %v7417_v51  ;;  %v7365_v32 = vpop.xlane.xlu1 %7364 }
 0x66e   : > { %13565 = vmatpush3.msra.mxu1 %v16021_v9  ;;  %v7393_v4 = vadd.f32 1e-08, %v7365_v32  ;;  %13562 = vmatmul.mubr.msk.f32.vlgmr.msra.gmra.mrb[100].mxu0 %vm2151_vm2, %v7418_v63  ;;  %v7362_v53 = vpop.xlane.xlu0 %7361 }
 0x66f   : > { %v14153_v39 = vpop.eup %14152  ;;  %13570 = vmatpush3.msra.mxu0 %v16029_v43  ;;  %v7392_v22 = vadd.f32 1e-08, %v7362_v53  ;;  %13566 = vmatprep.mubr.msk.f32.mxu1 %vm14419_vm1, %v17181_v42 }
 0x670   : > { %14162 = vrcp.f32 %v7393_v4  ;;  %13574 = vmatprep.subr.mxu1 %v17181_v42  ;;  %v7419_v47 = vmul.f32 %v14153_v39, %v15915_v59  ;;  %13571 = vmatprep.mubr.msk.f32.mxu0 %vm14419_vm1, %v17181_v42 }
 0x671   : > { %14164 = vrcp.f32 %v7392_v22  ;;  %v7371_v48 = vpop.xlane.xlu1 %7370  ;;  %13579 = vmatprep.subr.mxu0 %v17181_v42 }
 0x672   : > { %v14155_v19 = vpop.eup %14154  ;;  %v7395_v27 = vadd.f32 1e-08, %v7371_v48  ;;  %13567 = vmatmul.mubr.msk.f32.vlgmr.msra.gmra.mrb[112].mxu1 %vm2151_vm2, %v7419_v47  ;;  %v7368_v11 = vpop.xlane.xlu0 %7367 }
 0x673   : > { %v14157_v9 = vpop.eup %14156  ;;  %13575 = vmatpush3.msra.mxu1 %v16039_v12  ;;  %v7394_v43 = vadd.f32 1e-08, %v7368_v11  ;;  %13576 = vmatprep.mubr.msk.f32.mxu1 %vm14419_vm1, %v17181_v42  ;;  %v7421_v0 = vmul.f32 %v14155_v19, %v15929_v61 }
 0x674   : > { %14166 = vrcp.f32 %v7395_v27  ;;  %13584 = vmatprep.subr.mxu1 %v17181_v42  ;;  %v7420_v59 = vmul.f32 %v14157_v9, %v15923_v6 }
 0x675   : > { %14168 = vrcp.f32 %v7394_v43  ;;  %v7377_v2 = vpop.xlane.xlu1 %7376 }
 0x676   : > { %v14159_v49 = vpop.eup %14158  ;;  %v7397_v30 = vadd.f32 1e-08, %v7377_v2  ;;  %13572 = vmatmul.mubr.msk.f32.vlgmr.msra.gmra.mrb[102].mxu0 %vm2151_vm2, %v7420_v59  ;;  %v7374_v46 = vpop.xlane.xlu0 %7373  ;;  %13577 = vmatmul.mubr.msk.f32.vlgmr.msra.gmra.mrb[114].mxu1 %vm2151_vm2, %v7421_v0 }
 0x677   : > { %v14161_v12 = vpop.eup %14160  ;;  %13580 = vmatpush3.msra.mxu0 %v16045_v7  ;;  %v7396_v17 = vadd.f32 1e-08, %v7374_v46  ;;  %13585 = vmatpush3.msra.mxu1 %v16049_v15  ;;  %v7423_v61 = vmul.f32 %v14159_v49, %v15945_v57 }
 0x678   : > { %14170 = vrcp.f32 %v7397_v30  ;;  %13581 = vmatprep.mubr.msk.f32.mxu0 %vm14419_vm1, %v17181_v42  ;;  %13586 = vmatprep.mubr.msk.f32.mxu1 %vm14419_vm1, %v17181_v42  ;;  %v7422_v6 = vmul.f32 %v14161_v12, %v15939_v25 }
 0x679   : > { %14172 = vrcp.f32 %v7396_v17  ;;  %v7380_v10 = vpop.xlane.xlu1 %7379  ;;  %13589 = vmatprep.subr.mxu0 %v17181_v42  ;;  %13594 = vmatprep.subr.mxu1 %v17181_v42 }
 0x67a   : > { %v14163_v7 = vpop.eup %14162  ;;  %v7398_v51 = vadd.f32 1e-08, %v7380_v10  ;;  %13582 = vmatmul.mubr.msk.f32.vlgmr.msra.gmra.mrb[104].mxu0 %vm2151_vm2, %v7422_v6  ;;  %13587 = vmatmul.mubr.msk.f32.vlgmr.msra.gmra.mrb[116].mxu1 %vm2151_vm2, %v7423_v61  ;;  %v7383_v15 = vpop.xlane.xlu0 %7382 }
 0x67b   : > { %v14165_v63 = vpop.eup %14164  ;;  %13590 = vmatpush3.msra.mxu0 %v16055_v38  ;;  %13595 = vmatpush3.msra.mxu1 %v16059_v36  ;;  %v7399_v25 = vadd.f32 1e-08, %v7383_v15  ;;  %v7425_v32 = vmul.f32 %v14163_v7, %v15961_v20 }
 0x67c   : > { %14174 = vrcp.f32 %v7398_v51  ;;  %13591 = vmatprep.mubr.msk.f32.mxu0 %vm14419_vm1, %v17181_v42  ;;  %13596 = vmatprep.mubr.msk.f32.mxu1 %vm14419_vm1, %v17181_v42  ;;  %v7424_v57 = vmul.f32 %v14165_v63, %v15955_v37 }
 0x67d   : > { %14176 = vrcp.f32 %v7399_v25  ;;  %v16183_v4 = vpop.permute.xlu1 %9194  ;;  %13599 = vmatprep.subr.mxu0 %v17181_v42  ;;  %13604 = vmatprep.subr.mxu1 %v17181_v42 }
 0x67e   : > { %v14167_v38 = vpop.eup %14166  ;;  %13592 = vmatmul.mubr.msk.f32.vlgmr.msra.gmra.mrb[106].mxu0 %vm2151_vm2, %v7424_v57  ;;  %13597 = vmatmul.mubr.msk.f32.vlgmr.msra.gmra.mrb[118].mxu1 %vm2151_vm2, %v7425_v32  ;;  %v16189_v36 = vpop.permute.xlu0 %9116 }
 0x67f   : > { %v14169_v53 = vpop.eup %14168  ;;  %13600 = vmatpush3.msra.mxu0 %v16065_v26  ;;  %13605 = vmatpush3.msra.mxu1 %v16069_v31  ;;  %v7427_v20 = vmul.f32 %v14167_v38, %v15977_v56 }
 0x680   : > { %13601 = vmatprep.mubr.msk.f32.mxu0 %vm14419_vm1, %v17181_v42  ;;  %13606 = vmatprep.mubr.msk.f32.mxu1 %vm14419_vm1, %v17181_v42  ;;  %v7426_v37 = vmul.f32 %v14169_v53, %v15971_v40 }
 0x681   : > { %v16199_v39 = vpop.permute.xlu1 %9352  ;;  %13609 = vmatprep.subr.mxu0 %v17181_v42  ;;  %13614 = vmatprep.subr.mxu1 %v17181_v42 }
 0x682   : > { %v14171_v22 = vpop.eup %14170  ;;  %13602 = vmatmul.mubr.msk.f32.vlgmr.msra.gmra.mrb[108].mxu0 %vm2151_vm2, %v7426_v37  ;;  %13607 = vmatmul.mubr.msk.f32.vlgmr.msra.gmra.mrb[120].mxu1 %vm2151_vm2, %v7427_v20  ;;  %v16205_v26 = vpop.permute.xlu0 %9274 }
 0x683   : > { %v14173_v31 = vpop.eup %14172  ;;  %13610 = vmatpush3.msra.mxu0 %v16075_v18  ;;  %13615 = vmatpush3.msra.mxu1 %v16079_v21  ;;  %v7429_v56 = vmul.f32 %v14171_v22, %v15993_v34 }
 0x684   : > { %13611 = vmatprep.mubr.msk.f32.mxu0 %vm14419_vm1, %v17181_v42  ;;  %13616 = vmatprep.mubr.msk.f32.mxu1 %vm14419_vm1, %v17181_v42  ;;  %v7428_v40 = vmul.f32 %v14173_v31, %v15987_v28 }
 0x685   : > { %v16215_v47 = vpop.permute.xlu1 %9350  ;;  %13619 = vmatprep.subr.mxu0 %v17181_v42  ;;  %13624 = vmatprep.subr.mxu1 %v17181_v42 }
 0x686   : > { %v14175_v48 = vpop.eup %14174  ;;  %13612 = vmatmul.mubr.msk.f32.vlgmr.msra.gmra.mrb[110].mxu0 %vm2151_vm2, %v7428_v40  ;;  %13617 = vmatmul.mubr.msk.f32.vlgmr.msra.gmra.mrb[122].mxu1 %vm2151_vm2, %v7429_v56  ;;  %v9273_v18 = vpop.permute.xlu0 %9272 }
 0x687   : > { %v14177_v21 = vpop.eup %14176  ;;  %13620 = vmatpush3.msra.mxu0 %v16085_v60  ;;  %13625 = vmatpush3.msra.mxu1 %v16089_v62  ;;  %v7430_v28 = vmul.f32 %v14175_v48, %v16001_v16 }
 0x688   : > { %13621 = vmatprep.mubr.msk.f32.mxu0 %vm14419_vm1, %v17181_v42  ;;  %13626 = vmatprep.mubr.msk.f32.mxu1 %vm14419_vm1, %v17181_v42  ;;  %v7431_v34 = vmul.f32 %v14177_v21, %v16009_v13 }
 0x689   : > { %v9509_v19 = vpop.permute.xlu1 %9508  ;;  %13629 = vmatprep.subr.mxu0 %v17181_v42  ;;  %13634 = vmatprep.subr.mxu1 %v17181_v42 }
 0x68a   : > { %13622 = vmatmul.mubr.msk.f32.vlgmr.msra.gmra.mrb[112].mxu0 %vm2151_vm2, %v7430_v28  ;;  %13627 = vmatmul.mubr.msk.f32.vlgmr.msra.gmra.mrb[124].mxu1 %vm2151_vm2, %v7431_v34  ;;  %v9431_v60 = vpop.permute.xlu0 %9430 }
 0x68b   : > { %13631 = vmatprep.mubr.msk.f32.mxu0 %vm14419_vm1, %v17181_v42  ;;  %13636 = vmatprep.mubr.msk.f32.mxu1 %vm14419_vm1, %v17181_v42 }
 0x68d   : > { %v9507_v13 = vpop.permute.xlu1 %9506 }
 0x68e   : > { %13630 = vmatpush3.xpose.msk.msra.mxu0 %vm420_vm0, %v16095_v41  ;;  %13635 = vmatpush3.xpose.msk.msra.mxu1 %vm420_vm0, %v16099_v24  ;;  %v9429_v16 = vpop.permute.xlu0 %9428 }
 0x68f   : > { %13639 = vmatprep.subr.mxu0 %v17181_v42  ;;  %13644 = vmatprep.subr.mxu1 %v17181_v42 }
 0x691   : > { %13632 = vmatmul.mubr.msk.f32.vlgmr.msra.gmra.mrb[114].mxu0 %vm420_vm0, %v16105_v5  ;;  %13637 = vmatmul.mubr.msk.f32.vlgmr.msra.gmra.mrb[126].mxu1 %vm420_vm0, %v16109_v35  ;;  %v9665_v62 = vpop.permute.xlu1 %9664 }
 0x692   : > { %13640 = vmatpush3.xpose.msk.msra.mxu0 %vm420_vm0, %v16113_v54  ;;  %13645 = vmatpush3.xpose.msk.msra.mxu1 %vm420_vm0, %v16115_v50  ;;  %v9587_v41 = vpop.permute.xlu0 %9586 }
 0x693   : > { %13641 = vmatprep.mubr.msk.f32.mxu0 %vm14419_vm1, %v17181_v42  ;;  %13646 = vmatprep.mubr.msk.f32.mxu1 %vm14419_vm1, %v17181_v42 }
 0x694   : > { %13649 = vmatprep.subr.mxu0 %v17181_v42  ;;  %13654 = vmatprep.subr.mxu1 %v17181_v42 }
 0x695   : > { %13642 = vmatmul.mubr.msk.f32.vlgmr.msra.gmra.mrb[116].mxu0 %vm420_vm0, %v16119_v58  ;;  %13647 = vmatmul.mubr.msk.f32.vlgmr.msra.gmra.mrb[128].mxu1 %vm420_vm0, %v16121_v8 }
 0x696   : > { %13650 = vmatpush3.xpose.msk.msra.mxu0 %vm420_vm0, %v16123_v29  ;;  %13655 = vmatpush3.xpose.msk.msra.mxu1 %vm420_vm0, %v16125_v52  ;;  %v9663_v29 = vpop.permute.xlu1 %9662  ;;  %v9585_v52 = vpop.permute.xlu0 %9584 }
 0x697   : > { %13651 = vmatprep.mubr.msk.f32.mxu0 %vm14419_vm1, %v17181_v42  ;;  %13656 = vmatprep.mubr.msk.f32.mxu1 %vm14419_vm1, %v17181_v42 }
 0x698   : > { %13659 = vmatprep.subr.mxu0 %v17181_v42  ;;  %13664 = vmatprep.subr.mxu1 %v17181_v42 }
 0x699   : > { %13652 = vmatmul.mubr.msk.f32.vlgmr.msra.gmra.mrb[118].mxu0 %vm420_vm0, %v16127_v33  ;;  %13657 = vmatmul.mubr.msk.f32.vlgmr.msra.gmra.mrb[130].mxu1 %vm420_vm0, %v16129_v23 }
 0x69a   : > { %13660 = vmatpush3.xpose.msk.msra.mxu0 %vm420_vm0, %v16131_v44  ;;  %13665 = vmatpush3.xpose.msk.msra.mxu1 %vm420_vm0, %v16133_v45  ;;  %v9821_v23 = vpop.permute.xlu1 %9820  ;;  %v9743_v45 = vpop.permute.xlu0 %9742 }
 0x69b   : > { %13661 = vmatprep.mubr.msk.f32.mxu0 %vm14419_vm1, %v17181_v42  ;;  %13666 = vmatprep.mubr.msk.f32.mxu1 %vm14419_vm1, %v17181_v42 }
 0x69c   : > { %13669 = vmatprep.subr.mxu0 %v17181_v42  ;;  %13674 = vmatprep.subr.mxu1 %v17181_v42 }
 0x69d   : > { %13662 = vmatmul.mubr.msk.f32.vlgmr.msra.gmra.mrb[120].mxu0 %vm420_vm0, %v16189_v36  ;;  %13667 = vmatmul.mubr.msk.f32.vlgmr.msra.gmra.mrb[132].mxu1 %vm420_vm0, %v16183_v4 }
 0x69e   : > { %13670 = vmatpush3.xpose.msk.msra.mxu0 %vm420_vm0, %v16205_v26  ;;  %13675 = vmatpush3.xpose.msk.msra.mxu1 %vm420_vm0, %v16199_v39  ;;  %v9819_v24 = vpop.permute.xlu1 %9818  ;;  %v9741_v5 = vpop.permute.xlu0 %9740 }
 0x69f   : > { %13671 = vmatprep.mubr.msk.f32.mxu0 %vm14419_vm1, %v17181_v42  ;;  %13676 = vmatprep.mubr.msk.f32.mxu1 %vm14419_vm1, %v17181_v42 }
 0x6a0   : > { %13679 = vmatprep.subr.mxu0 %v17181_v42  ;;  %13684 = vmatprep.subr.mxu1 %v17181_v42 }
 0x6a1   : > { %13672 = vmatmul.mubr.msk.f32.vlgmr.msra.gmra.mrb[122].mxu0 %vm420_vm0, %v9273_v18  ;;  %13677 = vmatmul.mubr.msk.f32.vlgmr.msra.gmra.mrb[134].mxu1 %vm420_vm0, %v16215_v47 }
 0x6a2   : > { %13680 = vmatpush3.xpose.msk.msra.mxu0 %vm420_vm0, %v9431_v60  ;;  %13685 = vmatpush3.xpose.msk.msra.mxu1 %vm420_vm0, %v9509_v19  ;;  %v10041_v35 = vpop.permute.xlu1 %10040  ;;  %v10117_v54 = vpop.permute.xlu0 %10116 }
 0x6a3   : > { %13681 = vmatprep.mubr.msk.f32.mxu0 %vm14419_vm1, %v17181_v42  ;;  %13686 = vmatprep.mubr.msk.f32.mxu1 %vm14419_vm1, %v17181_v42 }
 0x6a4   : > { %13689 = vmatprep.subr.mxu0 %v17181_v42  ;;  %13694 = vmatprep.subr.mxu1 %v17181_v42 }
 0x6a5   : > { %13682 = vmatmul.mubr.msk.f32.vlgmr.msra.gmra.mrb[124].mxu0 %vm420_vm0, %v9429_v16  ;;  %13687 = vmatmul.mubr.msk.f32.vlgmr.msra.gmra.mrb[136].mxu1 %vm420_vm0, %v9507_v13 }
 0x6a6   : > { %13690 = vmatpush3.xpose.msk.msra.mxu0 %vm420_vm0, %v9587_v41  ;;  %13695 = vmatpush3.xpose.msk.msra.mxu1 %vm420_vm0, %v9665_v62 }
 0x6a7   : > { %13691 = vmatprep.mubr.msk.f32.mxu0 %vm14419_vm1, %v17181_v42  ;;  %13696 = vmatprep.mubr.msk.f32.mxu1 %vm14419_vm1, %v17181_v42 }
 0x6a8   : > { %13699 = vmatprep.subr.mxu0 %v17181_v42  ;;  %13704 = vmatprep.subr.mxu1 %v17181_v42 }
 0x6a9   : > { %13692 = vmatmul.mubr.msk.f32.vlgmr.msra.gmra.mrb[126].mxu0 %vm420_vm0, %v9585_v52  ;;  %13697 = vmatmul.mubr.msk.f32.vlgmr.msra.gmra.mrb[138].mxu1 %vm420_vm0, %v9663_v29 }
 0x6aa   : > { %13700 = vmatpush3.xpose.msk.msra.mxu0 %vm420_vm0, %v9743_v45  ;;  %13705 = vmatpush3.xpose.msk.msra.mxu1 %vm420_vm0, %v9821_v23 }
 0x6ab   : > { %13701 = vmatprep.mubr.msk.f32.mxu0 %vm14419_vm1, %v17181_v42  ;;  %13706 = vmatprep.mubr.msk.f32.mxu1 %vm14419_vm1, %v17181_v42 }
 0x6ac   : > { %13709 = vmatprep.subr.mxu0 %v17181_v42  ;;  %13714 = vmatprep.subr.mxu1 %v17181_v42 }
 0x6ad   : > { %13702 = vmatmul.mubr.msk.f32.vlgmr.msra.gmra.mrb[128].mxu0 %vm420_vm0, %v9741_v5  ;;  %13707 = vmatmul.mubr.msk.f32.vlgmr.msra.gmra.mrb[140].mxu1 %vm420_vm0, %v9819_v24 }
 0x6ae   : > { %13710 = vmatpush3.msra.mxu0 %v10041_v35  ;;  %13715 = vmatpush3.msra.mxu1 %v10117_v54 }
 0x6af   : > { %13711 = vmatprep.mubr.msk.f32.mxu0 %vm14419_vm1, %v17181_v42  ;;  %13716 = vmatprep.mubr.msk.f32.mxu1 %vm14419_vm1, %v17181_v42 }
 0x6b0   : > { %13719 = vmatprep.subr.mxu0 %v17181_v42  ;;  %13724 = vmatprep.subr.mxu1 %v17181_v42 }
 0x73d   : > { %v16338_v50 = vpop.f32.mrb[98].mxu0 }
 0x73e   : > { %v13553_v58 = vpop.f32.mrb[99].mxu0 }
 0x740   : > { %v16340_v8 = vpop.f32.mrb[110].mxu1 }
 0x741   : > { %v13558_v33 = vpop.f32.mrb[111].mxu1  ;;  %v16342_v44 = vpop.f32.mrb[100].mxu0 }
 0x742   : > { %v13563_v27 = vpop.f32.mrb[101].mxu0 }
 0x745   : > { %v16344_v11 = vpop.f32.mrb[112].mxu1 }
 0x746   : > { %v13568_v9 = vpop.f32.mrb[113].mxu1 }
 0x749   : > { %v16346_v43 = vpop.f32.mrb[102].mxu0  ;;  %v16348_v59 = vpop.f32.mrb[114].mxu1 }
 0x74a   : > { %v13573_v0 = vpop.f32.mrb[103].mxu0  ;;  %v13578_v2 = vpop.f32.mrb[115].mxu1 }
 0x74d   : > { %v16350_v49 = vpop.f32.mrb[104].mxu0  ;;  %v16352_v30 = vpop.f32.mrb[116].mxu1 }
 0x74e   : > { %v13583_v46 = vpop.f32.mrb[105].mxu0  ;;  %v13588_v12 = vpop.f32.mrb[117].mxu1 }
 0x751   : > { %v16354_v17 = vpop.f32.mrb[106].mxu0  ;;  %v16356_v6 = vpop.f32.mrb[118].mxu1 }
 0x752   : > { %v13593_v61 = vpop.f32.mrb[107].mxu0  ;;  %v13598_v10 = vpop.f32.mrb[119].mxu1 }
 0x755   : > { %v16358_v7 = vpop.f32.mrb[108].mxu0  ;;  %v16360_v51 = vpop.f32.mrb[120].mxu1 }
 0x756   : > { %v13603_v15 = vpop.f32.mrb[109].mxu0  ;;  %v13608_v63 = vpop.f32.mrb[121].mxu1 }
 0x759   : > { %v16362_v25 = vpop.f32.mrb[110].mxu0  ;;  %v16364_v57 = vpop.f32.mrb[122].mxu1 }
 0x75a   : > { %v13613_v32 = vpop.f32.mrb[111].mxu0  ;;  %v13618_v4 = vpop.f32.mrb[123].mxu1 }
 0x75d   : > { %v16366_v38 = vpop.f32.mrb[112].mxu0  ;;  %v16368_v36 = vpop.f32.mrb[124].mxu1 }
 0x75e   : > { %v13623_v53 = vpop.f32.mrb[113].mxu0  ;;  %v13628_v37 = vpop.f32.mrb[125].mxu1 }
 0x764   : > { %v8722_v20 = vpop.f32.mrb[114].mxu0  ;;  %v8800_v39 = vpop.f32.mrb[126].mxu1 }
 0x765   : > { %v9896_v22 = vmul.f32 1.442695, %v8722_v20  ;;  %v9898_v26 = vmul.f32 1.442695, %v8800_v39  ;;  %v13633_v31 = vpop.f32.mrb[115].mxu0  ;;  %v13638_v40 = vpop.f32.mrb[127].mxu1 }
 0x767   : > { %14178 = vpow2.f32 %v9896_v22 }
 0x768   : > { %14180 = vpow2.f32 %v9898_v26  ;;  %v8878_v56 = vpop.f32.mrb[116].mxu0  ;;  %v8956_v47 = vpop.f32.mrb[128].mxu1 }
 0x769   : > { %v9900_v48 = vmul.f32 1.442695, %v8878_v56  ;;  %v9902_v18 = vmul.f32 1.442695, %v8956_v47  ;;  %v13643_v21 = vpop.f32.mrb[117].mxu0  ;;  %v13648_v28 = vpop.f32.mrb[129].mxu1 }
 0x76b   : > { %14182 = vpow2.f32 %v9900_v48  ;;  %v17308_v48 = vld [vmem:[#allocation16_spill] sm:$0xff] }
 0x76c   : > { %14184 = vpow2.f32 %v9902_v18  ;;  %v9034_v34 = vpop.f32.mrb[118].mxu0  ;;  %v9112_v19 = vpop.f32.mrb[130].mxu1 }
 0x76d   : > { %v9904_v60 = vmul.f32 1.442695, %v9034_v34  ;;  %v9906_v13 = vmul.f32 1.442695, %v9112_v19  ;;  %v13653_v16 = vpop.f32.mrb[119].mxu0  ;;  %v13658_v62 = vpop.f32.mrb[131].mxu1 }
 0x76e   : > { %v17309_v16 = vld [vmem:[#allocation19_spill] sm:$0xff] }
 0x76f   : > { %14186 = vpow2.f32 %v9904_v60 }
 0x770   : > { %14188 = vpow2.f32 %v9906_v13  ;;  %v9190_v41 = vpop.f32.mrb[120].mxu0  ;;  %v9268_v29 = vpop.f32.mrb[132].mxu1 }
 0x771   : > { %v14179_v52 = vpop.eup %14178  ;;  %v9908_v23 = vmul.f32 1.442695, %v9190_v41  ;;  %v9910_v45 = vmul.f32 1.442695, %v9268_v29  ;;  %v13663_v24 = vpop.f32.mrb[121].mxu0 }
 0x772   : > { %v13668_v5 = vpop.f32.mrb[133].mxu1  ;;  %v14181_v35 = vpop.eup %14180  ;;  %v16371_v54 = vmul.f32 %v15888_v1, %v14179_v52 }
 0x773   : > { %14190 = vpow2.f32 %v9908_v23  ;;  %v16374_v58 = vmul.f32 %v15896_v55, %v14181_v35  ;;  %v17310_v23 = vld [vmem:[#allocation15_spill] sm:$0xff] }
 0x774   : > { %14192 = vpow2.f32 %v9910_v45  ;;  %v9346_v33 = vpop.f32.mrb[122].mxu0  ;;  %v9424_v27 = vpop.f32.mrb[134].mxu1  ;;  %v9944_v9 = vsel %vm2151_vm2, %v16371_v54, 0.0 }
 0x775   : > { %v14183_v0 = vpop.eup %14182  ;;  %v9912_v2 = vmul.f32 1.442695, %v9346_v33  ;;  %v9914_v46 = vmul.f32 1.442695, %v9424_v27  ;;  %9945 = vadd.xlane.f32.xlu0 %v9944_v9  ;;  %v13673_v12 = vpop.f32.mrb[123].mxu0  ;;  %v9947_v61 = vsel %vm2151_vm2, %v16374_v58, 0.0 }
 0x776   : > { %v14185_v1 = vpop.eup %14184  ;;  %9948 = vadd.xlane.f32.xlu1 %v9947_v61  ;;  %v13678_v10 = vpop.f32.mrb[135].mxu1  ;;  %v16381_v55 = vmul.f32 %v15902_v3, %v14183_v0  ;;  %v17307_v3 = vld [vmem:[#allocation11_spill] sm:$0xff] }
 0x777   : > { %14194 = vpow2.f32 %v9912_v2  ;;  %v16386_v4 = vmul.f32 %v15912_v14, %v14185_v1  ;;  %v17311_v2 = vld [vmem:[#allocation44_spill] sm:$0xff]  ;;  %v17312_v61 = vld [vmem:[#allocation23_spill] sm:$0xff] }
 0x778   : > { %14196 = vpow2.f32 %v9914_v46  ;;  %v9502_v15 = vpop.f32.mrb[124].mxu0  ;;  %v9580_v63 = vpop.f32.mrb[136].mxu1  ;;  %v9950_v32 = vsel %vm2151_vm2, %v16381_v55, 0.0 }
 0x779   : > { %v14187_v53 = vpop.eup %14186  ;;  %v9916_v37 = vmul.f32 1.442695, %v9502_v15  ;;  %v9918_v20 = vmul.f32 1.442695, %v9580_v63  ;;  %9951 = vadd.xlane.f32.xlu0 %v9950_v32  ;;  %v13683_v39 = vpop.f32.mrb[125].mxu0  ;;  %v9953_v47 = vsel %vm2151_vm2, %v16386_v4, 0.0 }
 0x77a   : > { %v13688_v22 = vpop.f32.mrb[137].mxu1  ;;  %v14189_v26 = vpop.eup %14188  ;;  %v16394_v14 = vmul.f32 %v17308_v48, %v14187_v53  ;;  %v17313_v32 = vld [vmem:[#allocation47_spill] sm:$0xff]  ;;  %v17316_v48 = vld [vmem:[#allocation42_spill] sm:$0xff] }
 0x77b   : > { %14198 = vpow2.f32 %v9916_v37  ;;  %v16389_v31 = vmul.f32 %v17307_v3, %v14189_v26 }
 0x77c   : > { %14200 = vpow2.f32 %v9918_v20  ;;  %v9658_v40 = vpop.f32.mrb[126].mxu0  ;;  %v9736_v56 = vpop.f32.mrb[138].mxu1  ;;  %v9956_v52 = vsel %vm2151_vm2, %v16394_v14, 0.0  ;;  %v17314_v20 = vld [vmem:[#allocation46_spill] sm:$0xff] }
 0x77d   : > { %v14191_v18 = vpop.eup %14190  ;;  %v9920_v21 = vmul.f32 1.442695, %v9658_v40  ;;  %v9922_v28 = vmul.f32 1.442695, %v9736_v56  ;;  %v13693_v34 = vpop.f32.mrb[127].mxu0  ;;  %9954 = vadd.xlane.f32.xlu0 %v9953_v47  ;;  %v9959_v19 = vsel %vm2151_vm2, %v16389_v31, 0.0 }
 0x77e   : > { %v14193_v60 = vpop.eup %14192  ;;  %9960 = vadd.xlane.f32.xlu1 %v9959_v19  ;;  %v13698_v13 = vpop.f32.mrb[139].mxu1  ;;  %v16404_v45 = vmul.f32 %v17310_v23, %v14191_v18  ;;  %v17315_v40 = vld [vmem:[#allocation43_spill] sm:$0xff]  ;;  %v17317_v19 = vld [vmem:[#allocation45_spill] sm:$0xff]  ;;  %v17319_v23 = vld [vmem:[#allocation28_spill] sm:$0xff] }
 0x77f   : > { %14202 = vpow2.f32 %v9920_v21  ;;  %v16399_v62 = vmul.f32 %v17309_v16, %v14193_v60 }
 0x780   : > { %14204 = vpow2.f32 %v9922_v28  ;;  %v9814_v41 = vpop.f32.mrb[128].mxu0  ;;  %v9892_v29 = vpop.f32.mrb[140].mxu1  ;;  %v9962_v12 = vsel %vm2151_vm2, %v16404_v45, 0.0 }
 0x781   : > { %v14195_v24 = vpop.eup %14194  ;;  %v9924_v5 = vmul.f32 1.442695, %v9814_v41  ;;  %v13703_v35 = vpop.f32.mrb[129].mxu0  ;;  %9957 = vadd.xlane.f32.xlu0 %v9956_v52  ;;  %v9965_v33 = vsel %vm2151_vm2, %v16399_v62, 0.0  ;;  %v9926_v0 = vmul.f32 1.442695, %v9892_v29 }
 0x782   : > { %v14197_v27 = vpop.eup %14196  ;;  %9966 = vadd.xlane.f32.xlu1 %v9965_v33  ;;  %v13708_v9 = vpop.f32.mrb[141].mxu1  ;;  %v16414_v1 = vmul.f32 %v17312_v61, %v14195_v24  ;;  %v17318_v41 = vld [vmem:[#allocation48_spill] sm:$0xff]  ;;  %v17320_v24 = vld [vmem:[#allocation51_spill] sm:$0xff]  ;;  %v17322_v35 = vld [vmem:[#allocation29_spill] sm:$0xff] }
 0x783   : > { %14206 = vpow2.f32 %v9924_v5  ;;  %v16409_v46 = vmul.f32 %v17311_v2, %v14197_v27  ;;  %v17321_v5 = vld [vmem:[#allocation25_spill] sm:$0xff]  ;;  %v17323_v33 = vld [vmem:[#allocation27_spill] sm:$0xff]  ;;  %v16518_v61 = vpop.permute.xlu0 %10496 }
 0x784   : > { %14208 = vpow2.f32 %v9926_v0  ;;  %v9968_v37 = vsel %vm2151_vm2, %v16414_v1, 0.0  ;;  %v17324_v27 = vld [vmem:[#allocation49_spill] sm:$0xff]  ;;  %v17327_v9 = vld [vmem:[#allocation39_spill] sm:$0xff]  ;;  %v10193_v0 = vpop.permute.xlu1 %10192 }
 0x785   : > { %v14199_v10 = vpop.eup %14198  ;;  %9963 = vadd.xlane.f32.xlu0 %v9962_v12  ;;  %v9971_v15 = vsel %vm2151_vm2, %v16409_v46, 0.0  ;;  %v17333_v2 = vld [vmem:[#allocation41_spill] sm:$0xff]  ;;  %v17335_v12 = vld [vmem:[#allocation40_spill] sm:$0xff] }
 0x786   : > { %v14201_v63 = vpop.eup %14200  ;;  %9972 = vadd.xlane.f32.xlu1 %v9971_v15  ;;  %v16424_v39 = vmul.f32 %v17314_v20, %v14199_v10 }
 0x787   : > { %v16419_v53 = vmul.f32 %v17313_v32, %v14201_v63 }
 0x788   : > { %v9974_v47 = vsel %vm2151_vm2, %v16424_v39, 0.0 }
 0x789   : > { %v14203_v22 = vpop.eup %14202  ;;  %9969 = vadd.xlane.f32.xlu0 %v9968_v37  ;;  %v9977_v26 = vsel %vm2151_vm2, %v16419_v53, 0.0 }
 0x78a   : > { %v14205_v3 = vpop.eup %14204  ;;  %9978 = vadd.xlane.f32.xlu1 %v9977_v26  ;;  %v16434_v18 = vmul.f32 %v17316_v48, %v14203_v22 }
 0x78b   : > { %v16429_v56 = vmul.f32 %v17315_v40, %v14205_v3 }
 0x78c   : > { %v9980_v34 = vsel %vm2151_vm2, %v16434_v18, 0.0 }
 0x78d   : > { %v14207_v21 = vpop.eup %14206  ;;  %9975 = vadd.xlane.f32.xlu0 %v9974_v47  ;;  %v9983_v28 = vsel %vm2151_vm2, %v16429_v56, 0.0 }
 0x78e   : > { %9984 = vadd.xlane.f32.xlu1 %v9983_v28  ;;  %v16441_v60 = vmul.f32 %v17317_v19, %v14207_v21  ;;  %v14209_v13 = vpop.eup %14208 }
 0x78f   : > { %v16446_v29 = vmul.f32 %v17318_v41, %v14209_v13 }
 0x790   : > { %v9986_v16 = vsel %vm2151_vm2, %v16441_v60, 0.0 }
 0x791   : > { %9981 = vadd.xlane.f32.xlu0 %v9980_v34  ;;  %v9989_v52 = vsel %vm2151_vm2, %v16446_v29, 0.0 }
 0x795   : > { %9987 = vadd.xlane.f32.xlu0 %v9986_v16 }
 0x799   : > { %9990 = vadd.xlane.f32.xlu0 %v9989_v52 }
 0x79f   : > { %11180 = vrot.lane.b32.xlu1 %v17319_v23, %s14422_s22 }
 0x7a3   : > { %11274 = vrot.lane.b32.xlu1 %v17320_v24, %s14422_s22 }
 0x7a7   : > { %11338 = vrot.lane.b32.xlu1 %v16340_v8, %s14421_s18  ;;  %v17325_v8 = vld [vmem:[#allocation32_spill] sm:$0xff] }
 0x7ab   : > { %11278 = vrot.lane.b32.xlu1 %v17321_v5, %s14422_s22 }
 0x7af   : > { %11342 = vrot.lane.b32.xlu1 %v16344_v11, %s14421_s18  ;;  %11104 = vrot.lane.b32.xlu0 %v17322_v35, %s14422_s22  ;;  %v17326_v11 = vld [vmem:[#allocation50_spill] sm:$0xff] }
 0x7b3   : > { %11282 = vrot.lane.b32.xlu1 %v17323_v33, %s14422_s22  ;;  %11272 = vrot.lane.b32.xlu0 %v17324_v27, %s14422_s22 }
 0x7b7   : > { %11346 = vrot.lane.b32.xlu1 %v16348_v59, %s14421_s18  ;;  %11336 = vrot.lane.b32.xlu0 %v16338_v50, %s14421_s18  ;;  %v17328_v59 = vld [vmem:[#allocation26_spill] sm:$0xff] }
 0x7b8   : > { %v17329_v50 = vld [vmem:[#allocation38_spill] sm:$0xff] }
 0x7bb   : > { %11286 = vrot.lane.b32.xlu1 %v17325_v8, %s14422_s22  ;;  %11276 = vrot.lane.b32.xlu0 %v17326_v11, %s14422_s22 }
 0x7bf   : > { %11350 = vrot.lane.b32.xlu1 %v16352_v30, %s14421_s18  ;;  %11340 = vrot.lane.b32.xlu0 %v16342_v44, %s14421_s18  ;;  %v17330_v30 = vld [vmem:[#allocation30_spill] sm:$0xff]  ;;  %v17331_v44 = vld [vmem:[#allocation9_spill] sm:$0xff] }
 0x7c3   : > { %11290 = vrot.lane.b32.xlu1 %v17327_v9, %s14422_s22  ;;  %11280 = vrot.lane.b32.xlu0 %v17328_v59, %s14422_s22 }
 0x7c7   : > { %11354 = vrot.lane.b32.xlu1 %v16356_v6, %s14421_s18  ;;  %11344 = vrot.lane.b32.xlu0 %v16346_v43, %s14421_s18  ;;  %v17332_v6 = vld [vmem:[#allocation10_spill] sm:$0xff]  ;;  %v10269_v43 = vpop.permute.xlu1 %10268 }
 0x7cb   : > { %11294 = vrot.lane.b32.xlu1 %v17329_v50, %s14422_s22  ;;  %11284 = vrot.lane.b32.xlu0 %v17330_v30, %s14422_s22 }
 0x7cf   : > { %11358 = vrot.lane.b32.xlu1 %v16360_v51, %s14421_s18  ;;  %11348 = vrot.lane.b32.xlu0 %v16350_v49, %s14421_s18  ;;  %v17334_v51 = vld [vmem:[#allocation8_spill] sm:$0xff]  ;;  %v10345_v49 = vpop.permute.xlu1 %10344 }
 0x7d3   : > { %11298 = vrot.lane.b32.xlu1 %v17331_v44, %s14422_s22  ;;  %11288 = vrot.lane.b32.xlu0 %v17332_v6, %s14422_s22 }
 0x7d7   : > { %11362 = vrot.lane.b32.xlu1 %v16364_v57, %s14421_s18  ;;  %11352 = vrot.lane.b32.xlu0 %v16354_v17, %s14421_s18  ;;  %v16512_v57 = vpop.permute.xlu1 %10420  ;;  %v17336_v17 = vld [vmem:[#allocation12_spill] sm:$0xff] }
 0x7db   : > { %11302 = vrot.lane.b32.xlu1 %v17333_v2, %s14422_s22  ;;  %11292 = vrot.lane.b32.xlu0 %v17334_v51, %s14422_s22  ;;  %v16520_v10 = vpop.permute.xlu1 %10572 }
 0x7df   : > { %11366 = vrot.lane.b32.xlu1 %v16368_v36, %s14421_s18  ;;  %11356 = vrot.lane.b32.xlu0 %v16358_v7, %s14421_s18  ;;  %v16524_v7 = vpop.permute.xlu0 %10648  ;;  %v16526_v36 = vpop.permute.xlu1 %10724 }
 0x7e3   : > { %11296 = vrot.lane.b32.xlu0 %v17335_v12, %s14422_s22  ;;  %v16528_v15 = vpop.permute.xlu0 %10800  ;;  %v16530_v63 = vpop.permute.xlu1 %10876 }
 0x7e7   : > { %11360 = vrot.lane.b32.xlu0 %v16362_v25, %s14421_s18  ;;  %v16532_v32 = vpop.permute.xlu0 %10952  ;;  %v16534_v25 = vpop.permute.xlu1 %11028 }
 0x7eb   : > { %11300 = vrot.lane.b32.xlu0 %v17336_v17, %s14422_s22  ;;  %s16989_s22 = scalar_lea.hbm %s17045_s9, %s12788_s15 }
 0x7ef   : > { %11364 = vrot.lane.b32.xlu0 %v16366_v38, %s14421_s18 }
 0x802   : > { %v9946_v37 = vpop.xlane.xlu0 %9945 }
 0x803   : > { %v9992_v20 = vadd.f32 1e-08, %v9946_v37  ;;  %v9949_v22 = vpop.xlane.xlu1 %9948 }
 0x804   : > { %v9993_v26 = vadd.f32 1e-08, %v9949_v22 }
 0x805   : > { %14210 = vrcp.f32 %v9992_v20 }
 0x806   : > { %14212 = vrcp.f32 %v9993_v26  ;;  %v9952_v3 = vpop.xlane.xlu0 %9951 }
 0x807   : > { %v9994_v38 = vadd.f32 1e-08, %v9952_v3 }
 0x809   : > { %14214 = vrcp.f32 %v9994_v38  ;;  %v11498_v38 = vld [vmem:[%s17041_s5] sm:$0xff] }
 0x80a   : > { %v9955_v40 = vpop.xlane.xlu0 %9954 }
 0x80b   : > { %v9995_v47 = vadd.f32 1e-08, %v9955_v40  ;;  %v9961_v48 = vpop.xlane.xlu1 %9960  ;;  %v11499_v40 = vld [vmem:[%s17041_s5 + $0x8] sm:$0xff] }
 0x80c   : > { %v9997_v21 = vadd.f32 1e-08, %v9961_v48  ;;  %v11502_v48 = vld [vmem:[%s17041_s5 + $0x20] sm:$0xff] }
 0x80d   : > { %14216 = vrcp.f32 %v9995_v47  ;;  %v11501_v47 = vld [vmem:[%s17041_s5 + $0x18] sm:$0xff] }
 0x80e   : > { %v9958_v28 = vpop.xlane.xlu0 %9957  ;;  %14218 = vrcp.f32 %v9997_v21  ;;  %v11503_v21 = vld [vmem:[%s17041_s5 + $0x28] sm:$0xff] }
 0x80f   : > { %v14211_v34 = vpop.eup %14210  ;;  %v9996_v19 = vadd.f32 1e-08, %v9958_v28  ;;  %v9967_v13 = vpop.xlane.xlu1 %9966  ;;  %v13901_v28 = vpack.c.bf16 %v11503_v21, %v11502_v48 }
 0x810   : > { %v14213_v16 = vpop.eup %14212  ;;  %v9999_v41 = vadd.f32 1e-08, %v9967_v13  ;;  %v10024_v52 = vmul.f32 %v14211_v34, %v16371_v54  ;;  %v11504_v34 = vld [vmem:[%s17041_s5 + $0x30] sm:$0xff] }
 0x811   : > { %14220 = vrcp.f32 %v9996_v19  ;;  %v10025_v23 = vmul.f32 %v14213_v16, %v16374_v58  ;;  %v11505_v19 = vld [vmem:[%s17041_s5 + $0x38] sm:$0xff]  ;;  %v11506_v16 = vld [vmem:[%s17041_s5 + $0x40] sm:$0xff] }
 0x812   : > { %13712 = vmatmul.mubr.msk.f32.vlgmr.msra.gmra.mrb[130].mxu0 %vm2151_vm2, %v10024_v52  ;;  %v9964_v24 = vpop.xlane.xlu0 %9963  ;;  %14222 = vrcp.f32 %v9999_v41  ;;  %v13905_v13 = vpack.c.bf16 %v11505_v19, %v11504_v34  ;;  %v11507_v41 = vld [vmem:[%s17041_s5 + $0x48] sm:$0xff] }
 0x813   : > { %v14215_v5 = vpop.eup %14214  ;;  %13717 = vmatmul.mubr.msk.f32.vlgmr.msra.gmra.mrb[142].mxu1 %vm2151_vm2, %v10025_v23  ;;  %13720 = vmatpush3.msra.mxu0 %v10193_v0  ;;  %v9998_v35 = vadd.f32 1e-08, %v9964_v24  ;;  %v9973_v33 = vpop.xlane.xlu1 %9972  ;;  %v13909_v52 = vpack.c.bf16 %v11507_v41, %v11506_v16  ;;  %v11508_v23 = vld [vmem:[%s17041_s5 + $0x50] sm:$0xff]  ;;  %v11509_v24 = vld [vmem:[%s17041_s5 + $0x58] sm:$0xff] }
 0x814   : > { %13725 = vmatpush3.msra.mxu1 %v10269_v43  ;;  %v10001_v27 = vadd.f32 1e-08, %v9973_v33  ;;  %13721 = vmatprep.mubr.msk.f32.mxu0 %vm14419_vm1, %v17181_v42  ;;  %v10026_v54 = vmul.f32 %v14215_v5, %v16381_v55  ;;  %v13913_v5 = vpack.c.bf16 %v11509_v24, %v11508_v23  ;;  %v11511_v33 = vld [vmem:[%s17041_s5 + $0x68] sm:$0xff] }
 0x815   : > { %14224 = vrcp.f32 %v9998_v35  ;;  %13729 = vmatprep.subr.mxu0 %v17181_v42  ;;  %13726 = vmatprep.mubr.msk.f32.mxu1 %vm14419_vm1, %v17181_v42  ;;  %v11510_v35 = vld [vmem:[%s17041_s5 + $0x60] sm:$0xff] }
 0x816   : > { %13722 = vmatmul.mubr.msk.f32.vlgmr.msra.gmra.mrb[132].mxu0 %vm2151_vm2, %v10026_v54  ;;  %v9970_v58 = vpop.xlane.xlu0 %9969  ;;  %13734 = vmatprep.subr.mxu1 %v17181_v42  ;;  %14226 = vrcp.f32 %v10001_v27  ;;  %v13917_v27 = vpack.c.bf16 %v11511_v33, %v11510_v35  ;;  %v11512_v54 = vld [vmem:[%s17041_s5 + $0x70] sm:$0xff] }
 0x817   : > { %v14217_v8 = vpop.eup %14216  ;;  %13730 = vmatpush3.msra.mxu0 %v10345_v49  ;;  %v10000_v11 = vadd.f32 1e-08, %v9970_v58  ;;  %v9979_v9 = vpop.xlane.xlu1 %9978  ;;  %13731 = vmatprep.mubr.msk.f32.mxu0 %vm14419_vm1, %v17181_v42  ;;  %v11513_v58 = vld [vmem:[%s17041_s5 + $0x78] sm:$0xff] }
 0x818   : > { %v10003_v55 = vadd.f32 1e-08, %v9979_v9  ;;  %v10027_v59 = vmul.f32 %v14217_v8, %v16386_v4  ;;  %13739 = vmatprep.subr.mxu0 %v17181_v42  ;;  %v14219_v50 = vpop.eup %14218  ;;  %v13921_v8 = vpack.c.bf16 %v11513_v58, %v11512_v54 }
 0x819   : > { %14228 = vrcp.f32 %v10000_v11  ;;  %v10029_v2 = vmul.f32 %v14219_v50, %v16389_v31 }
 0x81a   : > { %13727 = vmatmul.mubr.msk.f32.vlgmr.msra.gmra.mrb[144].mxu1 %vm2151_vm2, %v10027_v59  ;;  %v9976_v30 = vpop.xlane.xlu0 %9975  ;;  %14230 = vrcp.f32 %v10003_v55 }
 0x81b   : > { %v14221_v44 = vpop.eup %14220  ;;  %13735 = vmatpush3.msra.mxu1 %v16512_v57  ;;  %v10002_v6 = vadd.f32 1e-08, %v9976_v30  ;;  %v9985_v0 = vpop.xlane.xlu1 %9984  ;;  %13736 = vmatprep.mubr.msk.f32.mxu1 %vm14419_vm1, %v17181_v42 }
 0x81c   : > { %v10005_v43 = vadd.f32 1e-08, %v9985_v0  ;;  %13744 = vmatprep.subr.mxu1 %v17181_v42  ;;  %v10028_v4 = vmul.f32 %v14221_v44, %v16394_v14  ;;  %v14223_v51 = vpop.eup %14222 }
 0x81d   : > { %14232 = vrcp.f32 %v10002_v6  ;;  %v10031_v14 = vmul.f32 %v14223_v51, %v16399_v62 }
 0x81e   : > { %13732 = vmatmul.mubr.msk.f32.vlgmr.msra.gmra.mrb[134].mxu0 %vm2151_vm2, %v10028_v4  ;;  %v9982_v49 = vpop.xlane.xlu0 %9981  ;;  %13737 = vmatmul.mubr.msk.f32.vlgmr.msra.gmra.mrb[146].mxu1 %vm2151_vm2, %v10029_v2  ;;  %14234 = vrcp.f32 %v10005_v43 }
 0x81f   : > { %v14225_v12 = vpop.eup %14224  ;;  %13740 = vmatpush3.msra.mxu0 %v16518_v61  ;;  %v10004_v57 = vadd.f32 1e-08, %v9982_v49  ;;  %13745 = vmatpush3.msra.mxu1 %v16520_v10 }
 0x820   : > { %13741 = vmatprep.mubr.msk.f32.mxu0 %vm14419_vm1, %v17181_v42  ;;  %13746 = vmatprep.mubr.msk.f32.mxu1 %vm14419_vm1, %v17181_v42  ;;  %v10030_v31 = vmul.f32 %v14225_v12, %v16404_v45  ;;  %v14227_v17 = vpop.eup %14226 }
 0x821   : > { %14236 = vrcp.f32 %v10004_v57  ;;  %13749 = vmatprep.subr.mxu0 %v17181_v42  ;;  %13754 = vmatprep.subr.mxu1 %v17181_v42  ;;  %v10033_v45 = vmul.f32 %v14227_v17, %v16409_v46 }
 0x822   : > { %13742 = vmatmul.mubr.msk.f32.vlgmr.msra.gmra.mrb[136].mxu0 %vm2151_vm2, %v10030_v31  ;;  %v9988_v61 = vpop.xlane.xlu0 %9987  ;;  %13747 = vmatmul.mubr.msk.f32.vlgmr.msra.gmra.mrb[148].mxu1 %vm2151_vm2, %v10031_v14 }
 0x823   : > { %v14229_v10 = vpop.eup %14228  ;;  %13750 = vmatpush3.msra.mxu0 %v16524_v7  ;;  %v10006_v37 = vadd.f32 1e-08, %v9988_v61  ;;  %13755 = vmatpush3.msra.mxu1 %v16526_v36 }
 0x824   : > { %13751 = vmatprep.mubr.msk.f32.mxu0 %vm14419_vm1, %v17181_v42  ;;  %13756 = vmatprep.mubr.msk.f32.mxu1 %vm14419_vm1, %v17181_v42  ;;  %v10032_v62 = vmul.f32 %v14229_v10, %v16414_v1  ;;  %v14231_v20 = vpop.eup %14230 }
 0x825   : > { %14238 = vrcp.f32 %v10006_v37  ;;  %13759 = vmatprep.subr.mxu0 %v17181_v42  ;;  %13764 = vmatprep.subr.mxu1 %v17181_v42  ;;  %v10035_v1 = vmul.f32 %v14231_v20, %v16419_v53 }
 0x826   : > { %13752 = vmatmul.mubr.msk.f32.vlgmr.msra.gmra.mrb[138].mxu0 %vm2151_vm2, %v10032_v62  ;;  %13757 = vmatmul.mubr.msk.f32.vlgmr.msra.gmra.mrb[150].mxu1 %vm2151_vm2, %v10033_v45  ;;  %v9991_v7 = vpop.xlane.xlu0 %9990 }
 0x827   : > { %v14233_v36 = vpop.eup %14232  ;;  %13760 = vmatpush3.msra.mxu0 %v16528_v15  ;;  %13765 = vmatpush3.msra.mxu1 %v16530_v63  ;;  %v10007_v22 = vadd.f32 1e-08, %v9991_v7  ;;  %v11181_v63 = vpop.permute.xlu1 %11180 }
 0x828   : > { %13761 = vmatprep.mubr.msk.f32.mxu0 %vm14419_vm1, %v17181_v42  ;;  %13766 = vmatprep.mubr.msk.f32.mxu1 %vm14419_vm1, %v17181_v42  ;;  %v10034_v46 = vmul.f32 %v14233_v36, %v16424_v39  ;;  %v14235_v26 = vpop.eup %14234 }
 0x829   : > { %14240 = vrcp.f32 %v10007_v22  ;;  %13769 = vmatprep.subr.mxu0 %v17181_v42  ;;  %13774 = vmatprep.subr.mxu1 %v17181_v42  ;;  %v10037_v39 = vmul.f32 %v14235_v26, %v16429_v56 }
 0x82a   : > { %13762 = vmatmul.mubr.msk.f32.vlgmr.msra.gmra.mrb[140].mxu0 %vm2151_vm2, %v10034_v46  ;;  %13767 = vmatmul.mubr.msk.f32.vlgmr.msra.gmra.mrb[152].mxu1 %vm2151_vm2, %v10035_v1  ;;  %v11105_v3 = vpop.permute.xlu0 %11104 }
 0x82b   : > { %v14237_v15 = vpop.eup %14236  ;;  %13770 = vmatpush3.msra.mxu0 %v16532_v32  ;;  %13775 = vmatpush3.msra.mxu1 %v16534_v25  ;;  %v11275_v31 = vpop.permute.xlu1 %11274 }
 0x82c   : > { %13771 = vmatprep.mubr.msk.f32.mxu0 %vm14419_vm1, %v17181_v42  ;;  %13776 = vmatprep.mubr.msk.f32.mxu1 %vm14419_vm1, %v17181_v42  ;;  %v10036_v53 = vmul.f32 %v14237_v15, %v16434_v18 }
 0x82d   : > { %13779 = vmatprep.subr.mxu0 %v17181_v42  ;;  %13784 = vmatprep.subr.mxu1 %v17181_v42 }
 0x82e   : > { %13772 = vmatmul.mubr.msk.f32.vlgmr.msra.gmra.mrb[142].mxu0 %vm2151_vm2, %v10036_v53  ;;  %13777 = vmatmul.mubr.msk.f32.vlgmr.msra.gmra.mrb[154].mxu1 %vm2151_vm2, %v10037_v39  ;;  %v11273_v14 = vpop.permute.xlu0 %11272 }
 0x82f   : > { %v14239_v32 = vpop.eup %14238  ;;  %13785 = vmatpush3.msra.mxu1 %v11181_v63  ;;  %13780 = vmatpush3.msra.mxu0 %v11105_v3  ;;  %v11339_v36 = vpop.permute.xlu1 %11338 }
 0x830   : > { %13781 = vmatprep.mubr.msk.f32.mxu0 %vm14419_vm1, %v17181_v42  ;;  %v10038_v18 = vmul.f32 %v14239_v32, %v16441_v60  ;;  %13786 = vmatprep.mubr.msk.f32.mxu1 %vm14419_vm1, %v17181_v42  ;;  %v11500_v60 = vld [vmem:[%s17041_s5 + $0x10] sm:$0xff]  ;;  %v13893_v42 = vpack.c.bf16 %v11499_v40, %v11498_v38 }
 0x832   : > { %13782 = vmatmul.mubr.msk.f32.vlgmr.msra.gmra.mrb[144].mxu0 %vm2151_vm2, %v10038_v18  ;;  %13894 = vmatprep.subr.bf16.mxu0 %v13893_v42  ;;  %v11337_v22 = vpop.permute.xlu0 %11336 }
 0x833   : > { %v14241_v56 = vpop.eup %14240  ;;  %13896 = vmatpush3.bf16.msra.mxu0 %v13893_v42  ;;  %v11279_v3 = vpop.permute.xlu1 %11278 }
 0x834   : > { %v10039_v25 = vmul.f32 %v14241_v56, %v16446_v29  ;;  %v13897_v29 = vpack.c.bf16 %v11501_v47, %v11500_v60 }
 0x836   : > { %13787 = vmatmul.mubr.msk.f32.vlgmr.msra.gmra.mrb[156].mxu1 %vm2151_vm2, %v10039_v25  ;;  %13898 = vmatprep.subr.bf16.mxu0 %v13897_v29  ;;  %v11277_v39 = vpop.permute.xlu0 %11276 }
 0x837   : > { %13900 = vmatpush3.bf16.msra.mxu0 %v13897_v29  ;;  %v11343_v25 = vpop.permute.xlu1 %11342 }
 0x838   : > { %13902 = vmatprep.subr.bf16.mxu0 %v13901_v28 }
 0x83a   : > { %v11341_v56 = vpop.permute.xlu0 %11340 }
 0x83b   : > { %13904 = vmatpush3.bf16.msra.mxu0 %v13901_v28  ;;  %v11283_v40 = vpop.permute.xlu1 %11282 }
 0x83c   : > { %13906 = vmatprep.subr.bf16.mxu0 %v13905_v13 }
 0x83e   : > { %v11281_v38 = vpop.permute.xlu0 %11280 }
 0x83f   : > { %13908 = vmatpush3.bf16.msra.mxu0 %v13905_v13  ;;  %v11347_v42 = vpop.permute.xlu1 %11346 }
 0x840   : > { %13910 = vmatprep.subr.bf16.mxu0 %v13909_v52 }
 0x842   : > { %v11345_v60 = vpop.permute.xlu0 %11344 }
 0x843   : > { %13912 = vmatpush3.bf16.msra.mxu0 %v13909_v52  ;;  %v11287_v29 = vpop.permute.xlu1 %11286 }
 0x844   : > { %13914 = vmatprep.subr.bf16.mxu0 %v13913_v5 }
 0x846   : > { %v11285_v47 = vpop.permute.xlu0 %11284 }
 0x847   : > { %13916 = vmatpush3.bf16.msra.mxu0 %v13913_v5  ;;  %v11351_v21 = vpop.permute.xlu1 %11350 }
 0x848   : > { %13918 = vmatprep.subr.bf16.mxu0 %v13917_v27 }
 0x84a   : > { %v11349_v48 = vpop.permute.xlu0 %11348 }
 0x84b   : > { %13920 = vmatpush3.bf16.msra.mxu0 %v13917_v27  ;;  %v11291_v34 = vpop.permute.xlu1 %11290 }
 0x84c   : > { %13922 = vmatprep.subr.bf16.mxu0 %v13921_v8 }
 0x84e   : > { %v11289_v28 = vpop.permute.xlu0 %11288 }
 0x84f   : > { %13924 = vmatpush3.bf16.msra.mxu0 %v13921_v8  ;;  %v11355_v13 = vpop.permute.xlu1 %11354 }
 0x852   : > { %v11353_v19 = vpop.permute.xlu0 %11352 }
 0x853   : > { %v16683_v41 = vpop.permute.xlu1 %11294 }
 0x856   : > { %v16681_v16 = vpop.permute.xlu0 %11292 }
 0x857   : > { %v16687_v23 = vpop.permute.xlu1 %11358 }
 0x85a   : > { %v16685_v52 = vpop.permute.xlu0 %11356 }
 0x85b   : > { %v16691_v5 = vpop.permute.xlu1 %11298 }
 0x85e   : > { %v16689_v24 = vpop.permute.xlu0 %11296 }
 0x85f   : > { %v16695_v33 = vpop.permute.xlu1 %11362 }
 0x862   : > { %v16693_v35 = vpop.permute.xlu0 %11360 }
 0x863   : > { %v16699_v54 = vpop.permute.xlu1 %11302 }
 0x866   : > { %v16697_v27 = vpop.permute.xlu0 %11300 }
 0x867   : > { %v16703_v8 = vpop.permute.xlu1 %11366 }
 0x86a   : > { %v16701_v58 = vpop.permute.xlu0 %11364 }
 0x8e5   : > { %v10112_v11 = vpop.f32.mrb[130].mxu0 }
 0x8e6   : > { %v10188_v9 = vpop.f32.mrb[142].mxu1  ;;  %v13713_v55 = vpop.f32.mrb[131].mxu0  ;;  %11400 = vrot.lane.b32.xlu0 %v10112_v11, %s14420_s29  ;;  %v17337_v11 = vld [vmem:[#allocation7_spill] sm:$0xff] }
 0x8e7   : > { %11402 = vrot.lane.b32.xlu1 %v10188_v9, %s14420_s29  ;;  %v13718_v59 = vpop.f32.mrb[143].mxu1  ;;  %v11448_v9 = vsel %vm420_vm0, %v17337_v11, %v11273_v14  ;;  %v17338_v55 = vld [vmem:[#allocation6_spill] sm:$0xff] }
 0x8e8   : > { %v11449_v59 = vsel %vm420_vm0, %v17338_v55, %v11275_v31  ;;  %v17348_v55 = vld [vmem:[#allocation60_spill] sm:$0xff] }
 0x8e9   : > { %v10264_v50 = vpop.f32.mrb[132].mxu0 }
 0x8ea   : > { %v13723_v30 = vpop.f32.mrb[133].mxu0  ;;  %11404 = vrot.lane.b32.xlu0 %v10264_v50, %s14420_s29  ;;  %v11465_v50 = vsel %vm11464_vm3, %v11448_v9, %v11337_v22 }
 0x8ed   : > { %v10340_v44 = vpop.f32.mrb[144].mxu1 }
 0x8ee   : > { %11406 = vrot.lane.b32.xlu1 %v10340_v44, %s14420_s29  ;;  %v13728_v6 = vpop.f32.mrb[145].mxu1  ;;  %v11466_v44 = vsel %vm11464_vm3, %v11449_v59, %v11339_v36 }
 0x8f1   : > { %v10416_v0 = vpop.f32.mrb[134].mxu0  ;;  %v10492_v43 = vpop.f32.mrb[146].mxu1 }
 0x8f2   : > { %v13733_v4 = vpop.f32.mrb[135].mxu0  ;;  %11408 = vrot.lane.b32.xlu0 %v10416_v0, %s14420_s29  ;;  %11410 = vrot.lane.b32.xlu1 %v10492_v43, %s14420_s29  ;;  %v13738_v2 = vpop.f32.mrb[147].mxu1 }
 0x8f3   : > { %v17339_v4 = vld [vmem:[#allocation52_spill] sm:$0xff] }
 0x8f4   : > { %v11450_v2 = vsel %vm420_vm0, %v17339_v4, %v11277_v39  ;;  %v17350_v4 = vld [vmem:[#allocation62_spill] sm:$0xff] }
 0x8f5   : > { %v10568_v51 = vpop.f32.mrb[136].mxu0  ;;  %v10644_v49 = vpop.f32.mrb[148].mxu1 }
 0x8f6   : > { %v13743_v12 = vpop.f32.mrb[137].mxu0  ;;  %11412 = vrot.lane.b32.xlu0 %v10568_v51, %s14420_s29  ;;  %11414 = vrot.lane.b32.xlu1 %v10644_v49, %s14420_s29  ;;  %v13748_v57 = vpop.f32.mrb[149].mxu1  ;;  %v11467_v51 = vsel %vm11464_vm3, %v11450_v2, %v11341_v56 }
 0x8f7   : > { %v17340_v57 = vld [vmem:[#allocation54_spill] sm:$0xff] }
 0x8f8   : > { %v11451_v31 = vsel %vm420_vm0, %v17340_v57, %v11279_v3 }
 0x8f9   : > { %v10720_v17 = vpop.f32.mrb[138].mxu0  ;;  %v10796_v61 = vpop.f32.mrb[150].mxu1  ;;  %v11468_v14 = vsel %vm11464_vm3, %v11451_v31, %v11343_v25 }
 0x8fa   : > { %v13753_v10 = vpop.f32.mrb[139].mxu0  ;;  %11416 = vrot.lane.b32.xlu0 %v10720_v17, %s14420_s29  ;;  %11418 = vrot.lane.b32.xlu1 %v10796_v61, %s14420_s29  ;;  %v13758_v37 = vpop.f32.mrb[151].mxu1 }
 0x8fb   : > { %v17341_v10 = vld [vmem:[#allocation56_spill] sm:$0xff] }
 0x8fc   : > { %v11453_v37 = vsel %vm420_vm0, %v17341_v10, %v11283_v40 }
 0x8fd   : > { %v10872_v62 = vpop.f32.mrb[140].mxu0  ;;  %v10948_v45 = vpop.f32.mrb[152].mxu1 }
 0x8fe   : > { %v13763_v20 = vpop.f32.mrb[141].mxu0  ;;  %11420 = vrot.lane.b32.xlu0 %v10872_v62, %s14420_s29  ;;  %11422 = vrot.lane.b32.xlu1 %v10948_v45, %s14420_s29  ;;  %v13768_v7 = vpop.f32.mrb[153].mxu1  ;;  %v17342_v62 = vld [vmem:[#allocation53_spill] sm:$0xff] }
 0x8ff   : > { %v11452_v45 = vsel %vm420_vm0, %v17342_v62, %v11281_v38  ;;  %v11470_v20 = vsel %vm11464_vm3, %v11453_v37, %v11347_v42  ;;  %v17345_v38 = vld [vmem:[#allocation59_spill] sm:$0xff] }
 0x900   : > { %v11469_v7 = vsel %vm11464_vm3, %v11452_v45, %v11345_v60  ;;  %v11457_v40 = vsel %vm420_vm0, %v17345_v38, %v11291_v34  ;;  %v17346_v60 = vld [vmem:[#allocation58_spill] sm:$0xff]  ;;  %v17347_v34 = vld [vmem:[#allocation61_spill] sm:$0xff]  ;;  %v11683_v45 = vld [vmem:[%s17043_s7 + $0x8] sm:$0xff] }
 0x901   : > { %v11024_v46 = vpop.f32.mrb[142].mxu0  ;;  %v11100_v1 = vpop.f32.mrb[154].mxu1  ;;  %v11456_v42 = vsel %vm420_vm0, %v17346_v60, %v11289_v28  ;;  %v11459_v28 = vsel %vm420_vm0, %v17347_v34, %v16683_v41 }
 0x902   : > { %v13773_v26 = vpop.f32.mrb[143].mxu0  ;;  %11424 = vrot.lane.b32.xlu0 %v11024_v46, %s14420_s29  ;;  %11426 = vrot.lane.b32.xlu1 %v11100_v1, %s14420_s29  ;;  %v13778_v15 = vpop.f32.mrb[155].mxu1 }
 0x903   : > { %v17343_v26 = vld [vmem:[#allocation57_spill] sm:$0xff] }
 0x904   : > { %v11455_v15 = vsel %vm420_vm0, %v17343_v26, %v11287_v29  ;;  %v11473_v29 = vsel %vm11464_vm3, %v11456_v42, %v11353_v19  ;;  %v11476_v19 = vsel %vm11464_vm3, %v11459_v28, %v16687_v23  ;;  %v11460_v23 = vsel %vm420_vm0, %v17350_v4, %v16689_v24  ;;  %v17351_v24 = vld [vmem:[#allocation64_spill] sm:$0xff] }
 0x905   : > { %v11176_v53 = vpop.f32.mrb[144].mxu0  ;;  %v11477_v2 = vsel %vm11464_vm3, %v11460_v23, %v16693_v35 }
 0x906   : > { %11428 = vrot.lane.b32.xlu0 %v11176_v53, %s14420_s29  ;;  %v13783_v63 = vpop.f32.mrb[145].mxu0  ;;  %v17344_v53 = vld [vmem:[#allocation55_spill] sm:$0xff] }
 0x907   : > { %v11454_v39 = vsel %vm420_vm0, %v17344_v53, %v11285_v47  ;;  %v11472_v63 = vsel %vm11464_vm3, %v11455_v15, %v11351_v21  ;;  %v11474_v47 = vsel %vm11464_vm3, %v11457_v40, %v11355_v13  ;;  %v11458_v13 = vsel %vm420_vm0, %v17348_v55, %v16681_v16  ;;  %v17349_v16 = vld [vmem:[#allocation63_spill] sm:$0xff] }
 0x908   : > { %v11471_v3 = vsel %vm11464_vm3, %v11454_v39, %v11349_v48  ;;  %v11475_v59 = vsel %vm11464_vm3, %v11458_v13, %v16685_v52  ;;  %v11461_v41 = vsel %vm420_vm0, %v17349_v16, %v16691_v5  ;;  %v11462_v5 = vsel %vm420_vm0, %v17351_v24, %v16697_v27 }
 0x909   : > { %v11252_v32 = vpop.f32.mrb[156].mxu1  ;;  %v11478_v52 = vsel %vm11464_vm3, %v11461_v41, %v16695_v33  ;;  %v11479_v33 = vsel %vm11464_vm3, %v11462_v5, %v16701_v58  ;;  %v11682_v58 = vld [vmem:[%s17043_s7] sm:$0xff] }
 0x90a   : > { %11430 = vrot.lane.b32.xlu1 %v11252_v32, %s14420_s29  ;;  %v13788_v18 = vpop.f32.mrb[157].mxu1 }
 0x958   : > { %v11401_v30 = vpop.permute.xlu0 %11400 }
 0x959   : > { %v11403_v6 = vpop.permute.xlu1 %11402  ;;  %v16712_v0 = vsel %vm11481_vm4, %v11465_v50, %v11401_v30 }
 0x95a   : > { %v16715_v43 = vsel %vm11481_vm4, %v11466_v44, %v11403_v6  ;;  %13821 = vmatprep.mubr.f32.mxu0 %v16712_v0 }
 0x95b   : > { %13822 = vmatmul.mubr.f32.vlgmr.msra.gmra.mrb[146].mxu0 %v16715_v43 }
 0x95c   : > { %v11405_v49 = vpop.permute.xlu0 %11404 }
 0x95d   : > { %v16723_v12 = vsel %vm11481_vm4, %v11467_v51, %v11405_v49 }
 0x95e   : > { %13824 = vmatprep.mubr.f32.mxu0 %v16723_v12 }
 0x960   : > { %v11407_v17 = vpop.permute.xlu1 %11406 }
 0x961   : > { %v16730_v61 = vsel %vm11481_vm4, %v11468_v14, %v11407_v17  ;;  %v17352_v17 = vld [vmem:[#allocation37_spill] sm:$0xff] }
 0x962   : > { %13825 = vmatmul.mubr.f32.gmra.mrb[148].mxu0 %v16730_v61  ;;  %v11463_v10 = vsel %vm420_vm0, %v17352_v17, %v16699_v54  ;;  %v11684_v54 = vld [vmem:[%s17043_s7 + $0x10] sm:$0xff] }
 0x963   : > { %v11480_v37 = vsel %vm11464_vm3, %v11463_v10, %v16703_v8  ;;  %v11685_v8 = vld [vmem:[%s17043_s7 + $0x18] sm:$0xff] }
 0x964   : > { %v11409_v36 = vpop.permute.xlu0 %11408  ;;  %v11411_v22 = vpop.permute.xlu1 %11410 }
 0x965   : > { %v16740_v46 = vsel %vm11481_vm4, %v11469_v7, %v11409_v36  ;;  %v16743_v1 = vsel %vm11481_vm4, %v11470_v20, %v11411_v22  ;;  %v13925_v20 = vpack.c.bf16 %v11683_v45, %v11682_v58  ;;  %v13929_v7 = vpack.c.bf16 %v11685_v8, %v11684_v54  ;;  %v16844_v36 = vld [vmem:[%s17042_s6] ss:$0 sm:$0xff] }
 0x966   : > { %13827 = vmatprep.mubr.f32.mxu0 %v16740_v46 }
 0x967   : > { %13828 = vmatmul.mubr.f32.gmra.mrb[150].mxu0 %v16743_v1  ;;  %13926 = vmatprep.subr.bf16.mxu1 %v13925_v20 }
 0x968   : > { %v11413_v32 = vpop.permute.xlu0 %11412  ;;  %v11415_v18 = vpop.permute.xlu1 %11414  ;;  %13928 = vmatpush3.bf16.msra.mxu1 %v13925_v20 }
 0x969   : > { %v16754_v56 = vsel %vm11481_vm4, %v11471_v3, %v11413_v32  ;;  %v16757_v25 = vsel %vm11481_vm4, %v11472_v63, %v11415_v18  ;;  %13930 = vmatprep.subr.bf16.mxu1 %v13929_v7 }
 0x96a   : > { %13830 = vmatprep.mubr.f32.mxu0 %v16754_v56 }
 0x96b   : > { %13831 = vmatmul.mubr.f32.gmra.mrb[152].mxu0 %v16757_v25 }
 0x96c   : > { %v11417_v48 = vpop.permute.xlu0 %11416  ;;  %v11419_v21 = vpop.permute.xlu1 %11418  ;;  %13932 = vmatpush3.bf16.msra.mxu1 %v13929_v7 }
 0x96d   : > { %v16768_v11 = vsel %vm11481_vm4, %v11473_v29, %v11417_v48  ;;  %v16771_v9 = vsel %vm11481_vm4, %v11474_v47, %v11419_v21 }
 0x96e   : > { %13833 = vmatprep.mubr.f32.mxu0 %v16768_v11 }
 0x96f   : > { %13834 = vmatmul.mubr.f32.gmra.mrb[154].mxu0 %v16771_v9 }
 0x970   : > { %v11421_v50 = vpop.permute.xlu0 %11420  ;;  %v11423_v30 = vpop.permute.xlu1 %11422 }
 0x971   : > { %v16786_v44 = vsel %vm11481_vm4, %v11475_v59, %v11421_v50  ;;  %v16789_v6 = vsel %vm11481_vm4, %v11476_v19, %v11423_v30 }
 0x972   : > { %13836 = vmatprep.mubr.f32.mxu0 %v16786_v44 }
 0x973   : > { %13837 = vmatmul.mubr.f32.gmra.mrb[156].mxu0 %v16789_v6 }
 0x974   : > { %v11425_v51 = vpop.permute.xlu0 %11424  ;;  %v11427_v49 = vpop.permute.xlu1 %11426 }
 0x975   : > { %v16804_v57 = vsel %vm11481_vm4, %v11477_v2, %v11425_v51  ;;  %v16807_v31 = vsel %vm11481_vm4, %v11478_v52, %v11427_v49 }
 0x976   : > { %13839 = vmatprep.mubr.f32.mxu0 %v16804_v57 }
 0x977   : > { %13840 = vmatmul.mubr.f32.gmra.mrb[158].mxu0 %v16807_v31 }
 0x978   : > { %v11429_v35 = vpop.permute.xlu0 %11428 }
 0x979   : > { %v16817_v14 = vsel %vm11481_vm4, %v11479_v33, %v11429_v35 }
 0x97a   : > { %13842 = vmatprep.mubr.f32.mxu0 %v16817_v14 }
 0x97c   : > { %v11431_v62 = vpop.permute.xlu1 %11430 }
 0x97d   : > { %v16826_v27 = vsel %vm11481_vm4, %v11480_v37, %v11431_v62 }
 0x97e   : > { %13843 = vmatmul.mubr.f32.gmra.mrb[160].mxu0 %v16826_v27 }
 0xa2e   : > { %v13823_v22 = vpop.f32.mrb[146].mxu0 }
 0xa2f   : > { %v11593_v26 = vadd.f32 %v13823_v22, %v16844_v36  ;;  %v11587_v15 = vpop.f32.mrb[147].mxu0 }
 0xa30   : > { %v11588_v53 = vadd.f32 %v16844_v36, %v11587_v15 }
 0xa32   : > { %14242 = vtanh.f32 %v11588_v53 }
 0xa33   : > { %14244 = vtanh.f32 %v11593_v26  ;;  %v16878_v26 = vstv %s11686_s24  ;;  %s14424_s24 = smov [#allocation3]  }
 0xa34   : > { %s14358_s29 = sshll.u32 %s14424_s24, 4  ;;  %s14359_s29 = int_to_ptr.vmem [resolvable:$false] %s14358_s29 }
 0xa35   : > { %v13826_v39 = vpop.f32.mrb[148].mxu0  ;;  %s14360_s25 = scalar_lea.vmem %s14359_s29, 512  ;;  %p14361_p0 = scmp.lt.s32.totalorder %s16982_s30, %s14359_s29 }
 0xa36   : > { %v11603_v63 = vadd.f32 %v13826_v39, %v16844_v36  ;;  %v11597_v3 = vpop.f32.mrb[149].mxu0  ;;  %p14362_p1 = scmp.lt.s32.totalorder %s14360_s25, %s14354_s23 }
 0xa37   : > { %v11598_v32 = vadd.f32 %v16844_v36, %v11597_v3 }
 0xa38   : > { %p14363_p2 = por %p14362_p1, %p14361_p0 }
 0xa39   : > { %14246 = vtanh.f32 %v11598_v32 }
 0xa3a   : > { %14248 = vtanh.f32 %v11603_v63  ;;  %v13829_v18 = vpop.f32.mrb[150].mxu0  ;;  %p14364_p3 = pnand %p14363_p2, %p14357_p13 }
 0xa3b   : > { %v11613_v38 = vadd.f32 %v13829_v18, %v16844_v36  ;;  %v11607_v40 = vpop.f32.mrb[151].mxu0 }
 0xa3c   : > { %v14243_v60 = vpop.eup %14242  ;;  %v11608_v42 = vadd.f32 %v16844_v36, %v11607_v40 }
 0xa3d   : > { %v14245_v47 = vpop.eup %14244  ;;  %13853 = vmatprep.mubr.msk.f32.mxu1 %vm420_vm0, %v14243_v60 }
 0xa3e   : > { %14250 = vtanh.f32 %v11608_v42  ;;  %v13832_v29 = vpop.f32.mrb[152].mxu0  ;;  %13854 = vmatmul.mubr.msk.f32.vlgmr.msra.gmra.mrb[158].mxu1 %vm420_vm0, %v14245_v47 }
 0xa3f   : > { %14252 = vtanh.f32 %v11613_v38  ;;  %v11623_v48 = vadd.f32 %v13832_v29, %v16844_v36  ;;  %v11617_v21 = vpop.f32.mrb[153].mxu0 }
 0xa40   : > { %v11618_v34 = vadd.f32 %v16844_v36, %v11617_v21 }
 0xa42   : > { %14254 = vtanh.f32 %v11618_v34  ;;  %v13835_v28 = vpop.f32.mrb[154].mxu0  ;;  %v11914_v34 = vld [vmem:[%s16889_s26 + $0x8] sm:$0xff] }
 0xa43   : > { %v14247_v55 = vpop.eup %14246  ;;  %14256 = vtanh.f32 %v11623_v48  ;;  %v11633_v13 = vadd.f32 %v13835_v28, %v16844_v36  ;;  %v11627_v19 = vpop.f32.mrb[155].mxu0 }
 0xa44   : > { %v14249_v59 = vpop.eup %14248  ;;  %v11628_v50 = vadd.f32 %v16844_v36, %v11627_v19  ;;  %13856 = vmatprep.mubr.msk.f32.mxu1 %vm420_vm0, %v14247_v55  ;;  %v11913_v55 = vld [vmem:[%s16889_s26] sm:$0xff] }
 0xa45   : > { %13857 = vmatmul.mubr.msk.f32.gmra.mrb[160].mxu1 %vm420_vm0, %v14249_v59 }
 0xa46   : > { %14258 = vtanh.f32 %v11628_v50  ;;  %v13838_v30 = vpop.f32.mrb[156].mxu0 }
 0xa47   : > { %14260 = vtanh.f32 %v11633_v13  ;;  %v11643_v16 = vadd.f32 %v13838_v30, %v16844_v36  ;;  %v11637_v41 = vpop.f32.mrb[157].mxu0 }
 0xa48   : > { %v14251_v4 = vpop.eup %14250  ;;  %v11638_v23 = vadd.f32 %v16844_v36, %v11637_v41 }
 0xa49   : > { %v14253_v52 = vpop.eup %14252  ;;  %13859 = vmatprep.mubr.msk.f32.mxu1 %vm420_vm0, %v14251_v4 }
 0xa4a   : > { %14262 = vtanh.f32 %v11638_v23  ;;  %v13841_v2 = vpop.f32.mrb[158].mxu0  ;;  %13860 = vmatmul.mubr.msk.f32.gmra.mrb[162].mxu1 %vm420_vm0, %v14253_v52 }
 0xa4b   : > { %14264 = vtanh.f32 %v11643_v16  ;;  %v11653_v51 = vadd.f32 %v13841_v2, %v16844_v36  ;;  %v11647_v49 = vpop.f32.mrb[159].mxu0 }
 0xa4c   : > { %v14255_v24 = vpop.eup %14254  ;;  %v11648_v5 = vadd.f32 %v16844_v36, %v11647_v49 }
 0xa4d   : > { %v14257_v33 = vpop.eup %14256  ;;  %13862 = vmatprep.mubr.msk.f32.mxu1 %vm420_vm0, %v14255_v24 }
 0xa4e   : > { %14266 = vtanh.f32 %v11648_v5  ;;  %13863 = vmatmul.mubr.msk.f32.gmra.mrb[164].mxu1 %vm420_vm0, %v14257_v33 }
 0xa4f   : > { %14268 = vtanh.f32 %v11653_v51 }
 0xa50   : > { %v14259_v35 = vpop.eup %14258 }
 0xa51   : > { %v14261_v17 = vpop.eup %14260  ;;  %v13844_v10 = vpop.f32.mrb[160].mxu0  ;;  %13865 = vmatprep.mubr.msk.f32.mxu1 %vm420_vm0, %v14259_v35 }
 0xa52   : > { %v11663_v37 = vadd.f32 %v13844_v10, %v16844_v36  ;;  %v11657_v62 = vpop.f32.mrb[161].mxu0  ;;  %13866 = vmatmul.mubr.msk.f32.gmra.mrb[166].mxu1 %vm420_vm0, %v14261_v17  ;;  %v11916_v17 = vld [vmem:[%s16889_s26 + $0x18] sm:$0xff] }
 0xa53   : > { %v11658_v58 = vadd.f32 %v16844_v36, %v11657_v62  ;;  %v14423_v36 = vmov 0  }
 0xa54   : > { %v14263_v45 = vpop.eup %14262  ;;  %13984 = vset.pattern.permute.xlu1 %v14423_v36  ;;  %13985 = vset.pattern.permute.xlu0 %v14423_v36 }
 0xa55   : > { %v14265_v20 = vpop.eup %14264  ;;  %14270 = vtanh.f32 %v11658_v58  ;;  %13868 = vmatprep.mubr.msk.f32.mxu1 %vm420_vm0, %v14263_v45  ;;  %v11915_v58 = vld [vmem:[%s16889_s26 + $0x10] sm:$0xff] }
 0xa56   : > { %14272 = vtanh.f32 %v11663_v37  ;;  %13869 = vmatmul.mubr.msk.f32.gmra.mrb[168].mxu1 %vm420_vm0, %v14265_v20 }
 0xa58   : > { %v14267_v54 = vpop.eup %14266 }
 0xa59   : > { %v14269_v8 = vpop.eup %14268  ;;  %13871 = vmatprep.mubr.msk.f32.mxu1 %vm420_vm0, %v14267_v54 }
 0xa5a   : > { %13872 = vmatmul.mubr.msk.f32.gmra.mrb[170].mxu1 %vm420_vm0, %v14269_v8 }
 0xa5f   : > { %v14271_v7 = vpop.eup %14270 }
 0xa60   : > { %v14273_v22 = vpop.eup %14272  ;;  %13874 = vmatprep.mubr.msk.f32.mxu1 %vm420_vm0, %v14271_v7 }
 0xa61   : > { %13875 = vmatmul.mubr.msk.f32.gmra.mrb[172].mxu1 %vm420_vm0, %v14273_v22 }
 0xb11   : > { %v13855_v15 = vpop.f32.mrb[158].mxu1 }
 0xb12   : > { %v11808_v53 = vadd.f32 %v13855_v15, %v16878_v26  ;;  %v11802_v39 = vpop.f32.mrb[159].mxu1 }
 0xb13   : > { %v11803_v63 = vadd.f32 %v11802_v39, %v16878_v26 }
 0xb14   : > { %v11883_v3 = vmul.f32 1.442695, %v11808_v53 }
 0xb15   : > { %v11881_v32 = vmul.f32 1.442695, %v11803_v63 }
 0xb16   : > { %14274 = vpow2.f32 %v11883_v3 }
 0xb17   : > { %14276 = vpow2.f32 %v11881_v32 }
 0xb18   : > { %v13858_v18 = vpop.f32.mrb[160].mxu1 }
 0xb19   : > { %v11818_v38 = vadd.f32 %v13858_v18, %v16878_v26  ;;  %v11812_v40 = vpop.f32.mrb[161].mxu1 }
 0xb1a   : > { %v11813_v60 = vadd.f32 %v11812_v40, %v16878_v26 }
 0xb1b   : > { %v11887_v42 = vmul.f32 1.442695, %v11818_v38 }
 0xb1c   : > { %v11885_v47 = vmul.f32 1.442695, %v11813_v60 }
 0xb1d   : > { %14278 = vpow2.f32 %v11887_v42  ;;  %v13861_v29 = vpop.f32.mrb[162].mxu1 }
 0xb1e   : > { %14280 = vpow2.f32 %v11885_v47  ;;  %v11828_v48 = vadd.f32 %v13861_v29, %v16878_v26  ;;  %v11822_v21 = vpop.f32.mrb[163].mxu1  ;;  %v11918_v47 = vld [vmem:[%s16889_s26 + $0x28] sm:$0xff] }
 0xb1f   : > { %v11823_v28 = vadd.f32 %v11822_v21, %v16878_v26 }
 0xb20   : > { %v14275_v13 = vpop.eup %14274  ;;  %v11891_v19 = vmul.f32 1.442695, %v11828_v48 }
 0xb21   : > { %v14277_v59 = vpop.eup %14276  ;;  %v11889_v50 = vmul.f32 1.442695, %v11823_v28  ;;  %v13864_v30 = vpop.f32.mrb[164].mxu1  ;;  %v11930_v16 = vmul.f32 %v14275_v13, %v11914_v34 }
 0xb22   : > { %14282 = vpow2.f32 %v11891_v19  ;;  %v11838_v41 = vadd.f32 %v13864_v30, %v16878_v26  ;;  %v11832_v4 = vpop.f32.mrb[165].mxu1  ;;  %v11929_v23 = vmul.f32 %v14277_v59, %v11913_v55 }
 0xb23   : > { %v11833_v52 = vadd.f32 %v11832_v4, %v16878_v26  ;;  %12081 = vperm.xlu1 %13984, %v11930_v16   ;;  %v11953_v2 = vsel %vm11945_vm5, %v11930_v16, 0.0  ;;  %14284 = vpow2.f32 %v11889_v50 }
 0xb24   : > { %v11895_v51 = vmul.f32 1.442695, %v11838_v41  ;;  %v11954_v49 = vrot.slane %v11953_v2, 4  ;;  %12076 = vperm.xlu0 %13985, %v11929_v23   ;;  %v11946_v24 = vsel %vm11945_vm5, %v11929_v23, 0.0  ;;  %v11917_v23 = vld [vmem:[%s16889_s26 + $0x20] sm:$0xff] }
 0xb25   : > { %v11893_v5 = vmul.f32 1.442695, %v11833_v52  ;;  %v11947_v33 = vrot.slane %v11946_v24, 4  ;;  %v13867_v35 = vpop.f32.mrb[166].mxu1  ;;  %v11920_v52 = vld [vmem:[%s16889_s26 + $0x38] sm:$0xff] }
 0xb26   : > { %14286 = vpow2.f32 %v11895_v51  ;;  %v11955_v10 = vadd.f32 %v11954_v49, %v11953_v2  ;;  %v11848_v37 = vadd.f32 %v13867_v35, %v16878_v26  ;;  %v11842_v62 = vpop.f32.mrb[167].mxu1 }
 0xb27   : > { %v14279_v45 = vpop.eup %14278  ;;  %14288 = vpow2.f32 %v11893_v5  ;;  %v11948_v20 = vadd.f32 %v11947_v33, %v11946_v24  ;;  %v11843_v54 = vadd.f32 %v11842_v62, %v16878_v26  ;;  %v11919_v33 = vld [vmem:[%s16889_s26 + $0x30] sm:$0xff] }
 0xb28   : > { %v14281_v8 = vpop.eup %14280  ;;  %v11956_v7 = vrot.slane %v11955_v10, 2  ;;  %v11899_v22 = vmul.f32 1.442695, %v11848_v37  ;;  %v11932_v36 = vmul.f32 %v14279_v45, %v11916_v17 }
 0xb29   : > { %v11949_v15 = vrot.slane %v11948_v20, 2  ;;  %v13870_v53 = vpop.f32.mrb[168].mxu1  ;;  %v11931_v39 = vmul.f32 %v14281_v8, %v11915_v58  ;;  %v11897_v40 = vmul.f32 1.442695, %v11843_v54 }
 0xb2a   : > { %v11957_v63 = vadd.f32 %v11956_v7, %v11955_v10  ;;  %14290 = vpow2.f32 %v11899_v22  ;;  %v11858_v3 = vadd.f32 %v13870_v53, %v16878_v26  ;;  %12091 = vperm.xlu1 %13984, %v11932_v36   ;;  %v11967_v32 = vsel %vm11945_vm5, %v11932_v36, 0.0  ;;  %v11852_v18 = vpop.f32.mrb[169].mxu1  ;;  %v11922_v7 = vld [vmem:[%s16889_s26 + $0x48] sm:$0xff] }
 0xb2b   : > { %v11950_v38 = vadd.f32 %v11949_v15, %v11948_v20  ;;  %v11968_v60 = vrot.slane %v11967_v32, 4  ;;  %v11853_v42 = vadd.f32 %v11852_v18, %v16878_v26  ;;  %v11960_v34 = vsel %vm11945_vm5, %v11931_v39, 0.0 }
 0xb2c   : > { %v14283_v29 = vpop.eup %14282  ;;  %v11958_v48 = vrot.slane %v11957_v63, 1  ;;  %v11903_v21 = vmul.f32 1.442695, %v11858_v3  ;;  %v11961_v19 = vrot.slane %v11960_v34, 4 }
 0xb2d   : > { %v11969_v28 = vadd.f32 %v11968_v60, %v11967_v32  ;;  %v11901_v55 = vmul.f32 1.442695, %v11853_v42  ;;  %v13873_v13 = vpop.f32.mrb[170].mxu1  ;;  %v11951_v59 = vrot.slane %v11950_v38, 1  ;;  %v11934_v16 = vmul.f32 %v14283_v29, %v11918_v47  ;;  %v14285_v41 = vpop.eup %14284 }
 0xb2e   : > { %14292 = vpow2.f32 %v11903_v21  ;;  %v11868_v50 = vadd.f32 %v13873_v13, %v16878_v26  ;;  %v11862_v30 = vpop.f32.mrb[171].mxu1  ;;  %12086 = vperm.xlu1 %13984, %v11931_v39   ;;  %v11959_v51 = vadd.f32 %v11958_v48, %v11957_v63  ;;  %v11962_v24 = vadd.f32 %v11961_v19, %v11960_v34 }
 0xb2f   : > { %14294 = vpow2.f32 %v11897_v40  ;;  %v11970_v4 = vrot.slane %v11969_v28, 2  ;;  %v11863_v49 = vadd.f32 %v11862_v30, %v16878_v26  ;;  %v11981_v5 = vsel %vm11945_vm5, %v11934_v16, 0.0 }
 0xb30   : > { %v14287_v2 = vpop.eup %14286  ;;  %14296 = vpow2.f32 %v11901_v55  ;;  %v11907_v10 = vmul.f32 1.442695, %v11868_v50  ;;  %v11982_v37 = vrot.slane %v11981_v5, 4  ;;  %v11952_v62 = vadd.f32 %v11951_v59, %v11950_v38  ;;  %v11924_v55 = vld [vmem:[%s16889_s26 + $0x58] sm:$0xff] }
 0xb31   : > { %v14289_v35 = vpop.eup %14288  ;;  %v11971_v17 = vadd.f32 %v11970_v4, %v11969_v28  ;;  %v11963_v58 = vrot.slane %v11962_v24, 2  ;;  %v11933_v45 = vmul.f32 %v14285_v41, %v11917_v23  ;;  %v11936_v20 = vmul.f32 %v14287_v2, %v11920_v52 }
 0xb32   : > { %12101 = vperm.xlu1 %13984, %v11934_v16   ;;  %v11983_v8 = vadd.f32 %v11982_v37, %v11981_v5  ;;  %v11935_v22 = vmul.f32 %v14289_v35, %v11919_v33  ;;  %v12059_v15 = vadd.f32 1e-08, %v11959_v51  ;;  %v11905_v53 = vmul.f32 1.442695, %v11863_v49  ;;  %v11921_v5 = vld [vmem:[%s16889_s26 + $0x40] sm:$0xff] }
 0xb33   : > { %v11972_v54 = vrot.slane %v11971_v17, 1  ;;  %v11964_v39 = vadd.f32 %v11963_v58, %v11962_v24  ;;  %v11974_v3 = vsel %vm11945_vm5, %v11933_v45, 0.0  ;;  %14298 = vpow2.f32 %v11907_v10  ;;  %v11923_v24 = vld [vmem:[%s16889_s26 + $0x50] sm:$0xff] }
 0xb34   : > { %v14291_v36 = vpop.eup %14290  ;;  %v13876_v63 = vpop.f32.mrb[172].mxu1  ;;  %v11984_v32 = vrot.slane %v11983_v8, 2  ;;  %v11995_v40 = vsel %vm11945_vm5, %v11936_v20, 0.0  ;;  %v12058_v60 = vadd.f32 1e-08, %v11952_v62  ;;  %v11975_v47 = vrot.slane %v11974_v3, 4 }
 0xb35   : > { %v11878_v18 = vadd.f32 %v13876_v63, %v16878_v26  ;;  %v11872_v38 = vpop.f32.mrb[173].mxu1  ;;  %v11938_v29 = vmul.f32 %v14291_v36, %v11922_v7  ;;  %v11973_v48 = vadd.f32 %v11972_v54, %v11971_v17  ;;  %v11965_v21 = vrot.slane %v11964_v39, 1 }
 0xb36   : > { %v11873_v42 = vadd.f32 %v11872_v38, %v16878_v26  ;;  %12096 = vperm.xlu1 %13984, %v11933_v45   ;;  %v11985_v34 = vadd.f32 %v11984_v32, %v11983_v8  ;;  %14300 = vrcp.f32 %v12059_v15  ;;  %v11976_v19 = vadd.f32 %v11975_v47, %v11974_v3 }
 0xb37   : > { %v11911_v28 = vmul.f32 1.442695, %v11878_v18  ;;  %v12009_v59 = vsel %vm11945_vm5, %v11938_v29, 0.0  ;;  %12121 = vperm.xlu0 %13985, %v11938_v29   ;;  %v11996_v50 = vrot.slane %v11995_v40, 4  ;;  %14302 = vpow2.f32 %v11905_v53 }
 0xb38   : > { %v14293_v13 = vpop.eup %14292  ;;  %v11986_v26 = vrot.slane %v11985_v34, 1  ;;  %v11909_v16 = vmul.f32 1.442695, %v11873_v42  ;;  %v12010_v41 = vrot.slane %v12009_v59, 4  ;;  %v11977_v4 = vrot.slane %v11976_v19, 2 }
 0xb39   : > { %v14295_v30 = vpop.eup %14294  ;;  %14304 = vpow2.f32 %v11911_v28  ;;  %v11940_v23 = vmul.f32 %v14293_v13, %v11924_v55  ;;  %v12061_v2 = vadd.f32 1e-08, %v11973_v48  ;;  %v11966_v51 = vadd.f32 %v11965_v21, %v11964_v39  ;;  %v11926_v39 = vld [vmem:[%s16889_s26 + $0x68] sm:$0xff] }
 0xb3a   : > { %12111 = vperm.xlu1 %13984, %v11936_v20   ;;  %v14297_v52 = vpop.eup %14296  ;;  %14306 = vrcp.f32 %v12058_v60  ;;  %v12011_v49 = vadd.f32 %v12010_v41, %v12009_v59  ;;  %v11978_v33 = vadd.f32 %v11977_v4, %v11976_v19  ;;  %v11997_v35 = vadd.f32 %v11996_v50, %v11995_v40  ;;  %v11925_v19 = vld [vmem:[%s16889_s26 + $0x60] sm:$0xff] }
 0xb3b   : > { %v12023_v17 = vsel %vm11945_vm5, %v11940_v23, 0.0  ;;  %12131 = vperm.xlu0 %13985, %v11940_v23   ;;  %v11988_v10 = vsel %vm11945_vm5, %v11935_v22, 0.0  ;;  %v11987_v37 = vadd.f32 %v11986_v26, %v11985_v34  ;;  %14308 = vpow2.f32 %v11909_v16  ;;  %v11928_v16 = vld [vmem:[%s16889_s26 + $0x78] sm:$0xff] }
 0xb3c   : > { %v12012_v62 = vrot.slane %v12011_v49, 2  ;;  %v12024_v58 = vrot.slane %v12023_v17, 4  ;;  %v11979_v45 = vrot.slane %v11978_v33, 1  ;;  %v11989_v20 = vrot.slane %v11988_v10, 4 }
 0xb3d   : > { %v11939_v54 = vmul.f32 %v14297_v52, %v11923_v24  ;;  %v11937_v8 = vmul.f32 %v14295_v30, %v11921_v5  ;;  %v14299_v7 = vpop.eup %14298  ;;  %14310 = vrcp.f32 %v12061_v2  ;;  %v12060_v36 = vadd.f32 1e-08, %v11966_v51 }
 0xb3e   : > { %12106 = vperm.xlu1 %13984, %v11935_v22   ;;  %v12013_v15 = vadd.f32 %v12012_v62, %v12011_v49  ;;  %v12025_v53 = vadd.f32 %v12024_v58, %v12023_v17  ;;  %v11998_v63 = vrot.slane %v11997_v35, 2  ;;  %v11990_v3 = vadd.f32 %v11989_v20, %v11988_v10 }
 0xb3f   : > { %v12016_v32 = vsel %vm11945_vm5, %v11939_v54, 0.0  ;;  %12126 = vperm.xlu0 %13985, %v11939_v54   ;;  %v12002_v18 = vsel %vm11945_vm5, %v11937_v8, 0.0  ;;  %v12063_v38 = vadd.f32 1e-08, %v11987_v37  ;;  %v11980_v47 = vadd.f32 %v11979_v45, %v11978_v33 }
 0xb40   : > { %v12014_v40 = vrot.slane %v12013_v15, 1  ;;  %v12026_v60 = vrot.slane %v12025_v53, 2  ;;  %v12017_v22 = vrot.slane %v12016_v32, 4  ;;  %v14301_v42 = vpop.eup %14300  ;;  %v11991_v29 = vrot.slane %v11990_v3, 2 }
 0xb41   : > { %v12003_v48 = vrot.slane %v12002_v18, 4  ;;  %v11942_v21 = vmul.f32 %v14299_v7, %v11926_v39  ;;  %v14303_v34 = vpop.eup %14302  ;;  %14312 = vrcp.f32 %v12060_v36  ;;  %v11999_v4 = vadd.f32 %v11998_v63, %v11997_v35  ;;  %v11927_v35 = vld [vmem:[%s16889_s26 + $0x70] sm:$0xff] }
 0xb42   : > { %12116 = vperm.xlu1 %13984, %v11937_v8   ;;  %v12015_v28 = vadd.f32 %v12014_v40, %v12013_v15  ;;  %v12027_v55 = vadd.f32 %v12026_v60, %v12025_v53  ;;  %v12018_v13 = vadd.f32 %v12017_v22, %v12016_v32  ;;  %v11992_v50 = vadd.f32 %v11991_v29, %v11990_v3 }
 0xb43   : > { %v14305_v59 = vpop.eup %14304  ;;  %v12004_v30 = vadd.f32 %v12003_v48, %v12002_v18  ;;  %v12037_v26 = vsel %vm11945_vm5, %v11942_v21, 0.0  ;;  %12141 = vperm.xlu0 %13985, %v11942_v21   ;;  %14314 = vrcp.f32 %v12063_v38  ;;  %v12062_v2 = vadd.f32 1e-08, %v11980_v47 }
 0xb44   : > { %v14307_v41 = vpop.eup %14306  ;;  %v12028_v23 = vrot.slane %v12027_v55, 1  ;;  %v12019_v52 = vrot.slane %v12018_v13, 2  ;;  %v12038_v49 = vrot.slane %v12037_v26, 4  ;;  %v11941_v24 = vmul.f32 %v14303_v34, %v11925_v19 }
 0xb45   : > { %v12005_v51 = vrot.slane %v12004_v30, 2  ;;  %v14309_v5 = vpop.eup %14308  ;;  %v12067_v33 = vadd.f32 1e-08, %v12015_v28  ;;  %v11944_v37 = vmul.f32 %v14305_v59, %v11928_v16  ;;  %v11993_v62 = vrot.slane %v11992_v50, 1 }
 0xb46   : > { %12284 = vperm.xlu1 %13984, %v14307_v41   ;;  %v12029_v17 = vadd.f32 %v12028_v23, %v12027_v55  ;;  %v12020_v10 = vadd.f32 %v12019_v52, %v12018_v13  ;;  %v12039_v45 = vadd.f32 %v12038_v49, %v12037_v26  ;;  %v12030_v20 = vsel %vm11945_vm5, %v11941_v24, 0.0 }
 0xb47   : > { %v12006_v58 = vadd.f32 %v12005_v51, %v12004_v30  ;;  %12136 = vperm.xlu0 %13985, %v11941_v24   ;;  %v14311_v54 = vpop.eup %14310  ;;  %v12031_v7 = vrot.slane %v12030_v20, 4  ;;  %v12051_v36 = vsel %vm11945_vm5, %v11944_v37, 0.0  ;;  %v12000_v15 = vrot.slane %v11999_v4, 1 }
 0xb48   : > { %v12021_v8 = vrot.slane %v12020_v10, 1  ;;  %v12040_v39 = vrot.slane %v12039_v45, 2  ;;  %v12052_v63 = vrot.slane %v12051_v36, 4  ;;  %14316 = vrcp.f32 %v12062_v2 }
 0xb49   : > { %v12007_v53 = vrot.slane %v12006_v58, 1  ;;  %v12069_v3 = vadd.f32 1e-08, %v12029_v17  ;;  %v12032_v32 = vadd.f32 %v12031_v7, %v12030_v20  ;;  %v11943_v18 = vmul.f32 %v14309_v5, %v11927_v35 }
 0xb4a   : > { %12299 = vperm.xlu1 %13984, %v14311_v54   ;;  %14318 = vrcp.f32 %v12067_v33  ;;  %v11994_v38 = vadd.f32 %v11993_v62, %v11992_v50  ;;  %v12041_v60 = vadd.f32 %v12040_v39, %v12039_v45  ;;  %v12022_v47 = vadd.f32 %v12021_v8, %v12020_v10 }
 0xb4b   : > { %v12008_v40 = vadd.f32 %v12007_v53, %v12006_v58  ;;  %12289 = vperm.xlu0 %13985, %v14301_v42   ;;  %v14313_v22 = vpop.eup %14312  ;;  %v12033_v29 = vrot.slane %v12032_v32, 2  ;;  %v12053_v48 = vadd.f32 %v12052_v63, %v12051_v36  ;;  %v12044_v21 = vsel %vm11945_vm5, %v11943_v18, 0.0 }
 0xb4c   : > { %v12042_v28 = vrot.slane %v12041_v60, 1  ;;  %v12045_v55 = vrot.slane %v12044_v21, 4  ;;  %14320 = vrcp.f32 %v12069_v3  ;;  %v12001_v59 = vadd.f32 %v12000_v15, %v11999_v4 }
 0xb4d   : > { %v12066_v34 = vadd.f32 1e-08, %v12008_v40  ;;  %v14315_v13 = vpop.eup %14314  ;;  %v12034_v19 = vadd.f32 %v12033_v29, %v12032_v32  ;;  %v12064_v30 = vadd.f32 1e-08, %v11994_v38  ;;  %v12068_v26 = vadd.f32 1e-08, %v12022_v47 }
 0xb4e   : > { %12294 = vperm.xlu1 %13984, %v14313_v22   ;;  %v12046_v50 = vadd.f32 %v12045_v55, %v12044_v21  ;;  %v12043_v42 = vadd.f32 %v12042_v28, %v12041_v60  ;;  %v12054_v41 = vrot.slane %v12053_v48, 2  ;;  %v12065_v52 = vadd.f32 1e-08, %v12001_v59 }
 0xb4f   : > { %14322 = vrcp.f32 %v12066_v34  ;;  %12151 = vperm.xlu0 %13985, %v11944_v37   ;;  %v12035_v16 = vrot.slane %v12034_v19, 1 }
 0xb50   : > { %v12047_v23 = vrot.slane %v12046_v50, 2  ;;  %14324 = vrcp.f32 %v12064_v30  ;;  %v12071_v49 = vadd.f32 1e-08, %v12043_v42  ;;  %v12055_v5 = vadd.f32 %v12054_v41, %v12053_v48 }
 0xb51   : > { %14326 = vrcp.f32 %v12068_v26  ;;  %v12036_v24 = vadd.f32 %v12035_v16, %v12034_v19 }
 0xb52   : > { %12309 = vperm.xlu1 %13984, %v14315_v13   ;;  %v12048_v2 = vadd.f32 %v12047_v23, %v12046_v50  ;;  %v14317_v51 = vpop.eup %14316  ;;  %14328 = vrcp.f32 %v12065_v52  ;;  %v12056_v37 = vrot.slane %v12055_v5, 1 }
 0xb53   : > { %12146 = vperm.xlu0 %13985, %v11943_v18   ;;  %14330 = vrcp.f32 %v12071_v49  ;;  %v12070_v10 = vadd.f32 1e-08, %v12036_v24 }
 0xb54   : > { %v14319_v4 = vpop.eup %14318  ;;  %v12049_v33 = vrot.slane %v12048_v2, 1  ;;  %v12057_v45 = vadd.f32 %v12056_v37, %v12055_v5 }
 0xb55   : > { %14332 = vrcp.f32 %v12070_v10 }
 0xb56   : > { %12304 = vperm.xlu1 %13984, %v14317_v51   ;;  %v14321_v17 = vpop.eup %14320  ;;  %v12050_v62 = vadd.f32 %v12049_v33, %v12048_v2  ;;  %v12073_v8 = vadd.f32 1e-08, %v12057_v45 }
 0xb57   : > { %12329 = vperm.xlu0 %13985, %v14319_v4  }
 0xb58   : > { %v12072_v20 = vadd.f32 1e-08, %v12050_v62 }
 0xb59   : > { %v14323_v58 = vpop.eup %14322 }
 0xb5a   : > { %12324 = vperm.xlu1 %13984, %v14323_v58   ;;  %v14325_v35 = vpop.eup %14324  ;;  %14334 = vrcp.f32 %v12072_v20 }
 0xb5b   : > { %12339 = vperm.xlu0 %13985, %v14321_v17   ;;  %v14327_v54 = vpop.eup %14326  ;;  %14336 = vrcp.f32 %v12073_v8 }
 0xb5c   : > { %v14329_v7 = vpop.eup %14328 }
 0xb5d   : > { %v14331_v36 = vpop.eup %14330 }
 0xb5e   : > { %12314 = vperm.xlu1 %13984, %v14325_v35  }
 0xb5f   : > { %12334 = vperm.xlu0 %13985, %v14327_v54   ;;  %v14333_v15 = vpop.eup %14332 }
 0xb62   : > { %12319 = vperm.xlu1 %13984, %v14329_v7  }
 0xb63   : > { %12349 = vperm.xlu0 %13985, %v14331_v36  }
 0xb64   : > { %v14335_v53 = vpop.eup %14334 }
 0xb65   : > { %v14337_v39 = vpop.eup %14336 }
 0xb67   : > { %12344 = vperm.xlu0 %13985, %v14333_v15  }
 0xb6b   : > { %12354 = vperm.xlu0 %13985, %v14335_v53  }
 0xb6f   : > { %12359 = vperm.xlu0 %13985, %v14337_v39  }
 0xba2   : > { %v12082_v63 = vpop.permute.xlu1 %12081 }
 0xba3   : > { %v12077_v38 = vpop.permute.xlu0 %12076  ;;  %v12155_v47 = vmul.f32 %v12082_v63, %v16715_v43 }
 0xba4   : > { %v12154_v29 = vmul.f32 %v12077_v38, %v16712_v0 }
 0xba5   : > { %v12176_v28 = vrot.slane %v12155_v47, 4 }
 0xba6   : > { %v12170_v55 = vrot.slane %v12154_v29, 4 }
 0xba7   : > { %v12177_v26 = vadd.f32 %v12176_v28, %v12155_v47 }
 0xba8   : > { %v12171_v42 = vadd.f32 %v12170_v55, %v12154_v29 }
 0xba9   : > { %v12092_v3 = vpop.permute.xlu1 %12091  ;;  %v12178_v52 = vrot.slane %v12177_v26, 2 }
 0xbaa   : > { %v12157_v19 = vmul.f32 %v12092_v3, %v16730_v61  ;;  %v12172_v2 = vrot.slane %v12171_v42, 2 }
 0xbab   : > { %v12179_v58 = vadd.f32 %v12178_v52, %v12177_v26 }
 0xbac   : > { %v12188_v41 = vrot.slane %v12157_v19, 4  ;;  %v12173_v62 = vadd.f32 %v12172_v2, %v12171_v42 }
 0xbad   : > { %v12087_v32 = vpop.permute.xlu1 %12086 }
 0xbae   : > { %v12156_v21 = vmul.f32 %v12087_v32, %v16723_v12  ;;  %v12189_v61 = vadd.f32 %v12188_v41, %v12157_v19  ;;  %v12174_v53 = vrot.slane %v12173_v62, 1 }
 0xbb0   : > { %v12182_v59 = vrot.slane %v12156_v21, 4 }
 0xbb1   : > { %v12102_v18 = vpop.permute.xlu1 %12101 }
 0xbb2   : > { %v12183_v43 = vadd.f32 %v12182_v59, %v12156_v21  ;;  %v12159_v51 = vmul.f32 %v12102_v18, %v16743_v1  ;;  %v12190_v1 = vrot.slane %v12189_v61, 2 }
 0xbb4   : > { %v12184_v24 = vrot.slane %v12183_v43, 2  ;;  %v12191_v3 = vadd.f32 %v12190_v1, %v12189_v61 }
 0xbb5   : > { %v12097_v40 = vpop.permute.xlu1 %12096 }
 0xbb6   : > { %v12122_v60 = vpop.permute.xlu0 %12121  ;;  %v12158_v30 = vmul.f32 %v12097_v40, %v16740_v46  ;;  %v12185_v8 = vadd.f32 %v12184_v24, %v12183_v43 }
 0xbb7   : > { %v12163_v46 = vmul.f32 %v12122_v60, %v16771_v9 }
 0xbb8   : > { %v12194_v23 = vrot.slane %v12158_v30, 4  ;;  %v12186_v38 = vrot.slane %v12185_v8, 1 }
 0xbb9   : > { %v12112_v22 = vpop.permute.xlu1 %12111  ;;  %v12224_v35 = vrot.slane %v12163_v46, 4 }
 0xbba   : > { %v12132_v48 = vpop.permute.xlu0 %12131  ;;  %v12195_v5 = vadd.f32 %v12194_v23, %v12158_v30  ;;  %v12161_v4 = vmul.f32 %v12112_v22, %v16757_v25 }
 0xbbb   : > { %v12225_v32 = vadd.f32 %v12224_v35, %v12163_v46 }
 0xbbc   : > { %v12196_v20 = vrot.slane %v12195_v5, 2  ;;  %v12212_v54 = vrot.slane %v12161_v4, 4 }
 0xbbd   : > { %v12107_v34 = vpop.permute.xlu1 %12106  ;;  %v12226_v59 = vrot.slane %v12225_v32, 2 }
 0xbbe   : > { %v12127_v13 = vpop.permute.xlu0 %12126  ;;  %v12160_v12 = vmul.f32 %v12107_v34, %v16754_v56  ;;  %v12200_v56 = vrot.slane %v12159_v51, 4  ;;  %v12213_v18 = vadd.f32 %v12212_v54, %v12161_v4  ;;  %v12197_v60 = vadd.f32 %v12196_v20, %v12195_v5 }
 0xbbf   : > { %v12164_v10 = vmul.f32 %v12127_v13, %v16786_v44  ;;  %v12180_v44 = vrot.slane %v12179_v58, 1  ;;  %v12175_v34 = vadd.f32 %v12174_v53, %v12173_v62  ;;  %v12227_v4 = vadd.f32 %v12226_v59, %v12225_v32 }
 0xbc0   : > { %v12206_v17 = vrot.slane %v12160_v12, 4  ;;  %v12201_v15 = vadd.f32 %v12200_v56, %v12159_v51  ;;  %v12214_v30 = vrot.slane %v12213_v18, 2  ;;  %v12198_v26 = vrot.slane %v12197_v60, 1 }
 0xbc1   : > { %v12117_v50 = vpop.permute.xlu1 %12116  ;;  %v12230_v36 = vrot.slane %v12164_v10, 4 }
 0xbc2   : > { %v12142_v16 = vpop.permute.xlu0 %12141  ;;  %v12162_v37 = vmul.f32 %v12117_v50, %v16768_v11  ;;  %v12207_v9 = vadd.f32 %v12206_v17, %v12160_v12  ;;  %v12165_v11 = vmul.f32 %v12132_v48, %v16789_v6  ;;  %v12202_v21 = vrot.slane %v12201_v15, 2 }
 0xbc3   : > { %v12231_v47 = vadd.f32 %v12230_v36, %v12164_v10  ;;  %v12167_v6 = vmul.f32 %v12142_v16, %v16807_v31  ;;  %v12192_v48 = vrot.slane %v12191_v3, 1  ;;  %v12187_v50 = vadd.f32 %v12186_v38, %v12185_v8 }
 0xbc4   : > { %v12218_v25 = vrot.slane %v12162_v37, 4  ;;  %v12208_v22 = vrot.slane %v12207_v9, 2  ;;  %v12236_v13 = vrot.slane %v12165_v11, 4  ;;  %v12203_v51 = vadd.f32 %v12202_v21, %v12201_v15 }
 0xbc5   : > { %v16940_v0 = vpop.permute.xlu1 %12284  ;;  %v12232_v41 = vrot.slane %v12231_v47, 2  ;;  %v12193_v61 = vadd.f32 %v12192_v48, %v12191_v3  ;;  %v12199_v46 = vadd.f32 %v12198_v26, %v12197_v60  ;;  %v12215_v17 = vadd.f32 %v12214_v30, %v12213_v18 }
 0xbc6   : > { %v12137_v49 = vpop.permute.xlu0 %12136  ;;  %v12219_v29 = vadd.f32 %v12218_v25, %v12162_v37  ;;  %v12209_v12 = vadd.f32 %v12208_v22, %v12207_v9  ;;  %v12237_v16 = vadd.f32 %v12236_v13, %v12165_v11  ;;  %v12362_v5 = vmul.f32 %v16940_v0, %v12175_v34 }
 0xbc7   : > { %v12166_v39 = vmul.f32 %v12137_v49, %v16804_v57  ;;  %v12181_v57 = vadd.f32 %v12180_v44, %v12179_v58  ;;  %v12233_v62 = vadd.f32 %v12232_v41, %v12231_v47  ;;  %v12204_v1 = vrot.slane %v12203_v51, 1 }
 0xbc8   : > { %v12220_v43 = vrot.slane %v12219_v29, 2  ;;  %v12238_v54 = vrot.slane %v12237_v16, 2  ;;  %v12228_v36 = vrot.slane %v12227_v4, 1  ;;  %v12216_v25 = vrot.slane %v12215_v17, 1 }
 0xbc9   : > { %v16946_v33 = vpop.permute.xlu1 %12299  ;;  %v12242_v28 = vrot.slane %v12166_v39, 4  ;;  %v12205_v11 = vadd.f32 %v12204_v1, %v12203_v51 }
 0xbca   : > { %v12290_v45 = vpop.permute.xlu0 %12289  ;;  %v12221_v37 = vadd.f32 %v12220_v43, %v12219_v29  ;;  %v12365_v9 = vmul.f32 %v16946_v33, %v12193_v61  ;;  %v12239_v33 = vadd.f32 %v12238_v54, %v12237_v16  ;;  %v12217_v21 = vadd.f32 %v12216_v25, %v12215_v17 }
 0xbcb   : > { %v12243_v52 = vadd.f32 %v12242_v28, %v12166_v39  ;;  %v12363_v2 = vmul.f32 %v12290_v45, %v12181_v57  ;;  %v12229_v28 = vadd.f32 %v12228_v36, %v12227_v4 }
 0xbcc   : > { %v12222_v53 = vrot.slane %v12221_v37, 1  ;;  %v12240_v26 = vrot.slane %v12239_v33, 1 }
 0xbcd   : > { %v12295_v7 = vpop.permute.xlu1 %12294  ;;  %v12244_v58 = vrot.slane %v12243_v52, 2  ;;  %v12395_v45 = vsel %vm12394_vm6, %v12363_v2, %v12362_v5 }
 0xbce   : > { %v12152_v63 = vpop.permute.xlu0 %12151  ;;  %v12364_v24 = vmul.f32 %v12295_v7, %v12187_v50  ;;  %v12223_v57 = vadd.f32 %v12222_v53, %v12221_v37  ;;  %v12241_v16 = vadd.f32 %v12240_v26, %v12239_v33 }
 0xbcf   : > { %v12169_v23 = vmul.f32 %v12152_v63, %v16826_v27  ;;  %v12210_v27 = vrot.slane %v12209_v12, 1  ;;  %v12234_v63 = vrot.slane %v12233_v62, 1  ;;  %v12245_v38 = vadd.f32 %v12244_v58, %v12243_v52 }
 0xbd0   : > { %v12397_v7 = vsel %vm12396_vm7, %v12364_v24, %v12395_v45 }
 0xbd1   : > { %v16952_v40 = vpop.permute.xlu1 %12309  ;;  %v12260_v10 = vrot.slane %v12169_v23, 4  ;;  %v12211_v39 = vadd.f32 %v12210_v27, %v12209_v12  ;;  %v12399_v32 = vsel %vm12398_vm8, %v12365_v9, %v12397_v7  ;;  %v12246_v59 = vrot.slane %v12245_v38, 1 }
 0xbd2   : > { %v12147_v55 = vpop.permute.xlu0 %12146  ;;  %v12367_v29 = vmul.f32 %v16952_v40, %v12205_v11 }
 0xbd3   : > { %v12168_v19 = vmul.f32 %v12147_v55, %v16817_v14  ;;  %v12248_v14 = vrot.slane %v12167_v6, 4  ;;  %v12261_v15 = vadd.f32 %v12260_v10, %v12169_v23  ;;  %v12235_v55 = vadd.f32 %v12234_v63, %v12233_v62 }
 0xbd4   : > { %v12247_v52 = vadd.f32 %v12246_v59, %v12245_v38 }
 0xbd5   : > { %v12305_v42 = vpop.permute.xlu1 %12304  ;;  %v12254_v49 = vrot.slane %v12168_v19, 4  ;;  %v12249_v8 = vadd.f32 %v12248_v14, %v12167_v6  ;;  %v12262_v34 = vrot.slane %v12261_v15, 2 }
 0xbd6   : > { %v16957_v31 = vpop.permute.xlu0 %12329  ;;  %v12366_v0 = vmul.f32 %v12305_v42, %v12199_v46 }
 0xbd7   : > { %v12255_v20 = vadd.f32 %v12254_v49, %v12168_v19  ;;  %v12250_v60 = vrot.slane %v12249_v8, 2  ;;  %v12371_v23 = vmul.f32 %v16957_v31, %v12229_v28  ;;  %v12263_v12 = vadd.f32 %v12262_v34, %v12261_v15 }
 0xbd8   : > { %v12401_v22 = vsel %vm12400_vm9, %v12366_v0, %v12399_v32 }
 0xbd9   : > { %v12325_v56 = vpop.permute.xlu1 %12324  ;;  %v12256_v3 = vrot.slane %v12255_v20, 2  ;;  %v12403_v6 = vsel %vm12402_vm10, %v12367_v29, %v12401_v22  ;;  %v12251_v41 = vadd.f32 %v12250_v60, %v12249_v8  ;;  %v12264_v46 = vrot.slane %v12263_v12, 1 }
 0xbda   : > { %v12340_v35 = vpop.permute.xlu0 %12339  ;;  %v12370_v50 = vmul.f32 %v12325_v56, %v12223_v57 }
 0xbdb   : > { %v12257_v30 = vadd.f32 %v12256_v3, %v12255_v20  ;;  %v12252_v14 = vrot.slane %v12251_v41, 1  ;;  %v12373_v5 = vmul.f32 %v12340_v35, %v12241_v16  ;;  %v12265_v62 = vadd.f32 %v12264_v46, %v12263_v12 }
 0xbdc   : > { %v12408_v49 = vsel %vm12394_vm6, %v12371_v23, %v12370_v50 }
 0xbdd   : > { %v12315_v44 = vpop.permute.xlu1 %12314  ;;  %v12258_v51 = vrot.slane %v12257_v30, 1  ;;  %v12253_v17 = vadd.f32 %v12252_v14, %v12251_v41 }
 0xbde   : > { %v12335_v18 = vpop.permute.xlu0 %12334  ;;  %v12368_v47 = vmul.f32 %v12315_v44, %v12211_v39 }
 0xbdf   : > { %v12372_v40 = vmul.f32 %v12335_v18, %v12235_v55  ;;  %v12259_v31 = vadd.f32 %v12258_v51, %v12257_v30 }
 0xbe0   : > { %v12405_v42 = vsel %vm12404_vm11, %v12368_v47, %v12403_v6 }
 0xbe1   : > { %v12320_v13 = vpop.permute.xlu1 %12319  ;;  %v12409_v61 = vsel %vm12396_vm7, %v12372_v40, %v12408_v49 }
 0xbe2   : > { %v12369_v48 = vmul.f32 %v12320_v13, %v12217_v21  ;;  %v12350_v19 = vpop.permute.xlu0 %12349  ;;  %v12410_v10 = vsel %vm12398_vm8, %v12373_v5, %v12409_v61 }
 0xbe3   : > { %v12375_v27 = vmul.f32 %v12350_v19, %v12253_v17 }
 0xbe4   : > { %v12407_v43 = vsel %vm12406_vm12, %v12369_v48, %v12405_v42 }
 0xbe5   : > { %12417 = vst [vmem:[%s16973_s27] sm:$0xff] %v12407_v43 }
 0xbe6   : > { %v12345_v2 = vpop.permute.xlu0 %12344 }
 0xbe7   : > { %v12374_v24 = vmul.f32 %v12345_v2, %v12247_v52 }
 0xbe9   : > { %v12411_v37 = vsel %vm12400_vm9, %v12374_v24, %v12410_v10 }
 0xbea   : > { %v12355_v4 = vpop.permute.xlu0 %12354  ;;  %v12412_v45 = vsel %vm12402_vm10, %v12375_v27, %v12411_v37 }
 0xbeb   : > { %v12376_v56 = vmul.f32 %v12355_v4, %v12259_v31 }
 0xbed   : > { %v12413_v20 = vsel %vm12404_vm11, %v12376_v56, %v12412_v45 }
 0xbee   : > { %v12360_v58 = vpop.permute.xlu0 %12359 }
 0xbef   : > { %v12377_v1 = vmul.f32 %v12360_v58, %v12265_v62 }
 0xbf1   : > { %v12414_v35 = vsel %vm12406_vm12, %v12377_v1, %v12413_v20 }
 0xbf2   : > { %12418 = vst [vmem:[%s16973_s27 + $0x8] sm:$0xff] %v12414_v35 }
 0xbf3   : > { %14367 = shalt.err (!%p14364_p3)
}
 0xbf4   : > { %s14368_s26 = scalar_lea.hbm %s16989_s22, 256  ;;  %s14372_s27 = scalar_lea.hbm %s17045_s9, 512 }
 0xbf5   : > { %p14369_p4 = scmp.ne.s32.totalorder %s16989_s22, %s14368_s26  ;;  %p14373_p9 = scmp.lt.u32.totalorder %s16989_s22, %s17045_s9 }
 0xbf6   : > { %p14374_p10 = scmp.lt.u32.totalorder %s14372_s27, %s14368_s26  ;;  %p14376_p12 = scmp.lt.u32.totalorder %s14368_s26, %s16989_s22 }
 0xbf7   : > { %p14370_p7 = pnand %p14369_p4, %p14518_p5 }
 0xbf8   : > { %p14375_p11 = por %p14374_p10, %p14373_p9 }
 0xbf9   : > { %p14371_p8 = pneg %p14370_p7 }
 0xbfa   : > { %p14377_p13 = por %p14376_p12, %p14375_p11 }
 0xbfc   : > { %p14378_p0 = pnand %p14377_p13, %p14371_p8 }
 0xbfe   : > { %14381 = shalt.err (!%p14378_p0)
}
 0xbff   : > { %s14425_s18 = smov 128   ;;  %s14426_s23 = smov 8  }
 0xc00   : > { %13937 = dma.vmem_to_hbm [thread:$0]  (%p14518_p5), %s16982_s30, 256, %s16989_s22, %s16995_s8, %s14425_s18, %s14425_s18, %s14426_s23  }
 0xc01 PF: > { %p13943_p1 = scmp.ge.s32.totalorder %s14416_s14, 2  ;;  %s12448_s24 = sand.u32 1, %s14404_s11  }
 0xc02   : > { %s12449_s29 = scalar_lea.sflag [#allocation4], %s12448_s24 }
 0xc03   : > { %p13940_p2 = pnand %p13943_p1, %p14522_p6 }
 0xc05   : > { %14399 = dma.done.wait (!%p13940_p2), %s12449_s29, 256  }
 0xc06   : > { %14401 = vsyncadd (!%p13940_p2), %s12449_s29, 4294967040  ;;  %p20_p3 = scmp.ge.s32.totalorder %s14505_s16, 4   ;;  %s17353_s11 = smov %s14408_s12 }
 0xc07   : > { %s17354_s12 = smov %s14412_s13  ;;  %s17355_s13 = smov %s14516_s19 }
 0xc08   : > { %s17356_s14 = smov %s14505_s16  ;;  %22 = sbr.rel (!%p20_p3) target bundleno = 5 (0x5), region = 97 }
 0xc0f   :  { %12454 = vsyncpa [#allocation4], 1 }
 0xc10   :  { %12456 = vsyncpa [#allocation4 + $0x1], 1 }

</bundles_post_ra>
